<compile_context>
chip_gen: v6e
topology: v6e:2x2x1
jax: 0.10.0
libtpu: 0.0.40
codegen_flags: <defaults>
</compile_context>

<pallas_src>
import jax
import jax.numpy as jnp
from jax.experimental import pallas as pl
from jax.experimental.pallas import tpu as pltpu

# ---------------------------------------------------------------- config ----
VOCAB = 64
HIDDEN = 128
NUM_LAYERS = 2
NUM_HEADS = 4
HEAD_DIM = HIDDEN // NUM_HEADS
INTERMEDIATE = 256
MAX_POS = 64
TYPE_VOCAB = 2
NUM_LABELS = 2
PAD_IDX = 1            # RoBERTa pad_token_id
LN_EPS = 1e-5
SEQ = 16
LANE = 128             # lane-padded width for the classifier output


def _spec(shape):
    # whole-array block; grid=(1,) + 1 scalar-prefetch ref -> index_map(i, ids)
    n = len(shape)
    return pl.BlockSpec(shape, lambda i, ids_ref, _n=n: (0,) * _n)


# ---------------------------------------------------------------- kernel ----
def _layer_norm_f32(x, g, b, eps):
    # One-pass LN: var = E[x^2] - mean^2 (saves one cross-lane reduction).
    mean = jnp.mean(x, axis=-1, keepdims=True)
    mean_sq = jnp.mean(x * x, axis=-1, keepdims=True)
    var = mean_sq - mean * mean
    return (x - mean) * jax.lax.rsqrt(var + eps) * g + b


def _fused_forward_kernel(
    # scalar prefetch (SMEM)
    ids_ref,
    # embedding tables + embedding LN
    word_ref, pos_ref, type_ref, emb_g_ref, emb_b_ref,
    # encoder weights, stacked over layers on the leading axis
    wqkv_ref, bqkv_ref, wo_ref, bo_ref, ln1g_ref, ln1b_ref,
    wi_ref, bi_ref, wf_ref, bf_ref, ln2g_ref, ln2b_ref,
    # classification head
    cls_w1_ref, cls_b1_ref, cls_w2_ref, cls_b2_ref,
    # outputs
    h_out_ref, logits_ref,
):
    scale = 1.0 / float(HEAD_DIM) ** 0.5

    # ---- RobertaEmbedding: in-kernel position-id cumsum + row gathers ------
    # create_position_ids_from_input_ids: pos = cumsum(mask)*mask + pad_idx
    count = jnp.int32(0)
    rows = []
    for s in range(SEQ):
        tok = ids_ref[s]
        is_real = (tok != PAD_IDX).astype(jnp.int32)
        count = count + is_real
        pos_id = count * is_real + PAD_IDX
        we_row = word_ref[pl.ds(tok, 1), :]      # [1, HIDDEN] dynamic gather
        pe_row = pos_ref[pl.ds(pos_id, 1), :]    # [1, HIDDEN] dynamic gather
        rows.append(we_row + pe_row)
    x = jnp.concatenate(rows, axis=0)            # [SEQ, HIDDEN], stays in vregs
    x = x + type_ref[0:1, :]                     # token_type_ids == 0
    x = _layer_norm_f32(x.astype(jnp.float32),
                        emb_g_ref[...], emb_b_ref[...], LN_EPS)

    # ---- BertModel encoder layers (statically unrolled) --------------------
    # TODO(synk): no attention padding mask (inputs contain no PAD tokens).
    for l in range(NUM_LAYERS):
        xb = x.astype(jnp.bfloat16)

        # Fused QKV projection: single MXU op with N = 3*H.
        qkv = jnp.dot(xb, wqkv_ref[l], preferred_element_type=jnp.float32)
        qkv = qkv + bqkv_ref[l].astype(jnp.float32)
        qb = qkv[:, 0:HIDDEN].astype(jnp.bfloat16)
        kb = qkv[:, HIDDEN:2 * HIDDEN].astype(jnp.bfloat16)
        vb = qkv[:, 2 * HIDDEN:3 * HIDDEN].astype(jnp.bfloat16)

        # Multi-head attention; per-head contexts kept in vregs and joined
        # with a lane-axis concatenate (no VMEM scratch round-trip).
        ctx_heads = []
        for h in range(NUM_HEADS):
            sl = slice(h * HEAD_DIM, (h + 1) * HEAD_DIM)
            qh, kh, vh = qb[:, sl], kb[:, sl], vb[:, sl]
            s_scores = jax.lax.dot_general(
                qh, kh, (((1,), (1,)), ((), ())),
                preferred_element_type=jnp.float32) * scale
            s_scores = s_scores - jnp.max(s_scores, axis=-1, keepdims=True)
            p = jnp.exp(s_scores)
            p = p * pl.reciprocal(jnp.sum(p, axis=-1, keepdims=True),
                                  approx=True)
            ctx_heads.append(jnp.dot(p.astype(jnp.bfloat16), vh,
                                     preferred_element_type=jnp.float32))
        ctx = jnp.concatenate(ctx_heads, axis=-1)          # [SEQ, HIDDEN]

        # attention output projection + residual + LayerNorm
        attn_out = (jnp.dot(ctx.astype(jnp.bfloat16), wo_ref[l],
                            preferred_element_type=jnp.float32)
                    + bo_ref[l].astype(jnp.float32))
        x = _layer_norm_f32(attn_out + x, ln1g_ref[l], ln1b_ref[l], LN_EPS)

        # FFN: gelu(x @ Wi + bi) @ Wf + bf, residual + LayerNorm
        inter = (jnp.dot(x.astype(jnp.bfloat16), wi_ref[l],
                         preferred_element_type=jnp.float32)
                 + bi_ref[l].astype(jnp.float32))
        # tanh-approx GELU (EUP slot).  TODO(synk): HF exact-erf GELU parity.
        inter = jax.nn.gelu(inter, approximate=True)
        ffn = (jnp.dot(inter.astype(jnp.bfloat16), wf_ref[l],
                       preferred_element_type=jnp.float32)
               + bf_ref[l].astype(jnp.float32))
        x = _layer_norm_f32(ffn + x, ln2g_ref[l], ln2b_ref[l], LN_EPS)

    h_out_ref[...] = x.astype(h_out_ref.dtype)

    # ---- CrossEncodingPooler + RobertaClassificationHead (features[0, :]) --
    feat = x[0:1, :]
    hcls = jnp.tanh(jnp.dot(feat.astype(jnp.bfloat16), cls_w1_ref[...],
                            preferred_element_type=jnp.float32)
                    + cls_b1_ref[...].astype(jnp.float32))
    logits = (jnp.dot(hcls.astype(jnp.bfloat16), cls_w2_ref[...],
                      preferred_element_type=jnp.float32)
              + cls_b2_ref[...].astype(jnp.float32))
    logits_ref[...] = logits.astype(logits_ref.dtype)


def _fused_forward(params, input_ids):
    S = input_ids.shape[0]
    assert S == SEQ
    grid_spec = pltpu.PrefetchScalarGridSpec(
        num_scalar_prefetch=1,          # input_ids -> SMEM
        grid=(1,),
        in_specs=[
            _spec((VOCAB, HIDDEN)), _spec((MAX_POS, HIDDEN)),
            _spec((TYPE_VOCAB, HIDDEN)),
            _spec((1, HIDDEN)), _spec((1, HIDDEN)),
            _spec((NUM_LAYERS, HIDDEN, 3 * HIDDEN)),
            _spec((NUM_LAYERS, 1, 3 * HIDDEN)),
            _spec((NUM_LAYERS, HIDDEN, HIDDEN)),
            _spec((NUM_LAYERS, 1, HIDDEN)),
            _spec((NUM_LAYERS, 1, HIDDEN)),
            _spec((NUM_LAYERS, 1, HIDDEN)),
            _spec((NUM_LAYERS, HIDDEN, INTERMEDIATE)),
            _spec((NUM_LAYERS, 1, INTERMEDIATE)),
            _spec((NUM_LAYERS, INTERMEDIATE, HIDDEN)),
            _spec((NUM_LAYERS, 1, HIDDEN)),
            _spec((NUM_LAYERS, 1, HIDDEN)),
            _spec((NUM_LAYERS, 1, HIDDEN)),
            _spec((HIDDEN, HIDDEN)), _spec((1, HIDDEN)),
            _spec((HIDDEN, LANE)), _spec((1, LANE)),
        ],
        out_specs=(_spec((S, HIDDEN)), _spec((1, LANE))),
    )
    hidden, logits_pad = pl.pallas_call(
        _fused_forward_kernel,
        grid_spec=grid_spec,
        out_shape=(jax.ShapeDtypeStruct((S, HIDDEN), jnp.float32),
                   jax.ShapeDtypeStruct((1, LANE), jnp.float32)),
        compiler_params=pltpu.CompilerParams(
            dimension_semantics=("arbitrary",)),
    )(input_ids,
      params["word_emb"], params["pos_emb"], params["type_emb"],
      params["emb_ln_g"], params["emb_ln_b"],
      params["wqkv"], params["bqkv"], params["wo"], params["bo"],
      params["ln1_g"], params["ln1_b"],
      params["wi"], params["bi"], params["wf"], params["bf"],
      params["ln2_g"], params["ln2_b"],
      params["cls_w1"], params["cls_b1"], params["cls_w2"], params["cls_b2"])
    return hidden, logits_pad


# ----------------------------------------------------------------- model ----
def init_params(key):
    keys = iter(jax.random.split(key, 32))

    def nrm(shape, dtype):
        return (0.02 * jax.random.normal(next(keys), shape,
                                         jnp.float32)).astype(dtype)

    # classifier out_proj, lane-padded to 128 (zeros beyond NUM_LABELS)
    w2 = nrm((HIDDEN, NUM_LABELS), jnp.float32)
    cls_w2 = jnp.zeros((HIDDEN, LANE), jnp.float32).at[:, :NUM_LABELS].set(w2)

    params = {
        # embedding tables (gathered inside the kernel) -- f32, VMEM resident
        "word_emb": nrm((VOCAB, HIDDEN), jnp.float32),
        "pos_emb": nrm((MAX_POS, HIDDEN), jnp.float32),
        "type_emb": nrm((TYPE_VOCAB, HIDDEN), jnp.float32),
        "emb_ln_g": jnp.ones((1, HIDDEN), jnp.float32),
        "emb_ln_b": jnp.zeros((1, HIDDEN), jnp.float32),
        # encoder weights stacked over layers; MXU-path weights in bf16
        "wqkv": nrm((NUM_LAYERS, HIDDEN, 3 * HIDDEN), jnp.bfloat16),
        "bqkv": jnp.zeros((NUM_LAYERS, 1, 3 * HIDDEN), jnp.float32),
        "wo": nrm((NUM_LAYERS, HIDDEN, HIDDEN), jnp.bfloat16),
        "bo": jnp.zeros((NUM_LAYERS, 1, HIDDEN), jnp.float32),
        "ln1_g": jnp.ones((NUM_LAYERS, 1, HIDDEN), jnp.float32),
        "ln1_b": jnp.zeros((NUM_LAYERS, 1, HIDDEN), jnp.float32),
        "wi": nrm((NUM_LAYERS, HIDDEN, INTERMEDIATE), jnp.bfloat16),
        "bi": jnp.zeros((NUM_LAYERS, 1, INTERMEDIATE), jnp.float32),
        "wf": nrm((NUM_LAYERS, INTERMEDIATE, HIDDEN), jnp.bfloat16),
        "bf": jnp.zeros((NUM_LAYERS, 1, HIDDEN), jnp.float32),
        "ln2_g": jnp.ones((NUM_LAYERS, 1, HIDDEN), jnp.float32),
        "ln2_b": jnp.zeros((NUM_LAYERS, 1, HIDDEN), jnp.float32),
        # classification head
        "cls_w1": nrm((HIDDEN, HIDDEN), jnp.bfloat16),
        "cls_b1": jnp.zeros((1, HIDDEN), jnp.float32),
        "cls_w2": cls_w2.astype(jnp.bfloat16),
        "cls_b2": jnp.zeros((1, LANE), jnp.float32),
    }
    return params


def roberta_forward(params, input_ids):
    # Whole forward is one Pallas launch: embeddings (incl. RoBERTa position
    # ids), encoder, and classification head are all fused in-kernel.
    hidden_states, logits_pad = _fused_forward(params,
                                               input_ids.astype(jnp.int32))
    return hidden_states, logits_pad[0, :NUM_LABELS]


# ------------------------------------------------------------------ main ----
if __name__ == "__main__":
    key = jax.random.PRNGKey(0)
    pkey, ikey = jax.random.split(key)
    params = init_params(pkey)

    # token ids in [2, VOCAB) so they are non-padding (pad_token_id == 1)
    input_ids = jax.random.randint(ikey, (SEQ,), 2, VOCAB, dtype=jnp.int32)

    fwd = jax.jit(roberta_forward)
    hidden_states, logits = fwd(params, input_ids)
    jax.block_until_ready((hidden_states, logits))

    assert hidden_states.shape == (SEQ, HIDDEN)
    assert logits.shape == (NUM_LABELS,)
    assert bool(jnp.all(jnp.isfinite(hidden_states)))
    assert bool(jnp.all(jnp.isfinite(logits)))
    print("KERNEL_OK")
</pallas_src>

<mosaic_0001>
module attributes {stable_mosaic.version = 11 : i64} {
  func.func @_fused_forward_kernel(%arg0: i32, %arg1: memref<16xi32, #tpu.memory_space<smem>>, %arg2: memref<64x128xf32, #tpu.memory_space<vmem>>, %arg3: memref<64x128xf32, #tpu.memory_space<vmem>>, %arg4: memref<2x128xf32, #tpu.memory_space<vmem>>, %arg5: memref<1x128xf32, #tpu.memory_space<vmem>>, %arg6: memref<1x128xf32, #tpu.memory_space<vmem>>, %arg7: memref<2x128x384xbf16, #tpu.memory_space<vmem>>, %arg8: memref<2x1x384xf32, #tpu.memory_space<vmem>>, %arg9: memref<2x128x128xbf16, #tpu.memory_space<vmem>>, %arg10: memref<2x1x128xf32, #tpu.memory_space<vmem>>, %arg11: memref<2x1x128xf32, #tpu.memory_space<vmem>>, %arg12: memref<2x1x128xf32, #tpu.memory_space<vmem>>, %arg13: memref<2x128x256xbf16, #tpu.memory_space<vmem>>, %arg14: memref<2x1x256xf32, #tpu.memory_space<vmem>>, %arg15: memref<2x256x128xbf16, #tpu.memory_space<vmem>>, %arg16: memref<2x1x128xf32, #tpu.memory_space<vmem>>, %arg17: memref<2x1x128xf32, #tpu.memory_space<vmem>>, %arg18: memref<2x1x128xf32, #tpu.memory_space<vmem>>, %arg19: memref<128x128xbf16, #tpu.memory_space<vmem>>, %arg20: memref<1x128xf32, #tpu.memory_space<vmem>>, %arg21: memref<128x128xbf16, #tpu.memory_space<vmem>>, %arg22: memref<1x128xf32, #tpu.memory_space<vmem>>, %arg23: memref<16x128xf32, #tpu.memory_space<vmem>>, %arg24: memref<1x128xf32, #tpu.memory_space<vmem>>) attributes {dimension_semantics = [#tpu.dimension_semantics<arbitrary>], iteration_bounds = array<i64: 1>, scalar_prefetch = 1 : i64, scratch_operands = 0 : i64, tpu.core_type = #tpu.core_type<tc>, window_params = [{pipeline_mode = #tpu.pipeline_mode<synchronous>, transform_indices = @transform_0, window_bounds = array<i64: 64, 128>}, {pipeline_mode = #tpu.pipeline_mode<synchronous>, transform_indices = @transform_1, window_bounds = array<i64: 64, 128>}, {pipeline_mode = #tpu.pipeline_mode<synchronous>, transform_indices = @transform_2, window_bounds = array<i64: 2, 128>}, {pipeline_mode = #tpu.pipeline_mode<synchronous>, transform_indices = @transform_3, window_bounds = array<i64: 1, 128>}, {pipeline_mode = #tpu.pipeline_mode<synchronous>, transform_indices = @transform_4, window_bounds = array<i64: 1, 128>}, {pipeline_mode = #tpu.pipeline_mode<synchronous>, transform_indices = @transform_5, window_bounds = array<i64: 2, 128, 384>}, {pipeline_mode = #tpu.pipeline_mode<synchronous>, transform_indices = @transform_6, window_bounds = array<i64: 2, 1, 384>}, {pipeline_mode = #tpu.pipeline_mode<synchronous>, transform_indices = @transform_7, window_bounds = array<i64: 2, 128, 128>}, {pipeline_mode = #tpu.pipeline_mode<synchronous>, transform_indices = @transform_8, window_bounds = array<i64: 2, 1, 128>}, {pipeline_mode = #tpu.pipeline_mode<synchronous>, transform_indices = @transform_9, window_bounds = array<i64: 2, 1, 128>}, {pipeline_mode = #tpu.pipeline_mode<synchronous>, transform_indices = @transform_10, window_bounds = array<i64: 2, 1, 128>}, {pipeline_mode = #tpu.pipeline_mode<synchronous>, transform_indices = @transform_11, window_bounds = array<i64: 2, 128, 256>}, {pipeline_mode = #tpu.pipeline_mode<synchronous>, transform_indices = @transform_12, window_bounds = array<i64: 2, 1, 256>}, {pipeline_mode = #tpu.pipeline_mode<synchronous>, transform_indices = @transform_13, window_bounds = array<i64: 2, 256, 128>}, {pipeline_mode = #tpu.pipeline_mode<synchronous>, transform_indices = @transform_14, window_bounds = array<i64: 2, 1, 128>}, {pipeline_mode = #tpu.pipeline_mode<synchronous>, transform_indices = @transform_15, window_bounds = array<i64: 2, 1, 128>}, {pipeline_mode = #tpu.pipeline_mode<synchronous>, transform_indices = @transform_16, window_bounds = array<i64: 2, 1, 128>}, {pipeline_mode = #tpu.pipeline_mode<synchronous>, transform_indices = @transform_17, window_bounds = array<i64: 128, 128>}, {pipeline_mode = #tpu.pipeline_mode<synchronous>, transform_indices = @transform_18, window_bounds = array<i64: 1, 128>}, {pipeline_mode = #tpu.pipeline_mode<synchronous>, transform_indices = @transform_19, window_bounds = array<i64: 128, 128>}, {pipeline_mode = #tpu.pipeline_mode<synchronous>, transform_indices = @transform_20, window_bounds = array<i64: 1, 128>}, {pipeline_mode = #tpu.pipeline_mode<synchronous>, transform_indices = @transform_21, window_bounds = array<i64: 16, 128>}, {pipeline_mode = #tpu.pipeline_mode<synchronous>, transform_indices = @transform_22, window_bounds = array<i64: 1, 128>}]} {
    %c0 = arith.constant 0 : index
    %0 = memref.load %arg1[%c0] : memref<16xi32, #tpu.memory_space<smem>>
    %c1_i32 = arith.constant 1 : i32
    %1 = arith.cmpi ne, %0, %c1_i32 : i32
    %2 = arith.extui %1 : i1 to i32
    %c0_i32 = arith.constant 0 : i32
    %3 = arith.addi %c0_i32, %2 : i32
    %4 = arith.muli %3, %2 : i32
    %c1_i32_0 = arith.constant 1 : i32
    %5 = arith.addi %4, %c1_i32_0 : i32
    %6 = arith.index_cast %0 : i32 to index
    %c0_1 = arith.constant 0 : index
    %7 = vector.load %arg2[%6, %c0_1] : memref<64x128xf32, #tpu.memory_space<vmem>>, vector<1x128xf32>
    %8 = arith.index_cast %5 : i32 to index
    %c0_2 = arith.constant 0 : index
    %9 = vector.load %arg3[%8, %c0_2] : memref<64x128xf32, #tpu.memory_space<vmem>>, vector<1x128xf32>
    %10 = arith.addf %7, %9 : vector<1x128xf32>
    %c1 = arith.constant 1 : index
    %11 = memref.load %arg1[%c1] : memref<16xi32, #tpu.memory_space<smem>>
    %c1_i32_3 = arith.constant 1 : i32
    %12 = arith.cmpi ne, %11, %c1_i32_3 : i32
    %13 = arith.extui %12 : i1 to i32
    %14 = arith.addi %3, %13 : i32
    %15 = arith.muli %14, %13 : i32
    %c1_i32_4 = arith.constant 1 : i32
    %16 = arith.addi %15, %c1_i32_4 : i32
    %17 = arith.index_cast %11 : i32 to index
    %c0_5 = arith.constant 0 : index
    %18 = vector.load %arg2[%17, %c0_5] : memref<64x128xf32, #tpu.memory_space<vmem>>, vector<1x128xf32>
    %19 = arith.index_cast %16 : i32 to index
    %c0_6 = arith.constant 0 : index
    %20 = vector.load %arg3[%19, %c0_6] : memref<64x128xf32, #tpu.memory_space<vmem>>, vector<1x128xf32>
    %21 = arith.addf %18, %20 : vector<1x128xf32>
    %c2 = arith.constant 2 : index
    %22 = memref.load %arg1[%c2] : memref<16xi32, #tpu.memory_space<smem>>
    %c1_i32_7 = arith.constant 1 : i32
    %23 = arith.cmpi ne, %22, %c1_i32_7 : i32
    %24 = arith.extui %23 : i1 to i32
    %25 = arith.addi %14, %24 : i32
    %26 = arith.muli %25, %24 : i32
    %c1_i32_8 = arith.constant 1 : i32
    %27 = arith.addi %26, %c1_i32_8 : i32
    %28 = arith.index_cast %22 : i32 to index
    %c0_9 = arith.constant 0 : index
    %29 = vector.load %arg2[%28, %c0_9] : memref<64x128xf32, #tpu.memory_space<vmem>>, vector<1x128xf32>
    %30 = arith.index_cast %27 : i32 to index
    %c0_10 = arith.constant 0 : index
    %31 = vector.load %arg3[%30, %c0_10] : memref<64x128xf32, #tpu.memory_space<vmem>>, vector<1x128xf32>
    %32 = arith.addf %29, %31 : vector<1x128xf32>
    %c3 = arith.constant 3 : index
    %33 = memref.load %arg1[%c3] : memref<16xi32, #tpu.memory_space<smem>>
    %c1_i32_11 = arith.constant 1 : i32
    %34 = arith.cmpi ne, %33, %c1_i32_11 : i32
    %35 = arith.extui %34 : i1 to i32
    %36 = arith.addi %25, %35 : i32
    %37 = arith.muli %36, %35 : i32
    %c1_i32_12 = arith.constant 1 : i32
    %38 = arith.addi %37, %c1_i32_12 : i32
    %39 = arith.index_cast %33 : i32 to index
    %c0_13 = arith.constant 0 : index
    %40 = vector.load %arg2[%39, %c0_13] : memref<64x128xf32, #tpu.memory_space<vmem>>, vector<1x128xf32>
    %41 = arith.index_cast %38 : i32 to index
    %c0_14 = arith.constant 0 : index
    %42 = vector.load %arg3[%41, %c0_14] : memref<64x128xf32, #tpu.memory_space<vmem>>, vector<1x128xf32>
    %43 = arith.addf %40, %42 : vector<1x128xf32>
    %c4 = arith.constant 4 : index
    %44 = memref.load %arg1[%c4] : memref<16xi32, #tpu.memory_space<smem>>
    %c1_i32_15 = arith.constant 1 : i32
    %45 = arith.cmpi ne, %44, %c1_i32_15 : i32
    %46 = arith.extui %45 : i1 to i32
    %47 = arith.addi %36, %46 : i32
    %48 = arith.muli %47, %46 : i32
    %c1_i32_16 = arith.constant 1 : i32
    %49 = arith.addi %48, %c1_i32_16 : i32
    %50 = arith.index_cast %44 : i32 to index
    %c0_17 = arith.constant 0 : index
    %51 = vector.load %arg2[%50, %c0_17] : memref<64x128xf32, #tpu.memory_space<vmem>>, vector<1x128xf32>
    %52 = arith.index_cast %49 : i32 to index
    %c0_18 = arith.constant 0 : index
    %53 = vector.load %arg3[%52, %c0_18] : memref<64x128xf32, #tpu.memory_space<vmem>>, vector<1x128xf32>
    %54 = arith.addf %51, %53 : vector<1x128xf32>
    %c5 = arith.constant 5 : index
    %55 = memref.load %arg1[%c5] : memref<16xi32, #tpu.memory_space<smem>>
    %c1_i32_19 = arith.constant 1 : i32
    %56 = arith.cmpi ne, %55, %c1_i32_19 : i32
    %57 = arith.extui %56 : i1 to i32
    %58 = arith.addi %47, %57 : i32
    %59 = arith.muli %58, %57 : i32
    %c1_i32_20 = arith.constant 1 : i32
    %60 = arith.addi %59, %c1_i32_20 : i32
    %61 = arith.index_cast %55 : i32 to index
    %c0_21 = arith.constant 0 : index
    %62 = vector.load %arg2[%61, %c0_21] : memref<64x128xf32, #tpu.memory_space<vmem>>, vector<1x128xf32>
    %63 = arith.index_cast %60 : i32 to index
    %c0_22 = arith.constant 0 : index
    %64 = vector.load %arg3[%63, %c0_22] : memref<64x128xf32, #tpu.memory_space<vmem>>, vector<1x128xf32>
    %65 = arith.addf %62, %64 : vector<1x128xf32>
    %c6 = arith.constant 6 : index
    %66 = memref.load %arg1[%c6] : memref<16xi32, #tpu.memory_space<smem>>
    %c1_i32_23 = arith.constant 1 : i32
    %67 = arith.cmpi ne, %66, %c1_i32_23 : i32
    %68 = arith.extui %67 : i1 to i32
    %69 = arith.addi %58, %68 : i32
    %70 = arith.muli %69, %68 : i32
    %c1_i32_24 = arith.constant 1 : i32
    %71 = arith.addi %70, %c1_i32_24 : i32
    %72 = arith.index_cast %66 : i32 to index
    %c0_25 = arith.constant 0 : index
    %73 = vector.load %arg2[%72, %c0_25] : memref<64x128xf32, #tpu.memory_space<vmem>>, vector<1x128xf32>
    %74 = arith.index_cast %71 : i32 to index
    %c0_26 = arith.constant 0 : index
    %75 = vector.load %arg3[%74, %c0_26] : memref<64x128xf32, #tpu.memory_space<vmem>>, vector<1x128xf32>
    %76 = arith.addf %73, %75 : vector<1x128xf32>
    %c7 = arith.constant 7 : index
    %77 = memref.load %arg1[%c7] : memref<16xi32, #tpu.memory_space<smem>>
    %c1_i32_27 = arith.constant 1 : i32
    %78 = arith.cmpi ne, %77, %c1_i32_27 : i32
    %79 = arith.extui %78 : i1 to i32
    %80 = arith.addi %69, %79 : i32
    %81 = arith.muli %80, %79 : i32
    %c1_i32_28 = arith.constant 1 : i32
    %82 = arith.addi %81, %c1_i32_28 : i32
    %83 = arith.index_cast %77 : i32 to index
    %c0_29 = arith.constant 0 : index
    %84 = vector.load %arg2[%83, %c0_29] : memref<64x128xf32, #tpu.memory_space<vmem>>, vector<1x128xf32>
    %85 = arith.index_cast %82 : i32 to index
    %c0_30 = arith.constant 0 : index
    %86 = vector.load %arg3[%85, %c0_30] : memref<64x128xf32, #tpu.memory_space<vmem>>, vector<1x128xf32>
    %87 = arith.addf %84, %86 : vector<1x128xf32>
    %c8 = arith.constant 8 : index
    %88 = memref.load %arg1[%c8] : memref<16xi32, #tpu.memory_space<smem>>
    %c1_i32_31 = arith.constant 1 : i32
    %89 = arith.cmpi ne, %88, %c1_i32_31 : i32
    %90 = arith.extui %89 : i1 to i32
    %91 = arith.addi %80, %90 : i32
    %92 = arith.muli %91, %90 : i32
    %c1_i32_32 = arith.constant 1 : i32
    %93 = arith.addi %92, %c1_i32_32 : i32
    %94 = arith.index_cast %88 : i32 to index
    %c0_33 = arith.constant 0 : index
    %95 = vector.load %arg2[%94, %c0_33] : memref<64x128xf32, #tpu.memory_space<vmem>>, vector<1x128xf32>
    %96 = arith.index_cast %93 : i32 to index
    %c0_34 = arith.constant 0 : index
    %97 = vector.load %arg3[%96, %c0_34] : memref<64x128xf32, #tpu.memory_space<vmem>>, vector<1x128xf32>
    %98 = arith.addf %95, %97 : vector<1x128xf32>
    %c9 = arith.constant 9 : index
    %99 = memref.load %arg1[%c9] : memref<16xi32, #tpu.memory_space<smem>>
    %c1_i32_35 = arith.constant 1 : i32
    %100 = arith.cmpi ne, %99, %c1_i32_35 : i32
    %101 = arith.extui %100 : i1 to i32
    %102 = arith.addi %91, %101 : i32
    %103 = arith.muli %102, %101 : i32
    %c1_i32_36 = arith.constant 1 : i32
    %104 = arith.addi %103, %c1_i32_36 : i32
    %105 = arith.index_cast %99 : i32 to index
    %c0_37 = arith.constant 0 : index
    %106 = vector.load %arg2[%105, %c0_37] : memref<64x128xf32, #tpu.memory_space<vmem>>, vector<1x128xf32>
    %107 = arith.index_cast %104 : i32 to index
    %c0_38 = arith.constant 0 : index
    %108 = vector.load %arg3[%107, %c0_38] : memref<64x128xf32, #tpu.memory_space<vmem>>, vector<1x128xf32>
    %109 = arith.addf %106, %108 : vector<1x128xf32>
    %c10 = arith.constant 10 : index
    %110 = memref.load %arg1[%c10] : memref<16xi32, #tpu.memory_space<smem>>
    %c1_i32_39 = arith.constant 1 : i32
    %111 = arith.cmpi ne, %110, %c1_i32_39 : i32
    %112 = arith.extui %111 : i1 to i32
    %113 = arith.addi %102, %112 : i32
    %114 = arith.muli %113, %112 : i32
    %c1_i32_40 = arith.constant 1 : i32
    %115 = arith.addi %114, %c1_i32_40 : i32
    %116 = arith.index_cast %110 : i32 to index
    %c0_41 = arith.constant 0 : index
    %117 = vector.load %arg2[%116, %c0_41] : memref<64x128xf32, #tpu.memory_space<vmem>>, vector<1x128xf32>
    %118 = arith.index_cast %115 : i32 to index
    %c0_42 = arith.constant 0 : index
    %119 = vector.load %arg3[%118, %c0_42] : memref<64x128xf32, #tpu.memory_space<vmem>>, vector<1x128xf32>
    %120 = arith.addf %117, %119 : vector<1x128xf32>
    %c11 = arith.constant 11 : index
    %121 = memref.load %arg1[%c11] : memref<16xi32, #tpu.memory_space<smem>>
    %c1_i32_43 = arith.constant 1 : i32
    %122 = arith.cmpi ne, %121, %c1_i32_43 : i32
    %123 = arith.extui %122 : i1 to i32
    %124 = arith.addi %113, %123 : i32
    %125 = arith.muli %124, %123 : i32
    %c1_i32_44 = arith.constant 1 : i32
    %126 = arith.addi %125, %c1_i32_44 : i32
    %127 = arith.index_cast %121 : i32 to index
    %c0_45 = arith.constant 0 : index
    %128 = vector.load %arg2[%127, %c0_45] : memref<64x128xf32, #tpu.memory_space<vmem>>, vector<1x128xf32>
    %129 = arith.index_cast %126 : i32 to index
    %c0_46 = arith.constant 0 : index
    %130 = vector.load %arg3[%129, %c0_46] : memref<64x128xf32, #tpu.memory_space<vmem>>, vector<1x128xf32>
    %131 = arith.addf %128, %130 : vector<1x128xf32>
    %c12 = arith.constant 12 : index
    %132 = memref.load %arg1[%c12] : memref<16xi32, #tpu.memory_space<smem>>
    %c1_i32_47 = arith.constant 1 : i32
    %133 = arith.cmpi ne, %132, %c1_i32_47 : i32
    %134 = arith.extui %133 : i1 to i32
    %135 = arith.addi %124, %134 : i32
    %136 = arith.muli %135, %134 : i32
    %c1_i32_48 = arith.constant 1 : i32
    %137 = arith.addi %136, %c1_i32_48 : i32
    %138 = arith.index_cast %132 : i32 to index
    %c0_49 = arith.constant 0 : index
    %139 = vector.load %arg2[%138, %c0_49] : memref<64x128xf32, #tpu.memory_space<vmem>>, vector<1x128xf32>
    %140 = arith.index_cast %137 : i32 to index
    %c0_50 = arith.constant 0 : index
    %141 = vector.load %arg3[%140, %c0_50] : memref<64x128xf32, #tpu.memory_space<vmem>>, vector<1x128xf32>
    %142 = arith.addf %139, %141 : vector<1x128xf32>
    %c13 = arith.constant 13 : index
    %143 = memref.load %arg1[%c13] : memref<16xi32, #tpu.memory_space<smem>>
    %c1_i32_51 = arith.constant 1 : i32
    %144 = arith.cmpi ne, %143, %c1_i32_51 : i32
    %145 = arith.extui %144 : i1 to i32
    %146 = arith.addi %135, %145 : i32
    %147 = arith.muli %146, %145 : i32
    %c1_i32_52 = arith.constant 1 : i32
    %148 = arith.addi %147, %c1_i32_52 : i32
    %149 = arith.index_cast %143 : i32 to index
    %c0_53 = arith.constant 0 : index
    %150 = vector.load %arg2[%149, %c0_53] : memref<64x128xf32, #tpu.memory_space<vmem>>, vector<1x128xf32>
    %151 = arith.index_cast %148 : i32 to index
    %c0_54 = arith.constant 0 : index
    %152 = vector.load %arg3[%151, %c0_54] : memref<64x128xf32, #tpu.memory_space<vmem>>, vector<1x128xf32>
    %153 = arith.addf %150, %152 : vector<1x128xf32>
    %c14 = arith.constant 14 : index
    %154 = memref.load %arg1[%c14] : memref<16xi32, #tpu.memory_space<smem>>
    %c1_i32_55 = arith.constant 1 : i32
    %155 = arith.cmpi ne, %154, %c1_i32_55 : i32
    %156 = arith.extui %155 : i1 to i32
    %157 = arith.addi %146, %156 : i32
    %158 = arith.muli %157, %156 : i32
    %c1_i32_56 = arith.constant 1 : i32
    %159 = arith.addi %158, %c1_i32_56 : i32
    %160 = arith.index_cast %154 : i32 to index
    %c0_57 = arith.constant 0 : index
    %161 = vector.load %arg2[%160, %c0_57] : memref<64x128xf32, #tpu.memory_space<vmem>>, vector<1x128xf32>
    %162 = arith.index_cast %159 : i32 to index
    %c0_58 = arith.constant 0 : index
    %163 = vector.load %arg3[%162, %c0_58] : memref<64x128xf32, #tpu.memory_space<vmem>>, vector<1x128xf32>
    %164 = arith.addf %161, %163 : vector<1x128xf32>
    %c15 = arith.constant 15 : index
    %165 = memref.load %arg1[%c15] : memref<16xi32, #tpu.memory_space<smem>>
    %c1_i32_59 = arith.constant 1 : i32
    %166 = arith.cmpi ne, %165, %c1_i32_59 : i32
    %167 = arith.extui %166 : i1 to i32
    %168 = arith.addi %157, %167 : i32
    %169 = arith.muli %168, %167 : i32
    %c1_i32_60 = arith.constant 1 : i32
    %170 = arith.addi %169, %c1_i32_60 : i32
    %171 = arith.index_cast %165 : i32 to index
    %c0_61 = arith.constant 0 : index
    %172 = vector.load %arg2[%171, %c0_61] : memref<64x128xf32, #tpu.memory_space<vmem>>, vector<1x128xf32>
    %173 = arith.index_cast %170 : i32 to index
    %c0_62 = arith.constant 0 : index
    %174 = vector.load %arg3[%173, %c0_62] : memref<64x128xf32, #tpu.memory_space<vmem>>, vector<1x128xf32>
    %175 = arith.addf %172, %174 : vector<1x128xf32>
    %176 = tpu.concatenate %10, %21, %32, %43, %54, %65, %76, %87, %98, %109, %120, %131, %142, %153, %164, %175 in 0 : vector<1x128xf32>, vector<1x128xf32>, vector<1x128xf32>, vector<1x128xf32>, vector<1x128xf32>, vector<1x128xf32>, vector<1x128xf32>, vector<1x128xf32>, vector<1x128xf32>, vector<1x128xf32>, vector<1x128xf32>, vector<1x128xf32>, vector<1x128xf32>, vector<1x128xf32>, vector<1x128xf32>, vector<1x128xf32> -> vector<16x128xf32>
    %c0_63 = arith.constant 0 : index
    %c0_64 = arith.constant 0 : index
    %177 = vector.load %arg4[%c0_63, %c0_64] : memref<2x128xf32, #tpu.memory_space<vmem>>, vector<1x128xf32>
    %178 = vector.broadcast %177 : vector<1x128xf32> to vector<16x128xf32>
    %179 = arith.addf %176, %178 : vector<16x128xf32>
    %c0_65 = arith.constant 0 : index
    %c0_66 = arith.constant 0 : index
    %180 = vector.load %arg5[%c0_65, %c0_66] : memref<1x128xf32, #tpu.memory_space<vmem>>, vector<1x128xf32>
    %c0_67 = arith.constant 0 : index
    %c0_68 = arith.constant 0 : index
    %181 = vector.load %arg6[%c0_67, %c0_68] : memref<1x128xf32, #tpu.memory_space<vmem>>, vector<1x128xf32>
    %cst = arith.constant dense<0.000000e+00> : vector<16xf32>
    %182 = vector.multi_reduction <add>, %179, %cst [1] : vector<16x128xf32> to vector<16xf32>
    %183 = vector.shape_cast %182 : vector<16xf32> to vector<16x1xf32>
    %cst_69 = arith.constant 1.280000e+02 : f32
    %184 = vector.broadcast %cst_69 : f32 to vector<16x1xf32>
    %185 = arith.divf %183, %184 : vector<16x1xf32>
    %186 = arith.mulf %179, %179 : vector<16x128xf32>
    %cst_70 = arith.constant dense<0.000000e+00> : vector<16xf32>
    %187 = vector.multi_reduction <add>, %186, %cst_70 [1] : vector<16x128xf32> to vector<16xf32>
    %188 = vector.shape_cast %187 : vector<16xf32> to vector<16x1xf32>
    %cst_71 = arith.constant 1.280000e+02 : f32
    %189 = vector.broadcast %cst_71 : f32 to vector<16x1xf32>
    %190 = arith.divf %188, %189 : vector<16x1xf32>
    %191 = arith.mulf %185, %185 : vector<16x1xf32>
    %192 = arith.subf %190, %191 : vector<16x1xf32>
    %193 = vector.broadcast %185 : vector<16x1xf32> to vector<16x128xf32>
    %194 = arith.subf %179, %193 : vector<16x128xf32>
    %cst_72 = arith.constant 9.99999974E-6 : f32
    %195 = vector.broadcast %cst_72 : f32 to vector<16x1xf32>
    %196 = arith.addf %192, %195 : vector<16x1xf32>
    %197 = math.rsqrt %196 : vector<16x1xf32>
    %198 = vector.broadcast %197 : vector<16x1xf32> to vector<16x128xf32>
    %199 = arith.mulf %194, %198 : vector<16x128xf32>
    %200 = vector.broadcast %180 : vector<1x128xf32> to vector<16x128xf32>
    %201 = arith.mulf %199, %200 : vector<16x128xf32>
    %202 = vector.broadcast %181 : vector<1x128xf32> to vector<16x128xf32>
    %203 = arith.addf %201, %202 : vector<16x128xf32>
    %204 = arith.truncf %203 : vector<16x128xf32> to vector<16x128xbf16>
    %c0_73 = arith.constant 0 : index
    %c0_74 = arith.constant 0 : index
    %c0_75 = arith.constant 0 : index
    %205 = vector.load %arg7[%c0_73, %c0_74, %c0_75] : memref<2x128x384xbf16, #tpu.memory_space<vmem>>, vector<1x128x384xbf16>
    %206 = vector.shape_cast %205 : vector<1x128x384xbf16> to vector<128x384xbf16>
    %cst_76 = arith.constant dense<0.000000e+00> : vector<16x384xf32>
    %207 = tpu.matmul %204, %206, %cst_76 {dimension_numbers = #tpu.dot_dimension_numbers<[1], [0], [0], [1], [0, 0, 1, 1], [], []>} : vector<16x128xbf16>, vector<128x384xbf16>, vector<16x384xf32> -> vector<16x384xf32>
    %c0_77 = arith.constant 0 : index
    %c0_78 = arith.constant 0 : index
    %c0_79 = arith.constant 0 : index
    %208 = vector.load %arg8[%c0_77, %c0_78, %c0_79] : memref<2x1x384xf32, #tpu.memory_space<vmem>>, vector<1x1x384xf32>
    %209 = vector.shape_cast %208 : vector<1x1x384xf32> to vector<1x384xf32>
    %210 = vector.broadcast %209 : vector<1x384xf32> to vector<16x384xf32>
    %211 = arith.addf %207, %210 : vector<16x384xf32>
    %212 = vector.extract_strided_slice %211 {offsets = [0, 0], sizes = [16, 128], strides = [1, 1]} : vector<16x384xf32> to vector<16x128xf32>
    %213 = arith.truncf %212 : vector<16x128xf32> to vector<16x128xbf16>
    %214 = vector.extract_strided_slice %211 {offsets = [0, 128], sizes = [16, 128], strides = [1, 1]} : vector<16x384xf32> to vector<16x128xf32>
    %215 = arith.truncf %214 : vector<16x128xf32> to vector<16x128xbf16>
    %216 = vector.extract_strided_slice %211 {offsets = [0, 256], sizes = [16, 128], strides = [1, 1]} : vector<16x384xf32> to vector<16x128xf32>
    %217 = arith.truncf %216 : vector<16x128xf32> to vector<16x128xbf16>
    %218 = vector.extract_strided_slice %213 {offsets = [0, 0], sizes = [16, 32], strides = [1, 1]} : vector<16x128xbf16> to vector<16x32xbf16>
    %219 = vector.extract_strided_slice %215 {offsets = [0, 0], sizes = [16, 32], strides = [1, 1]} : vector<16x128xbf16> to vector<16x32xbf16>
    %220 = vector.extract_strided_slice %217 {offsets = [0, 0], sizes = [16, 32], strides = [1, 1]} : vector<16x128xbf16> to vector<16x32xbf16>
    %cst_80 = arith.constant dense<0.000000e+00> : vector<16x16xf32>
    %221 = tpu.matmul %218, %219, %cst_80 {dimension_numbers = #tpu.dot_dimension_numbers<[1], [1], [0], [0], [0, 0, 1, 0], [], []>} : vector<16x32xbf16>, vector<16x32xbf16>, vector<16x16xf32> -> vector<16x16xf32>
    %cst_81 = arith.constant 0.176776692 : f32
    %222 = vector.broadcast %cst_81 : f32 to vector<16x16xf32>
    %223 = arith.mulf %221, %222 : vector<16x16xf32>
    %cst_82 = arith.constant dense<0xFF800000> : vector<16xf32>
    %224 = vector.multi_reduction <maximumf>, %223, %cst_82 [1] : vector<16x16xf32> to vector<16xf32>
    %225 = vector.shape_cast %224 : vector<16xf32> to vector<16x1xf32>
    %226 = vector.broadcast %225 : vector<16x1xf32> to vector<16x16xf32>
    %227 = arith.subf %223, %226 : vector<16x16xf32>
    %228 = math.exp %227 : vector<16x16xf32>
    %cst_83 = arith.constant dense<0.000000e+00> : vector<16xf32>
    %229 = vector.multi_reduction <add>, %228, %cst_83 [1] : vector<16x16xf32> to vector<16xf32>
    %230 = vector.shape_cast %229 : vector<16xf32> to vector<16x1xf32>
    %231 = tpu.reciprocal %230 {approx = true} : vector<16x1xf32> -> vector<16x1xf32>
    %232 = vector.broadcast %231 : vector<16x1xf32> to vector<16x16xf32>
    %233 = arith.mulf %228, %232 : vector<16x16xf32>
    %234 = arith.truncf %233 : vector<16x16xf32> to vector<16x16xbf16>
    %cst_84 = arith.constant dense<0.000000e+00> : vector<16x32xf32>
    %235 = tpu.matmul %234, %220, %cst_84 {dimension_numbers = #tpu.dot_dimension_numbers<[1], [0], [0], [1], [0, 0, 1, 1], [], []>} : vector<16x16xbf16>, vector<16x32xbf16>, vector<16x32xf32> -> vector<16x32xf32>
    %236 = vector.extract_strided_slice %213 {offsets = [0, 32], sizes = [16, 32], strides = [1, 1]} : vector<16x128xbf16> to vector<16x32xbf16>
    %237 = vector.extract_strided_slice %215 {offsets = [0, 32], sizes = [16, 32], strides = [1, 1]} : vector<16x128xbf16> to vector<16x32xbf16>
    %238 = vector.extract_strided_slice %217 {offsets = [0, 32], sizes = [16, 32], strides = [1, 1]} : vector<16x128xbf16> to vector<16x32xbf16>
    %cst_85 = arith.constant dense<0.000000e+00> : vector<16x16xf32>
    %239 = tpu.matmul %236, %237, %cst_85 {dimension_numbers = #tpu.dot_dimension_numbers<[1], [1], [0], [0], [0, 0, 1, 0], [], []>} : vector<16x32xbf16>, vector<16x32xbf16>, vector<16x16xf32> -> vector<16x16xf32>
    %cst_86 = arith.constant 0.176776692 : f32
    %240 = vector.broadcast %cst_86 : f32 to vector<16x16xf32>
    %241 = arith.mulf %239, %240 : vector<16x16xf32>
    %cst_87 = arith.constant dense<0xFF800000> : vector<16xf32>
    %242 = vector.multi_reduction <maximumf>, %241, %cst_87 [1] : vector<16x16xf32> to vector<16xf32>
    %243 = vector.shape_cast %242 : vector<16xf32> to vector<16x1xf32>
    %244 = vector.broadcast %243 : vector<16x1xf32> to vector<16x16xf32>
    %245 = arith.subf %241, %244 : vector<16x16xf32>
    %246 = math.exp %245 : vector<16x16xf32>
    %cst_88 = arith.constant dense<0.000000e+00> : vector<16xf32>
    %247 = vector.multi_reduction <add>, %246, %cst_88 [1] : vector<16x16xf32> to vector<16xf32>
    %248 = vector.shape_cast %247 : vector<16xf32> to vector<16x1xf32>
    %249 = tpu.reciprocal %248 {approx = true} : vector<16x1xf32> -> vector<16x1xf32>
    %250 = vector.broadcast %249 : vector<16x1xf32> to vector<16x16xf32>
    %251 = arith.mulf %246, %250 : vector<16x16xf32>
    %252 = arith.truncf %251 : vector<16x16xf32> to vector<16x16xbf16>
    %cst_89 = arith.constant dense<0.000000e+00> : vector<16x32xf32>
    %253 = tpu.matmul %252, %238, %cst_89 {dimension_numbers = #tpu.dot_dimension_numbers<[1], [0], [0], [1], [0, 0, 1, 1], [], []>} : vector<16x16xbf16>, vector<16x32xbf16>, vector<16x32xf32> -> vector<16x32xf32>
    %254 = vector.extract_strided_slice %213 {offsets = [0, 64], sizes = [16, 32], strides = [1, 1]} : vector<16x128xbf16> to vector<16x32xbf16>
    %255 = vector.extract_strided_slice %215 {offsets = [0, 64], sizes = [16, 32], strides = [1, 1]} : vector<16x128xbf16> to vector<16x32xbf16>
    %256 = vector.extract_strided_slice %217 {offsets = [0, 64], sizes = [16, 32], strides = [1, 1]} : vector<16x128xbf16> to vector<16x32xbf16>
    %cst_90 = arith.constant dense<0.000000e+00> : vector<16x16xf32>
    %257 = tpu.matmul %254, %255, %cst_90 {dimension_numbers = #tpu.dot_dimension_numbers<[1], [1], [0], [0], [0, 0, 1, 0], [], []>} : vector<16x32xbf16>, vector<16x32xbf16>, vector<16x16xf32> -> vector<16x16xf32>
    %cst_91 = arith.constant 0.176776692 : f32
    %258 = vector.broadcast %cst_91 : f32 to vector<16x16xf32>
    %259 = arith.mulf %257, %258 : vector<16x16xf32>
    %cst_92 = arith.constant dense<0xFF800000> : vector<16xf32>
    %260 = vector.multi_reduction <maximumf>, %259, %cst_92 [1] : vector<16x16xf32> to vector<16xf32>
    %261 = vector.shape_cast %260 : vector<16xf32> to vector<16x1xf32>
    %262 = vector.broadcast %261 : vector<16x1xf32> to vector<16x16xf32>
    %263 = arith.subf %259, %262 : vector<16x16xf32>
    %264 = math.exp %263 : vector<16x16xf32>
    %cst_93 = arith.constant dense<0.000000e+00> : vector<16xf32>
    %265 = vector.multi_reduction <add>, %264, %cst_93 [1] : vector<16x16xf32> to vector<16xf32>
    %266 = vector.shape_cast %265 : vector<16xf32> to vector<16x1xf32>
    %267 = tpu.reciprocal %266 {approx = true} : vector<16x1xf32> -> vector<16x1xf32>
    %268 = vector.broadcast %267 : vector<16x1xf32> to vector<16x16xf32>
    %269 = arith.mulf %264, %268 : vector<16x16xf32>
    %270 = arith.truncf %269 : vector<16x16xf32> to vector<16x16xbf16>
    %cst_94 = arith.constant dense<0.000000e+00> : vector<16x32xf32>
    %271 = tpu.matmul %270, %256, %cst_94 {dimension_numbers = #tpu.dot_dimension_numbers<[1], [0], [0], [1], [0, 0, 1, 1], [], []>} : vector<16x16xbf16>, vector<16x32xbf16>, vector<16x32xf32> -> vector<16x32xf32>
    %272 = vector.extract_strided_slice %213 {offsets = [0, 96], sizes = [16, 32], strides = [1, 1]} : vector<16x128xbf16> to vector<16x32xbf16>
    %273 = vector.extract_strided_slice %215 {offsets = [0, 96], sizes = [16, 32], strides = [1, 1]} : vector<16x128xbf16> to vector<16x32xbf16>
    %274 = vector.extract_strided_slice %217 {offsets = [0, 96], sizes = [16, 32], strides = [1, 1]} : vector<16x128xbf16> to vector<16x32xbf16>
    %cst_95 = arith.constant dense<0.000000e+00> : vector<16x16xf32>
    %275 = tpu.matmul %272, %273, %cst_95 {dimension_numbers = #tpu.dot_dimension_numbers<[1], [1], [0], [0], [0, 0, 1, 0], [], []>} : vector<16x32xbf16>, vector<16x32xbf16>, vector<16x16xf32> -> vector<16x16xf32>
    %cst_96 = arith.constant 0.176776692 : f32
    %276 = vector.broadcast %cst_96 : f32 to vector<16x16xf32>
    %277 = arith.mulf %275, %276 : vector<16x16xf32>
    %cst_97 = arith.constant dense<0xFF800000> : vector<16xf32>
    %278 = vector.multi_reduction <maximumf>, %277, %cst_97 [1] : vector<16x16xf32> to vector<16xf32>
    %279 = vector.shape_cast %278 : vector<16xf32> to vector<16x1xf32>
    %280 = vector.broadcast %279 : vector<16x1xf32> to vector<16x16xf32>
    %281 = arith.subf %277, %280 : vector<16x16xf32>
    %282 = math.exp %281 : vector<16x16xf32>
    %cst_98 = arith.constant dense<0.000000e+00> : vector<16xf32>
    %283 = vector.multi_reduction <add>, %282, %cst_98 [1] : vector<16x16xf32> to vector<16xf32>
    %284 = vector.shape_cast %283 : vector<16xf32> to vector<16x1xf32>
    %285 = tpu.reciprocal %284 {approx = true} : vector<16x1xf32> -> vector<16x1xf32>
    %286 = vector.broadcast %285 : vector<16x1xf32> to vector<16x16xf32>
    %287 = arith.mulf %282, %286 : vector<16x16xf32>
    %288 = arith.truncf %287 : vector<16x16xf32> to vector<16x16xbf16>
    %cst_99 = arith.constant dense<0.000000e+00> : vector<16x32xf32>
    %289 = tpu.matmul %288, %274, %cst_99 {dimension_numbers = #tpu.dot_dimension_numbers<[1], [0], [0], [1], [0, 0, 1, 1], [], []>} : vector<16x16xbf16>, vector<16x32xbf16>, vector<16x32xf32> -> vector<16x32xf32>
    %290 = tpu.concatenate %235, %253, %271, %289 in 1 : vector<16x32xf32>, vector<16x32xf32>, vector<16x32xf32>, vector<16x32xf32> -> vector<16x128xf32>
    %291 = arith.truncf %290 : vector<16x128xf32> to vector<16x128xbf16>
    %c0_100 = arith.constant 0 : index
    %c0_101 = arith.constant 0 : index
    %c0_102 = arith.constant 0 : index
    %292 = vector.load %arg9[%c0_100, %c0_101, %c0_102] : memref<2x128x128xbf16, #tpu.memory_space<vmem>>, vector<1x128x128xbf16>
    %293 = vector.shape_cast %292 : vector<1x128x128xbf16> to vector<128x128xbf16>
    %cst_103 = arith.constant dense<0.000000e+00> : vector<16x128xf32>
    %294 = tpu.matmul %291, %293, %cst_103 {dimension_numbers = #tpu.dot_dimension_numbers<[1], [0], [0], [1], [0, 0, 1, 1], [], []>} : vector<16x128xbf16>, vector<128x128xbf16>, vector<16x128xf32> -> vector<16x128xf32>
    %c0_104 = arith.constant 0 : index
    %c0_105 = arith.constant 0 : index
    %c0_106 = arith.constant 0 : index
    %295 = vector.load %arg10[%c0_104, %c0_105, %c0_106] : memref<2x1x128xf32, #tpu.memory_space<vmem>>, vector<1x1x128xf32>
    %296 = vector.shape_cast %295 : vector<1x1x128xf32> to vector<1x128xf32>
    %297 = vector.broadcast %296 : vector<1x128xf32> to vector<16x128xf32>
    %298 = arith.addf %294, %297 : vector<16x128xf32>
    %299 = arith.addf %298, %203 : vector<16x128xf32>
    %c0_107 = arith.constant 0 : index
    %c0_108 = arith.constant 0 : index
    %c0_109 = arith.constant 0 : index
    %300 = vector.load %arg11[%c0_107, %c0_108, %c0_109] : memref<2x1x128xf32, #tpu.memory_space<vmem>>, vector<1x1x128xf32>
    %301 = vector.shape_cast %300 : vector<1x1x128xf32> to vector<1x128xf32>
    %c0_110 = arith.constant 0 : index
    %c0_111 = arith.constant 0 : index
    %c0_112 = arith.constant 0 : index
    %302 = vector.load %arg12[%c0_110, %c0_111, %c0_112] : memref<2x1x128xf32, #tpu.memory_space<vmem>>, vector<1x1x128xf32>
    %303 = vector.shape_cast %302 : vector<1x1x128xf32> to vector<1x128xf32>
    %cst_113 = arith.constant dense<0.000000e+00> : vector<16xf32>
    %304 = vector.multi_reduction <add>, %299, %cst_113 [1] : vector<16x128xf32> to vector<16xf32>
    %305 = vector.shape_cast %304 : vector<16xf32> to vector<16x1xf32>
    %cst_114 = arith.constant 1.280000e+02 : f32
    %306 = vector.broadcast %cst_114 : f32 to vector<16x1xf32>
    %307 = arith.divf %305, %306 : vector<16x1xf32>
    %308 = arith.mulf %299, %299 : vector<16x128xf32>
    %cst_115 = arith.constant dense<0.000000e+00> : vector<16xf32>
    %309 = vector.multi_reduction <add>, %308, %cst_115 [1] : vector<16x128xf32> to vector<16xf32>
    %310 = vector.shape_cast %309 : vector<16xf32> to vector<16x1xf32>
    %cst_116 = arith.constant 1.280000e+02 : f32
    %311 = vector.broadcast %cst_116 : f32 to vector<16x1xf32>
    %312 = arith.divf %310, %311 : vector<16x1xf32>
    %313 = arith.mulf %307, %307 : vector<16x1xf32>
    %314 = arith.subf %312, %313 : vector<16x1xf32>
    %315 = vector.broadcast %307 : vector<16x1xf32> to vector<16x128xf32>
    %316 = arith.subf %299, %315 : vector<16x128xf32>
    %cst_117 = arith.constant 9.99999974E-6 : f32
    %317 = vector.broadcast %cst_117 : f32 to vector<16x1xf32>
    %318 = arith.addf %314, %317 : vector<16x1xf32>
    %319 = math.rsqrt %318 : vector<16x1xf32>
    %320 = vector.broadcast %319 : vector<16x1xf32> to vector<16x128xf32>
    %321 = arith.mulf %316, %320 : vector<16x128xf32>
    %322 = vector.broadcast %301 : vector<1x128xf32> to vector<16x128xf32>
    %323 = arith.mulf %321, %322 : vector<16x128xf32>
    %324 = vector.broadcast %303 : vector<1x128xf32> to vector<16x128xf32>
    %325 = arith.addf %323, %324 : vector<16x128xf32>
    %326 = arith.truncf %325 : vector<16x128xf32> to vector<16x128xbf16>
    %c0_118 = arith.constant 0 : index
    %c0_119 = arith.constant 0 : index
    %c0_120 = arith.constant 0 : index
    %327 = vector.load %arg13[%c0_118, %c0_119, %c0_120] : memref<2x128x256xbf16, #tpu.memory_space<vmem>>, vector<1x128x256xbf16>
    %328 = vector.shape_cast %327 : vector<1x128x256xbf16> to vector<128x256xbf16>
    %cst_121 = arith.constant dense<0.000000e+00> : vector<16x256xf32>
    %329 = tpu.matmul %326, %328, %cst_121 {dimension_numbers = #tpu.dot_dimension_numbers<[1], [0], [0], [1], [0, 0, 1, 1], [], []>} : vector<16x128xbf16>, vector<128x256xbf16>, vector<16x256xf32> -> vector<16x256xf32>
    %c0_122 = arith.constant 0 : index
    %c0_123 = arith.constant 0 : index
    %c0_124 = arith.constant 0 : index
    %330 = vector.load %arg14[%c0_122, %c0_123, %c0_124] : memref<2x1x256xf32, #tpu.memory_space<vmem>>, vector<1x1x256xf32>
    %331 = vector.shape_cast %330 : vector<1x1x256xf32> to vector<1x256xf32>
    %332 = vector.broadcast %331 : vector<1x256xf32> to vector<16x256xf32>
    %333 = arith.addf %329, %332 : vector<16x256xf32>
    %334 = arith.mulf %333, %333 : vector<16x256xf32>
    %335 = arith.mulf %333, %334 : vector<16x256xf32>
    %cst_125 = arith.constant 4.471500e-02 : f32
    %336 = vector.broadcast %cst_125 : f32 to vector<16x256xf32>
    %337 = arith.mulf %336, %335 : vector<16x256xf32>
    %338 = arith.addf %333, %337 : vector<16x256xf32>
    %cst_126 = arith.constant 0.797884583 : f32
    %339 = vector.broadcast %cst_126 : f32 to vector<16x256xf32>
    %340 = arith.mulf %339, %338 : vector<16x256xf32>
    %341 = math.tanh %340 : vector<16x256xf32>
    %cst_127 = arith.constant 1.000000e+00 : f32
    %342 = vector.broadcast %cst_127 : f32 to vector<16x256xf32>
    %343 = arith.addf %342, %341 : vector<16x256xf32>
    %cst_128 = arith.constant 5.000000e-01 : f32
    %344 = vector.broadcast %cst_128 : f32 to vector<16x256xf32>
    %345 = arith.mulf %344, %343 : vector<16x256xf32>
    %346 = arith.mulf %333, %345 : vector<16x256xf32>
    %347 = arith.truncf %346 : vector<16x256xf32> to vector<16x256xbf16>
    %c0_129 = arith.constant 0 : index
    %c0_130 = arith.constant 0 : index
    %c0_131 = arith.constant 0 : index
    %348 = vector.load %arg15[%c0_129, %c0_130, %c0_131] : memref<2x256x128xbf16, #tpu.memory_space<vmem>>, vector<1x256x128xbf16>
    %349 = vector.shape_cast %348 : vector<1x256x128xbf16> to vector<256x128xbf16>
    %cst_132 = arith.constant dense<0.000000e+00> : vector<16x128xf32>
    %350 = tpu.matmul %347, %349, %cst_132 {dimension_numbers = #tpu.dot_dimension_numbers<[1], [0], [0], [1], [0, 0, 1, 1], [], []>} : vector<16x256xbf16>, vector<256x128xbf16>, vector<16x128xf32> -> vector<16x128xf32>
    %c0_133 = arith.constant 0 : index
    %c0_134 = arith.constant 0 : index
    %c0_135 = arith.constant 0 : index
    %351 = vector.load %arg16[%c0_133, %c0_134, %c0_135] : memref<2x1x128xf32, #tpu.memory_space<vmem>>, vector<1x1x128xf32>
    %352 = vector.shape_cast %351 : vector<1x1x128xf32> to vector<1x128xf32>
    %353 = vector.broadcast %352 : vector<1x128xf32> to vector<16x128xf32>
    %354 = arith.addf %350, %353 : vector<16x128xf32>
    %355 = arith.addf %354, %325 : vector<16x128xf32>
    %c0_136 = arith.constant 0 : index
    %c0_137 = arith.constant 0 : index
    %c0_138 = arith.constant 0 : index
    %356 = vector.load %arg17[%c0_136, %c0_137, %c0_138] : memref<2x1x128xf32, #tpu.memory_space<vmem>>, vector<1x1x128xf32>
    %357 = vector.shape_cast %356 : vector<1x1x128xf32> to vector<1x128xf32>
    %c0_139 = arith.constant 0 : index
    %c0_140 = arith.constant 0 : index
    %c0_141 = arith.constant 0 : index
    %358 = vector.load %arg18[%c0_139, %c0_140, %c0_141] : memref<2x1x128xf32, #tpu.memory_space<vmem>>, vector<1x1x128xf32>
    %359 = vector.shape_cast %358 : vector<1x1x128xf32> to vector<1x128xf32>
    %cst_142 = arith.constant dense<0.000000e+00> : vector<16xf32>
    %360 = vector.multi_reduction <add>, %355, %cst_142 [1] : vector<16x128xf32> to vector<16xf32>
    %361 = vector.shape_cast %360 : vector<16xf32> to vector<16x1xf32>
    %cst_143 = arith.constant 1.280000e+02 : f32
    %362 = vector.broadcast %cst_143 : f32 to vector<16x1xf32>
    %363 = arith.divf %361, %362 : vector<16x1xf32>
    %364 = arith.mulf %355, %355 : vector<16x128xf32>
    %cst_144 = arith.constant dense<0.000000e+00> : vector<16xf32>
    %365 = vector.multi_reduction <add>, %364, %cst_144 [1] : vector<16x128xf32> to vector<16xf32>
    %366 = vector.shape_cast %365 : vector<16xf32> to vector<16x1xf32>
    %cst_145 = arith.constant 1.280000e+02 : f32
    %367 = vector.broadcast %cst_145 : f32 to vector<16x1xf32>
    %368 = arith.divf %366, %367 : vector<16x1xf32>
    %369 = arith.mulf %363, %363 : vector<16x1xf32>
    %370 = arith.subf %368, %369 : vector<16x1xf32>
    %371 = vector.broadcast %363 : vector<16x1xf32> to vector<16x128xf32>
    %372 = arith.subf %355, %371 : vector<16x128xf32>
    %cst_146 = arith.constant 9.99999974E-6 : f32
    %373 = vector.broadcast %cst_146 : f32 to vector<16x1xf32>
    %374 = arith.addf %370, %373 : vector<16x1xf32>
    %375 = math.rsqrt %374 : vector<16x1xf32>
    %376 = vector.broadcast %375 : vector<16x1xf32> to vector<16x128xf32>
    %377 = arith.mulf %372, %376 : vector<16x128xf32>
    %378 = vector.broadcast %357 : vector<1x128xf32> to vector<16x128xf32>
    %379 = arith.mulf %377, %378 : vector<16x128xf32>
    %380 = vector.broadcast %359 : vector<1x128xf32> to vector<16x128xf32>
    %381 = arith.addf %379, %380 : vector<16x128xf32>
    %382 = arith.truncf %381 : vector<16x128xf32> to vector<16x128xbf16>
    %c1_147 = arith.constant 1 : index
    %c0_148 = arith.constant 0 : index
    %c0_149 = arith.constant 0 : index
    %383 = vector.load %arg7[%c1_147, %c0_148, %c0_149] : memref<2x128x384xbf16, #tpu.memory_space<vmem>>, vector<1x128x384xbf16>
    %384 = vector.shape_cast %383 : vector<1x128x384xbf16> to vector<128x384xbf16>
    %cst_150 = arith.constant dense<0.000000e+00> : vector<16x384xf32>
    %385 = tpu.matmul %382, %384, %cst_150 {dimension_numbers = #tpu.dot_dimension_numbers<[1], [0], [0], [1], [0, 0, 1, 1], [], []>} : vector<16x128xbf16>, vector<128x384xbf16>, vector<16x384xf32> -> vector<16x384xf32>
    %c1_151 = arith.constant 1 : index
    %c0_152 = arith.constant 0 : index
    %c0_153 = arith.constant 0 : index
    %386 = vector.load %arg8[%c1_151, %c0_152, %c0_153] : memref<2x1x384xf32, #tpu.memory_space<vmem>>, vector<1x1x384xf32>
    %387 = vector.shape_cast %386 : vector<1x1x384xf32> to vector<1x384xf32>
    %388 = vector.broadcast %387 : vector<1x384xf32> to vector<16x384xf32>
    %389 = arith.addf %385, %388 : vector<16x384xf32>
    %390 = vector.extract_strided_slice %389 {offsets = [0, 0], sizes = [16, 128], strides = [1, 1]} : vector<16x384xf32> to vector<16x128xf32>
    %391 = arith.truncf %390 : vector<16x128xf32> to vector<16x128xbf16>
    %392 = vector.extract_strided_slice %389 {offsets = [0, 128], sizes = [16, 128], strides = [1, 1]} : vector<16x384xf32> to vector<16x128xf32>
    %393 = arith.truncf %392 : vector<16x128xf32> to vector<16x128xbf16>
    %394 = vector.extract_strided_slice %389 {offsets = [0, 256], sizes = [16, 128], strides = [1, 1]} : vector<16x384xf32> to vector<16x128xf32>
    %395 = arith.truncf %394 : vector<16x128xf32> to vector<16x128xbf16>
    %396 = vector.extract_strided_slice %391 {offsets = [0, 0], sizes = [16, 32], strides = [1, 1]} : vector<16x128xbf16> to vector<16x32xbf16>
    %397 = vector.extract_strided_slice %393 {offsets = [0, 0], sizes = [16, 32], strides = [1, 1]} : vector<16x128xbf16> to vector<16x32xbf16>
    %398 = vector.extract_strided_slice %395 {offsets = [0, 0], sizes = [16, 32], strides = [1, 1]} : vector<16x128xbf16> to vector<16x32xbf16>
    %cst_154 = arith.constant dense<0.000000e+00> : vector<16x16xf32>
    %399 = tpu.matmul %396, %397, %cst_154 {dimension_numbers = #tpu.dot_dimension_numbers<[1], [1], [0], [0], [0, 0, 1, 0], [], []>} : vector<16x32xbf16>, vector<16x32xbf16>, vector<16x16xf32> -> vector<16x16xf32>
    %cst_155 = arith.constant 0.176776692 : f32
    %400 = vector.broadcast %cst_155 : f32 to vector<16x16xf32>
    %401 = arith.mulf %399, %400 : vector<16x16xf32>
    %cst_156 = arith.constant dense<0xFF800000> : vector<16xf32>
    %402 = vector.multi_reduction <maximumf>, %401, %cst_156 [1] : vector<16x16xf32> to vector<16xf32>
    %403 = vector.shape_cast %402 : vector<16xf32> to vector<16x1xf32>
    %404 = vector.broadcast %403 : vector<16x1xf32> to vector<16x16xf32>
    %405 = arith.subf %401, %404 : vector<16x16xf32>
    %406 = math.exp %405 : vector<16x16xf32>
    %cst_157 = arith.constant dense<0.000000e+00> : vector<16xf32>
    %407 = vector.multi_reduction <add>, %406, %cst_157 [1] : vector<16x16xf32> to vector<16xf32>
    %408 = vector.shape_cast %407 : vector<16xf32> to vector<16x1xf32>
    %409 = tpu.reciprocal %408 {approx = true} : vector<16x1xf32> -> vector<16x1xf32>
    %410 = vector.broadcast %409 : vector<16x1xf32> to vector<16x16xf32>
    %411 = arith.mulf %406, %410 : vector<16x16xf32>
    %412 = arith.truncf %411 : vector<16x16xf32> to vector<16x16xbf16>
    %cst_158 = arith.constant dense<0.000000e+00> : vector<16x32xf32>
    %413 = tpu.matmul %412, %398, %cst_158 {dimension_numbers = #tpu.dot_dimension_numbers<[1], [0], [0], [1], [0, 0, 1, 1], [], []>} : vector<16x16xbf16>, vector<16x32xbf16>, vector<16x32xf32> -> vector<16x32xf32>
    %414 = vector.extract_strided_slice %391 {offsets = [0, 32], sizes = [16, 32], strides = [1, 1]} : vector<16x128xbf16> to vector<16x32xbf16>
    %415 = vector.extract_strided_slice %393 {offsets = [0, 32], sizes = [16, 32], strides = [1, 1]} : vector<16x128xbf16> to vector<16x32xbf16>
    %416 = vector.extract_strided_slice %395 {offsets = [0, 32], sizes = [16, 32], strides = [1, 1]} : vector<16x128xbf16> to vector<16x32xbf16>
    %cst_159 = arith.constant dense<0.000000e+00> : vector<16x16xf32>
    %417 = tpu.matmul %414, %415, %cst_159 {dimension_numbers = #tpu.dot_dimension_numbers<[1], [1], [0], [0], [0, 0, 1, 0], [], []>} : vector<16x32xbf16>, vector<16x32xbf16>, vector<16x16xf32> -> vector<16x16xf32>
    %cst_160 = arith.constant 0.176776692 : f32
    %418 = vector.broadcast %cst_160 : f32 to vector<16x16xf32>
    %419 = arith.mulf %417, %418 : vector<16x16xf32>
    %cst_161 = arith.constant dense<0xFF800000> : vector<16xf32>
    %420 = vector.multi_reduction <maximumf>, %419, %cst_161 [1] : vector<16x16xf32> to vector<16xf32>
    %421 = vector.shape_cast %420 : vector<16xf32> to vector<16x1xf32>
    %422 = vector.broadcast %421 : vector<16x1xf32> to vector<16x16xf32>
    %423 = arith.subf %419, %422 : vector<16x16xf32>
    %424 = math.exp %423 : vector<16x16xf32>
    %cst_162 = arith.constant dense<0.000000e+00> : vector<16xf32>
    %425 = vector.multi_reduction <add>, %424, %cst_162 [1] : vector<16x16xf32> to vector<16xf32>
    %426 = vector.shape_cast %425 : vector<16xf32> to vector<16x1xf32>
    %427 = tpu.reciprocal %426 {approx = true} : vector<16x1xf32> -> vector<16x1xf32>
    %428 = vector.broadcast %427 : vector<16x1xf32> to vector<16x16xf32>
    %429 = arith.mulf %424, %428 : vector<16x16xf32>
    %430 = arith.truncf %429 : vector<16x16xf32> to vector<16x16xbf16>
    %cst_163 = arith.constant dense<0.000000e+00> : vector<16x32xf32>
    %431 = tpu.matmul %430, %416, %cst_163 {dimension_numbers = #tpu.dot_dimension_numbers<[1], [0], [0], [1], [0, 0, 1, 1], [], []>} : vector<16x16xbf16>, vector<16x32xbf16>, vector<16x32xf32> -> vector<16x32xf32>
    %432 = vector.extract_strided_slice %391 {offsets = [0, 64], sizes = [16, 32], strides = [1, 1]} : vector<16x128xbf16> to vector<16x32xbf16>
    %433 = vector.extract_strided_slice %393 {offsets = [0, 64], sizes = [16, 32], strides = [1, 1]} : vector<16x128xbf16> to vector<16x32xbf16>
    %434 = vector.extract_strided_slice %395 {offsets = [0, 64], sizes = [16, 32], strides = [1, 1]} : vector<16x128xbf16> to vector<16x32xbf16>
    %cst_164 = arith.constant dense<0.000000e+00> : vector<16x16xf32>
    %435 = tpu.matmul %432, %433, %cst_164 {dimension_numbers = #tpu.dot_dimension_numbers<[1], [1], [0], [0], [0, 0, 1, 0], [], []>} : vector<16x32xbf16>, vector<16x32xbf16>, vector<16x16xf32> -> vector<16x16xf32>
    %cst_165 = arith.constant 0.176776692 : f32
    %436 = vector.broadcast %cst_165 : f32 to vector<16x16xf32>
    %437 = arith.mulf %435, %436 : vector<16x16xf32>
    %cst_166 = arith.constant dense<0xFF800000> : vector<16xf32>
    %438 = vector.multi_reduction <maximumf>, %437, %cst_166 [1] : vector<16x16xf32> to vector<16xf32>
    %439 = vector.shape_cast %438 : vector<16xf32> to vector<16x1xf32>
    %440 = vector.broadcast %439 : vector<16x1xf32> to vector<16x16xf32>
    %441 = arith.subf %437, %440 : vector<16x16xf32>
    %442 = math.exp %441 : vector<16x16xf32>
    %cst_167 = arith.constant dense<0.000000e+00> : vector<16xf32>
    %443 = vector.multi_reduction <add>, %442, %cst_167 [1] : vector<16x16xf32> to vector<16xf32>
    %444 = vector.shape_cast %443 : vector<16xf32> to vector<16x1xf32>
    %445 = tpu.reciprocal %444 {approx = true} : vector<16x1xf32> -> vector<16x1xf32>
    %446 = vector.broadcast %445 : vector<16x1xf32> to vector<16x16xf32>
    %447 = arith.mulf %442, %446 : vector<16x16xf32>
    %448 = arith.truncf %447 : vector<16x16xf32> to vector<16x16xbf16>
    %cst_168 = arith.constant dense<0.000000e+00> : vector<16x32xf32>
    %449 = tpu.matmul %448, %434, %cst_168 {dimension_numbers = #tpu.dot_dimension_numbers<[1], [0], [0], [1], [0, 0, 1, 1], [], []>} : vector<16x16xbf16>, vector<16x32xbf16>, vector<16x32xf32> -> vector<16x32xf32>
    %450 = vector.extract_strided_slice %391 {offsets = [0, 96], sizes = [16, 32], strides = [1, 1]} : vector<16x128xbf16> to vector<16x32xbf16>
    %451 = vector.extract_strided_slice %393 {offsets = [0, 96], sizes = [16, 32], strides = [1, 1]} : vector<16x128xbf16> to vector<16x32xbf16>
    %452 = vector.extract_strided_slice %395 {offsets = [0, 96], sizes = [16, 32], strides = [1, 1]} : vector<16x128xbf16> to vector<16x32xbf16>
    %cst_169 = arith.constant dense<0.000000e+00> : vector<16x16xf32>
    %453 = tpu.matmul %450, %451, %cst_169 {dimension_numbers = #tpu.dot_dimension_numbers<[1], [1], [0], [0], [0, 0, 1, 0], [], []>} : vector<16x32xbf16>, vector<16x32xbf16>, vector<16x16xf32> -> vector<16x16xf32>
    %cst_170 = arith.constant 0.176776692 : f32
    %454 = vector.broadcast %cst_170 : f32 to vector<16x16xf32>
    %455 = arith.mulf %453, %454 : vector<16x16xf32>
    %cst_171 = arith.constant dense<0xFF800000> : vector<16xf32>
    %456 = vector.multi_reduction <maximumf>, %455, %cst_171 [1] : vector<16x16xf32> to vector<16xf32>
    %457 = vector.shape_cast %456 : vector<16xf32> to vector<16x1xf32>
    %458 = vector.broadcast %457 : vector<16x1xf32> to vector<16x16xf32>
    %459 = arith.subf %455, %458 : vector<16x16xf32>
    %460 = math.exp %459 : vector<16x16xf32>
    %cst_172 = arith.constant dense<0.000000e+00> : vector<16xf32>
    %461 = vector.multi_reduction <add>, %460, %cst_172 [1] : vector<16x16xf32> to vector<16xf32>
    %462 = vector.shape_cast %461 : vector<16xf32> to vector<16x1xf32>
    %463 = tpu.reciprocal %462 {approx = true} : vector<16x1xf32> -> vector<16x1xf32>
    %464 = vector.broadcast %463 : vector<16x1xf32> to vector<16x16xf32>
    %465 = arith.mulf %460, %464 : vector<16x16xf32>
    %466 = arith.truncf %465 : vector<16x16xf32> to vector<16x16xbf16>
    %cst_173 = arith.constant dense<0.000000e+00> : vector<16x32xf32>
    %467 = tpu.matmul %466, %452, %cst_173 {dimension_numbers = #tpu.dot_dimension_numbers<[1], [0], [0], [1], [0, 0, 1, 1], [], []>} : vector<16x16xbf16>, vector<16x32xbf16>, vector<16x32xf32> -> vector<16x32xf32>
    %468 = tpu.concatenate %413, %431, %449, %467 in 1 : vector<16x32xf32>, vector<16x32xf32>, vector<16x32xf32>, vector<16x32xf32> -> vector<16x128xf32>
    %469 = arith.truncf %468 : vector<16x128xf32> to vector<16x128xbf16>
    %c1_174 = arith.constant 1 : index
    %c0_175 = arith.constant 0 : index
    %c0_176 = arith.constant 0 : index
    %470 = vector.load %arg9[%c1_174, %c0_175, %c0_176] : memref<2x128x128xbf16, #tpu.memory_space<vmem>>, vector<1x128x128xbf16>
    %471 = vector.shape_cast %470 : vector<1x128x128xbf16> to vector<128x128xbf16>
    %cst_177 = arith.constant dense<0.000000e+00> : vector<16x128xf32>
    %472 = tpu.matmul %469, %471, %cst_177 {dimension_numbers = #tpu.dot_dimension_numbers<[1], [0], [0], [1], [0, 0, 1, 1], [], []>} : vector<16x128xbf16>, vector<128x128xbf16>, vector<16x128xf32> -> vector<16x128xf32>
    %c1_178 = arith.constant 1 : index
    %c0_179 = arith.constant 0 : index
    %c0_180 = arith.constant 0 : index
    %473 = vector.load %arg10[%c1_178, %c0_179, %c0_180] : memref<2x1x128xf32, #tpu.memory_space<vmem>>, vector<1x1x128xf32>
    %474 = vector.shape_cast %473 : vector<1x1x128xf32> to vector<1x128xf32>
    %475 = vector.broadcast %474 : vector<1x128xf32> to vector<16x128xf32>
    %476 = arith.addf %472, %475 : vector<16x128xf32>
    %477 = arith.addf %476, %381 : vector<16x128xf32>
    %c1_181 = arith.constant 1 : index
    %c0_182 = arith.constant 0 : index
    %c0_183 = arith.constant 0 : index
    %478 = vector.load %arg11[%c1_181, %c0_182, %c0_183] : memref<2x1x128xf32, #tpu.memory_space<vmem>>, vector<1x1x128xf32>
    %479 = vector.shape_cast %478 : vector<1x1x128xf32> to vector<1x128xf32>
    %c1_184 = arith.constant 1 : index
    %c0_185 = arith.constant 0 : index
    %c0_186 = arith.constant 0 : index
    %480 = vector.load %arg12[%c1_184, %c0_185, %c0_186] : memref<2x1x128xf32, #tpu.memory_space<vmem>>, vector<1x1x128xf32>
    %481 = vector.shape_cast %480 : vector<1x1x128xf32> to vector<1x128xf32>
    %cst_187 = arith.constant dense<0.000000e+00> : vector<16xf32>
    %482 = vector.multi_reduction <add>, %477, %cst_187 [1] : vector<16x128xf32> to vector<16xf32>
    %483 = vector.shape_cast %482 : vector<16xf32> to vector<16x1xf32>
    %cst_188 = arith.constant 1.280000e+02 : f32
    %484 = vector.broadcast %cst_188 : f32 to vector<16x1xf32>
    %485 = arith.divf %483, %484 : vector<16x1xf32>
    %486 = arith.mulf %477, %477 : vector<16x128xf32>
    %cst_189 = arith.constant dense<0.000000e+00> : vector<16xf32>
    %487 = vector.multi_reduction <add>, %486, %cst_189 [1] : vector<16x128xf32> to vector<16xf32>
    %488 = vector.shape_cast %487 : vector<16xf32> to vector<16x1xf32>
    %cst_190 = arith.constant 1.280000e+02 : f32
    %489 = vector.broadcast %cst_190 : f32 to vector<16x1xf32>
    %490 = arith.divf %488, %489 : vector<16x1xf32>
    %491 = arith.mulf %485, %485 : vector<16x1xf32>
    %492 = arith.subf %490, %491 : vector<16x1xf32>
    %493 = vector.broadcast %485 : vector<16x1xf32> to vector<16x128xf32>
    %494 = arith.subf %477, %493 : vector<16x128xf32>
    %cst_191 = arith.constant 9.99999974E-6 : f32
    %495 = vector.broadcast %cst_191 : f32 to vector<16x1xf32>
    %496 = arith.addf %492, %495 : vector<16x1xf32>
    %497 = math.rsqrt %496 : vector<16x1xf32>
    %498 = vector.broadcast %497 : vector<16x1xf32> to vector<16x128xf32>
    %499 = arith.mulf %494, %498 : vector<16x128xf32>
    %500 = vector.broadcast %479 : vector<1x128xf32> to vector<16x128xf32>
    %501 = arith.mulf %499, %500 : vector<16x128xf32>
    %502 = vector.broadcast %481 : vector<1x128xf32> to vector<16x128xf32>
    %503 = arith.addf %501, %502 : vector<16x128xf32>
    %504 = arith.truncf %503 : vector<16x128xf32> to vector<16x128xbf16>
    %c1_192 = arith.constant 1 : index
    %c0_193 = arith.constant 0 : index
    %c0_194 = arith.constant 0 : index
    %505 = vector.load %arg13[%c1_192, %c0_193, %c0_194] : memref<2x128x256xbf16, #tpu.memory_space<vmem>>, vector<1x128x256xbf16>
    %506 = vector.shape_cast %505 : vector<1x128x256xbf16> to vector<128x256xbf16>
    %cst_195 = arith.constant dense<0.000000e+00> : vector<16x256xf32>
    %507 = tpu.matmul %504, %506, %cst_195 {dimension_numbers = #tpu.dot_dimension_numbers<[1], [0], [0], [1], [0, 0, 1, 1], [], []>} : vector<16x128xbf16>, vector<128x256xbf16>, vector<16x256xf32> -> vector<16x256xf32>
    %c1_196 = arith.constant 1 : index
    %c0_197 = arith.constant 0 : index
    %c0_198 = arith.constant 0 : index
    %508 = vector.load %arg14[%c1_196, %c0_197, %c0_198] : memref<2x1x256xf32, #tpu.memory_space<vmem>>, vector<1x1x256xf32>
    %509 = vector.shape_cast %508 : vector<1x1x256xf32> to vector<1x256xf32>
    %510 = vector.broadcast %509 : vector<1x256xf32> to vector<16x256xf32>
    %511 = arith.addf %507, %510 : vector<16x256xf32>
    %512 = arith.mulf %511, %511 : vector<16x256xf32>
    %513 = arith.mulf %511, %512 : vector<16x256xf32>
    %cst_199 = arith.constant 4.471500e-02 : f32
    %514 = vector.broadcast %cst_199 : f32 to vector<16x256xf32>
    %515 = arith.mulf %514, %513 : vector<16x256xf32>
    %516 = arith.addf %511, %515 : vector<16x256xf32>
    %cst_200 = arith.constant 0.797884583 : f32
    %517 = vector.broadcast %cst_200 : f32 to vector<16x256xf32>
    %518 = arith.mulf %517, %516 : vector<16x256xf32>
    %519 = math.tanh %518 : vector<16x256xf32>
    %cst_201 = arith.constant 1.000000e+00 : f32
    %520 = vector.broadcast %cst_201 : f32 to vector<16x256xf32>
    %521 = arith.addf %520, %519 : vector<16x256xf32>
    %cst_202 = arith.constant 5.000000e-01 : f32
    %522 = vector.broadcast %cst_202 : f32 to vector<16x256xf32>
    %523 = arith.mulf %522, %521 : vector<16x256xf32>
    %524 = arith.mulf %511, %523 : vector<16x256xf32>
    %525 = arith.truncf %524 : vector<16x256xf32> to vector<16x256xbf16>
    %c1_203 = arith.constant 1 : index
    %c0_204 = arith.constant 0 : index
    %c0_205 = arith.constant 0 : index
    %526 = vector.load %arg15[%c1_203, %c0_204, %c0_205] : memref<2x256x128xbf16, #tpu.memory_space<vmem>>, vector<1x256x128xbf16>
    %527 = vector.shape_cast %526 : vector<1x256x128xbf16> to vector<256x128xbf16>
    %cst_206 = arith.constant dense<0.000000e+00> : vector<16x128xf32>
    %528 = tpu.matmul %525, %527, %cst_206 {dimension_numbers = #tpu.dot_dimension_numbers<[1], [0], [0], [1], [0, 0, 1, 1], [], []>} : vector<16x256xbf16>, vector<256x128xbf16>, vector<16x128xf32> -> vector<16x128xf32>
    %c1_207 = arith.constant 1 : index
    %c0_208 = arith.constant 0 : index
    %c0_209 = arith.constant 0 : index
    %529 = vector.load %arg16[%c1_207, %c0_208, %c0_209] : memref<2x1x128xf32, #tpu.memory_space<vmem>>, vector<1x1x128xf32>
    %530 = vector.shape_cast %529 : vector<1x1x128xf32> to vector<1x128xf32>
    %531 = vector.broadcast %530 : vector<1x128xf32> to vector<16x128xf32>
    %532 = arith.addf %528, %531 : vector<16x128xf32>
    %533 = arith.addf %532, %503 : vector<16x128xf32>
    %c1_210 = arith.constant 1 : index
    %c0_211 = arith.constant 0 : index
    %c0_212 = arith.constant 0 : index
    %534 = vector.load %arg17[%c1_210, %c0_211, %c0_212] : memref<2x1x128xf32, #tpu.memory_space<vmem>>, vector<1x1x128xf32>
    %535 = vector.shape_cast %534 : vector<1x1x128xf32> to vector<1x128xf32>
    %c1_213 = arith.constant 1 : index
    %c0_214 = arith.constant 0 : index
    %c0_215 = arith.constant 0 : index
    %536 = vector.load %arg18[%c1_213, %c0_214, %c0_215] : memref<2x1x128xf32, #tpu.memory_space<vmem>>, vector<1x1x128xf32>
    %537 = vector.shape_cast %536 : vector<1x1x128xf32> to vector<1x128xf32>
    %cst_216 = arith.constant dense<0.000000e+00> : vector<16xf32>
    %538 = vector.multi_reduction <add>, %533, %cst_216 [1] : vector<16x128xf32> to vector<16xf32>
    %539 = vector.shape_cast %538 : vector<16xf32> to vector<16x1xf32>
    %cst_217 = arith.constant 1.280000e+02 : f32
    %540 = vector.broadcast %cst_217 : f32 to vector<16x1xf32>
    %541 = arith.divf %539, %540 : vector<16x1xf32>
    %542 = arith.mulf %533, %533 : vector<16x128xf32>
    %cst_218 = arith.constant dense<0.000000e+00> : vector<16xf32>
    %543 = vector.multi_reduction <add>, %542, %cst_218 [1] : vector<16x128xf32> to vector<16xf32>
    %544 = vector.shape_cast %543 : vector<16xf32> to vector<16x1xf32>
    %cst_219 = arith.constant 1.280000e+02 : f32
    %545 = vector.broadcast %cst_219 : f32 to vector<16x1xf32>
    %546 = arith.divf %544, %545 : vector<16x1xf32>
    %547 = arith.mulf %541, %541 : vector<16x1xf32>
    %548 = arith.subf %546, %547 : vector<16x1xf32>
    %549 = vector.broadcast %541 : vector<16x1xf32> to vector<16x128xf32>
    %550 = arith.subf %533, %549 : vector<16x128xf32>
    %cst_220 = arith.constant 9.99999974E-6 : f32
    %551 = vector.broadcast %cst_220 : f32 to vector<16x1xf32>
    %552 = arith.addf %548, %551 : vector<16x1xf32>
    %553 = math.rsqrt %552 : vector<16x1xf32>
    %554 = vector.broadcast %553 : vector<16x1xf32> to vector<16x128xf32>
    %555 = arith.mulf %550, %554 : vector<16x128xf32>
    %556 = vector.broadcast %535 : vector<1x128xf32> to vector<16x128xf32>
    %557 = arith.mulf %555, %556 : vector<16x128xf32>
    %558 = vector.broadcast %537 : vector<1x128xf32> to vector<16x128xf32>
    %559 = arith.addf %557, %558 : vector<16x128xf32>
    %c0_221 = arith.constant 0 : index
    %c0_222 = arith.constant 0 : index
    %560 = vector.load %arg23[%c0_221, %c0_222] : memref<16x128xf32, #tpu.memory_space<vmem>>, vector<16x128xf32>
    tpu.vector_store %arg23[%c0_221, %c0_222], %559 {strides = array<i32>} : memref<16x128xf32, #tpu.memory_space<vmem>>, vector<16x128xf32>,
    %561 = vector.extract_strided_slice %559 {offsets = [0, 0], sizes = [1, 128], strides = [1, 1]} : vector<16x128xf32> to vector<1x128xf32>
    %562 = arith.truncf %561 : vector<1x128xf32> to vector<1x128xbf16>
    %c0_223 = arith.constant 0 : index
    %c0_224 = arith.constant 0 : index
    %563 = vector.load %arg19[%c0_223, %c0_224] : memref<128x128xbf16, #tpu.memory_space<vmem>>, vector<128x128xbf16>
    %cst_225 = arith.constant dense<0.000000e+00> : vector<1x128xf32>
    %564 = tpu.matmul %562, %563, %cst_225 {dimension_numbers = #tpu.dot_dimension_numbers<[1], [0], [0], [1], [0, 0, 1, 1], [], []>} : vector<1x128xbf16>, vector<128x128xbf16>, vector<1x128xf32> -> vector<1x128xf32>
    %c0_226 = arith.constant 0 : index
    %c0_227 = arith.constant 0 : index
    %565 = vector.load %arg20[%c0_226, %c0_227] : memref<1x128xf32, #tpu.memory_space<vmem>>, vector<1x128xf32>
    %566 = arith.addf %564, %565 : vector<1x128xf32>
    %567 = math.tanh %566 : vector<1x128xf32>
    %568 = arith.truncf %567 : vector<1x128xf32> to vector<1x128xbf16>
    %c0_228 = arith.constant 0 : index
    %c0_229 = arith.constant 0 : index
    %569 = vector.load %arg21[%c0_228, %c0_229] : memref<128x128xbf16, #tpu.memory_space<vmem>>, vector<128x128xbf16>
    %cst_230 = arith.constant dense<0.000000e+00> : vector<1x128xf32>
    %570 = tpu.matmul %568, %569, %cst_230 {dimension_numbers = #tpu.dot_dimension_numbers<[1], [0], [0], [1], [0, 0, 1, 1], [], []>} : vector<1x128xbf16>, vector<128x128xbf16>, vector<1x128xf32> -> vector<1x128xf32>
    %c0_231 = arith.constant 0 : index
    %c0_232 = arith.constant 0 : index
    %571 = vector.load %arg22[%c0_231, %c0_232] : memref<1x128xf32, #tpu.memory_space<vmem>>, vector<1x128xf32>
    %572 = arith.addf %570, %571 : vector<1x128xf32>
    %c0_233 = arith.constant 0 : index
    %c0_234 = arith.constant 0 : index
    %573 = vector.load %arg24[%c0_233, %c0_234] : memref<1x128xf32, #tpu.memory_space<vmem>>, vector<1x128xf32>
    tpu.vector_store %arg24[%c0_233, %c0_234], %572 {strides = array<i32>} : memref<1x128xf32, #tpu.memory_space<vmem>>, vector<1x128xf32>,
    return
  }
  func.func @transform_0(%arg0: i32, %arg1: memref<16xi32, #tpu.memory_space<smem>>) -> (i32, i32) {
    %c0_i32 = arith.constant 0 : i32
    %c0_i32_0 = arith.constant 0 : i32
    %c0_i32_1 = arith.constant 0 : i32
    return %c0_i32, %c0_i32_0 : i32, i32
  }
  func.func @transform_1(%arg0: i32, %arg1: memref<16xi32, #tpu.memory_space<smem>>) -> (i32, i32) {
    %c0_i32 = arith.constant 0 : i32
    %c0_i32_0 = arith.constant 0 : i32
    %c0_i32_1 = arith.constant 0 : i32
    return %c0_i32, %c0_i32_0 : i32, i32
  }
  func.func @transform_2(%arg0: i32, %arg1: memref<16xi32, #tpu.memory_space<smem>>) -> (i32, i32) {
    %c0_i32 = arith.constant 0 : i32
    %c0_i32_0 = arith.constant 0 : i32
    %c0_i32_1 = arith.constant 0 : i32
    return %c0_i32, %c0_i32_0 : i32, i32
  }
  func.func @transform_3(%arg0: i32, %arg1: memref<16xi32, #tpu.memory_space<smem>>) -> (i32, i32) {
    %c0_i32 = arith.constant 0 : i32
    %c0_i32_0 = arith.constant 0 : i32
    %c0_i32_1 = arith.constant 0 : i32
    return %c0_i32, %c0_i32_0 : i32, i32
  }
  func.func @transform_4(%arg0: i32, %arg1: memref<16xi32, #tpu.memory_space<smem>>) -> (i32, i32) {
    %c0_i32 = arith.constant 0 : i32
    %c0_i32_0 = arith.constant 0 : i32
    %c0_i32_1 = arith.constant 0 : i32
    return %c0_i32, %c0_i32_0 : i32, i32
  }
  func.func @transform_5(%arg0: i32, %arg1: memref<16xi32, #tpu.memory_space<smem>>) -> (i32, i32, i32) {
    %c0_i32 = arith.constant 0 : i32
    %c0_i32_0 = arith.constant 0 : i32
    %c0_i32_1 = arith.constant 0 : i32
    %c0_i32_2 = arith.constant 0 : i32
    return %c0_i32, %c0_i32_0, %c0_i32_1 : i32, i32, i32
  }
  func.func @transform_6(%arg0: i32, %arg1: memref<16xi32, #tpu.memory_space<smem>>) -> (i32, i32, i32) {
    %c0_i32 = arith.constant 0 : i32
    %c0_i32_0 = arith.constant 0 : i32
    %c0_i32_1 = arith.constant 0 : i32
    %c0_i32_2 = arith.constant 0 : i32
    return %c0_i32, %c0_i32_0, %c0_i32_1 : i32, i32, i32
  }
  func.func @transform_7(%arg0: i32, %arg1: memref<16xi32, #tpu.memory_space<smem>>) -> (i32, i32, i32) {
    %c0_i32 = arith.constant 0 : i32
    %c0_i32_0 = arith.constant 0 : i32
    %c0_i32_1 = arith.constant 0 : i32
    %c0_i32_2 = arith.constant 0 : i32
    return %c0_i32, %c0_i32_0, %c0_i32_1 : i32, i32, i32
  }
  func.func @transform_8(%arg0: i32, %arg1: memref<16xi32, #tpu.memory_space<smem>>) -> (i32, i32, i32) {
    %c0_i32 = arith.constant 0 : i32
    %c0_i32_0 = arith.constant 0 : i32
    %c0_i32_1 = arith.constant 0 : i32
    %c0_i32_2 = arith.constant 0 : i32
    return %c0_i32, %c0_i32_0, %c0_i32_1 : i32, i32, i32
  }
  func.func @transform_9(%arg0: i32, %arg1: memref<16xi32, #tpu.memory_space<smem>>) -> (i32, i32, i32) {
    %c0_i32 = arith.constant 0 : i32
    %c0_i32_0 = arith.constant 0 : i32
    %c0_i32_1 = arith.constant 0 : i32
    %c0_i32_2 = arith.constant 0 : i32
    return %c0_i32, %c0_i32_0, %c0_i32_1 : i32, i32, i32
  }
  func.func @transform_10(%arg0: i32, %arg1: memref<16xi32, #tpu.memory_space<smem>>) -> (i32, i32, i32) {
    %c0_i32 = arith.constant 0 : i32
    %c0_i32_0 = arith.constant 0 : i32
    %c0_i32_1 = arith.constant 0 : i32
    %c0_i32_2 = arith.constant 0 : i32
    return %c0_i32, %c0_i32_0, %c0_i32_1 : i32, i32, i32
  }
  func.func @transform_11(%arg0: i32, %arg1: memref<16xi32, #tpu.memory_space<smem>>) -> (i32, i32, i32) {
    %c0_i32 = arith.constant 0 : i32
    %c0_i32_0 = arith.constant 0 : i32
    %c0_i32_1 = arith.constant 0 : i32
    %c0_i32_2 = arith.constant 0 : i32
    return %c0_i32, %c0_i32_0, %c0_i32_1 : i32, i32, i32
  }
  func.func @transform_12(%arg0: i32, %arg1: memref<16xi32, #tpu.memory_space<smem>>) -> (i32, i32, i32) {
    %c0_i32 = arith.constant 0 : i32
    %c0_i32_0 = arith.constant 0 : i32
    %c0_i32_1 = arith.constant 0 : i32
    %c0_i32_2 = arith.constant 0 : i32
    return %c0_i32, %c0_i32_0, %c0_i32_1 : i32, i32, i32
  }
  func.func @transform_13(%arg0: i32, %arg1: memref<16xi32, #tpu.memory_space<smem>>) -> (i32, i32, i32) {
    %c0_i32 = arith.constant 0 : i32
    %c0_i32_0 = arith.constant 0 : i32
    %c0_i32_1 = arith.constant 0 : i32
    %c0_i32_2 = arith.constant 0 : i32
    return %c0_i32, %c0_i32_0, %c0_i32_1 : i32, i32, i32
  }
  func.func @transform_14(%arg0: i32, %arg1: memref<16xi32, #tpu.memory_space<smem>>) -> (i32, i32, i32) {
    %c0_i32 = arith.constant 0 : i32
    %c0_i32_0 = arith.constant 0 : i32
    %c0_i32_1 = arith.constant 0 : i32
    %c0_i32_2 = arith.constant 0 : i32
    return %c0_i32, %c0_i32_0, %c0_i32_1 : i32, i32, i32
  }
  func.func @transform_15(%arg0: i32, %arg1: memref<16xi32, #tpu.memory_space<smem>>) -> (i32, i32, i32) {
    %c0_i32 = arith.constant 0 : i32
    %c0_i32_0 = arith.constant 0 : i32
    %c0_i32_1 = arith.constant 0 : i32
    %c0_i32_2 = arith.constant 0 : i32
    return %c0_i32, %c0_i32_0, %c0_i32_1 : i32, i32, i32
  }
  func.func @transform_16(%arg0: i32, %arg1: memref<16xi32, #tpu.memory_space<smem>>) -> (i32, i32, i32) {
    %c0_i32 = arith.constant 0 : i32
    %c0_i32_0 = arith.constant 0 : i32
    %c0_i32_1 = arith.constant 0 : i32
    %c0_i32_2 = arith.constant 0 : i32
    return %c0_i32, %c0_i32_0, %c0_i32_1 : i32, i32, i32
  }
  func.func @transform_17(%arg0: i32, %arg1: memref<16xi32, #tpu.memory_space<smem>>) -> (i32, i32) {
    %c0_i32 = arith.constant 0 : i32
    %c0_i32_0 = arith.constant 0 : i32
    %c0_i32_1 = arith.constant 0 : i32
    return %c0_i32, %c0_i32_0 : i32, i32
  }
  func.func @transform_18(%arg0: i32, %arg1: memref<16xi32, #tpu.memory_space<smem>>) -> (i32, i32) {
    %c0_i32 = arith.constant 0 : i32
    %c0_i32_0 = arith.constant 0 : i32
    %c0_i32_1 = arith.constant 0 : i32
    return %c0_i32, %c0_i32_0 : i32, i32
  }
  func.func @transform_19(%arg0: i32, %arg1: memref<16xi32, #tpu.memory_space<smem>>) -> (i32, i32) {
    %c0_i32 = arith.constant 0 : i32
    %c0_i32_0 = arith.constant 0 : i32
    %c0_i32_1 = arith.constant 0 : i32
    return %c0_i32, %c0_i32_0 : i32, i32
  }
  func.func @transform_20(%arg0: i32, %arg1: memref<16xi32, #tpu.memory_space<smem>>) -> (i32, i32) {
    %c0_i32 = arith.constant 0 : i32
    %c0_i32_0 = arith.constant 0 : i32
    %c0_i32_1 = arith.constant 0 : i32
    return %c0_i32, %c0_i32_0 : i32, i32
  }
  func.func @transform_21(%arg0: i32, %arg1: memref<16xi32, #tpu.memory_space<smem>>) -> (i32, i32) {
    %c0_i32 = arith.constant 0 : i32
    %c0_i32_0 = arith.constant 0 : i32
    %c0_i32_1 = arith.constant 0 : i32
    return %c0_i32, %c0_i32_0 : i32, i32
  }
  func.func @transform_22(%arg0: i32, %arg1: memref<16xi32, #tpu.memory_space<smem>>) -> (i32, i32) {
    %c0_i32 = arith.constant 0 : i32
    %c0_i32_0 = arith.constant 0 : i32
    %c0_i32_1 = arith.constant 0 : i32
    return %c0_i32, %c0_i32_0 : i32, i32
  }
}

</mosaic_0001>

<bundles_post_ra>
// kernel: roberta_forward.1
= control target key start
LH: loop header
LB: loop body
LE: loop exit
PB: predicated region body
PF: predicated region fallthrough
CT: control target
= control target key end

     0   :  { %s5464_s0 = inlined_call_operand.vmem [shape: s32[16], index: 0, kind: input, shape index: {}]   ;;  %s5465_s1 = inlined_call_operand.hbm [shape: f32[64,128], index: 1, kind: input, shape index: {}]   ;;  %s5466_s2 = inlined_call_operand.hbm [shape: f32[64,128], index: 2, kind: input, shape index: {}]   ;;  %s5467_s3 = inlined_call_operand.vmem [shape: f32[2,128], index: 3, kind: input, shape index: {}]   ;;  %s5468_s4 = inlined_call_operand.vmem [shape: f32[1,128], index: 4, kind: input, shape index: {}]   ;;  %s5469_s5 = inlined_call_operand.vmem [shape: f32[1,128], index: 5, kind: input, shape index: {}]   ;;  %s5470_s6 = inlined_call_operand.hbm [shape: bf16[2,128,384], index: 6, kind: input, shape index: {}]   ;;  %s5471_s7 = inlined_call_operand.hbm [shape: f32[2,1,384], index: 7, kind: input, shape index: {}]   ;;  %s5472_s8 = inlined_call_operand.hbm [shape: bf16[2,128,128], index: 8, kind: input, shape index: {}]   ;;  %s5473_s9 = inlined_call_operand.hbm [shape: f32[2,1,128], index: 9, kind: input, shape index: {}]   ;;  %s5474_s10 = inlined_call_operand.vmem [shape: f32[2,1,128], index: 10, kind: input, shape index: {}]   ;;  %s5475_s11 = inlined_call_operand.vmem [shape: f32[2,1,128], index: 11, kind: input, shape index: {}]   ;;  %s5476_s12 = inlined_call_operand.hbm [shape: bf16[2,128,256], index: 12, kind: input, shape index: {}]   ;;  %s5477_s13 = inlined_call_operand.hbm [shape: f32[2,1,256], index: 13, kind: input, shape index: {}]   ;;  %s5478_s14 = inlined_call_operand.hbm [shape: bf16[2,256,128], index: 14, kind: input, shape index: {}]   ;;  %s5479_s15 = inlined_call_operand.hbm [shape: f32[2,1,128], index: 15, kind: input, shape index: {}]   ;;  %s5480_s16 = inlined_call_operand.vmem [shape: f32[2,1,128], index: 16, kind: input, shape index: {}]   ;;  %s5481_s17 = inlined_call_operand.vmem [shape: f32[2,1,128], index: 17, kind: input, shape index: {}]   ;;  %s5482_s18 = inlined_call_operand.hbm [shape: bf16[128,128], index: 18, kind: input, shape index: {}]   ;;  %s5483_s19 = inlined_call_operand.hbm [shape: f32[1,128], index: 19, kind: input, shape index: {}]   ;;  %s5484_s20 = inlined_call_operand.hbm [shape: bf16[128,128], index: 20, kind: input, shape index: {}]   ;;  %s5485_s21 = inlined_call_operand.hbm [shape: f32[1,128], index: 21, kind: input, shape index: {}]   ;;  %s5486_s22 = inlined_call_operand.hbm [shape: f32[16,128], index: 22, kind: output, shape index: {0}]   ;;  %s5487_s23 = inlined_call_operand.vmem [shape: f32[1,128], index: 23, kind: output, shape index: {1}]  }
   0x1   :  { %5489 = sst [smem:[#allocation38_spill]] %s5464_s0 }
   0x2   :  { %5490 = sst [smem:[#allocation39_spill]] %s5465_s1 }
   0x3   :  { %5491 = sst [smem:[#allocation40_spill]] %s5466_s2 }
   0x4   :  { %5492 = sst [smem:[#allocation41_spill]] %s5467_s3 }
   0x5   :  { %5493 = sst [smem:[#allocation42_spill]] %s5468_s4 }
   0x6   :  { %5494 = sst [smem:[#allocation43_spill]] %s5469_s5 }
   0x7   :  { %5495 = sst [smem:[#allocation44_spill]] %s5470_s6 }
   0x8   :  { %5496 = sst [smem:[#allocation45_spill]] %s5471_s7 }
   0x9   :  { %5497 = sst [smem:[#allocation46_spill]] %s5481_s17 }
   0xa   :  { %s5498_s24 = sld [smem:[#allocation38_spill]] }
  0x10   :  { %s29_s17 = sshll.u32 %s5498_s24, 4  ;;  %s30_s17 = int_to_ptr.vmem [resolvable:$true] %s29_s17 }
  0x11   :  { %s4467_s25 = scalar_lea.vmem %s30_s17, 16  ;;  %p4472_p1 = scmp.lt.s32.totalorder %s30_s17, %s30_s17 }
  0x12   :  { %p4468_p0 = scmp.ne.s32.totalorder %s30_s17, %s4467_s25  ;;  %p4473_p2 = scmp.lt.s32.totalorder %s4467_s25, %s4467_s25 }
  0x14   :  { %p4474_p3 = por %p4473_p2, %p4472_p1 }
  0x16   :  { %p4475_p4 = pnand %p4474_p3, %p4468_p0 }
  0x18   :  { %4478 = shalt.err (!%p4475_p4)  }
  0x19   :  { %s4799_s5 = smov [#allocation3]  }
  0x1a   :  { %32 = dma.vmem_to_smem %s30_s17, 16, %s4799_s5, [#allocation2] }
  0x1b   :  { %4779 = dma.done.wait [#allocation2], 16 }
  0x1c   :  { %4780 = vsyncadd [#allocation2], 4294967280 }
  0x1d   :  { %34 = sfence }
  0x1e   :  { %35 = vsyncpa [#allocation5], 0 }
  0x1f   :  { %36 = vsyncpa [#allocation8], 0 }
  0x20   :  { %37 = vsyncpa [#allocation11], 0 }
  0x21   :  { %38 = vsyncpa [#allocation14], 0 }
  0x22   :  { %39 = vsyncpa [#allocation17], 0 }
  0x23   :  { %40 = vsyncpa [#allocation20], 0 }
  0x24   :  { %41 = vsyncpa [#allocation23], 0 }
  0x25   :  { %42 = vsyncpa [#allocation26], 0 }
  0x26   :  { %43 = vsyncpa [#allocation6], 0  ;;  %s4800_s1 = smov [#allocation7]   ;;  %s4801_s2 = smov [#allocation10]  }
  0x27   :  { %s61_s26 = sshll.u32 %s4800_s1, 4  ;;  %s91_s6 = sshll.u32 %s4801_s2, 4  ;;  %s62_s26 = int_to_ptr.vmem [resolvable:$true] %s61_s26  ;;  %s92_s6 = int_to_ptr.vmem [resolvable:$true] %s91_s6 }
  0x28   :  { %s4487_s27 = scalar_lea.vmem %s62_s26, 1024  ;;  %p4492_p6 = scmp.lt.s32.totalorder %s62_s26, %s62_s26 }
  0x29   :  { %p4488_p5 = scmp.ne.s32.totalorder %s62_s26, %s4487_s27  ;;  %p4493_p7 = scmp.lt.s32.totalorder %s4487_s27, %s4487_s27 }
  0x2b   :  { %p4494_p8 = por %p4493_p7, %p4492_p6 }
  0x2d   :  { %p4495_p9 = pnand %p4494_p8, %p4488_p5 }
  0x2f   :  { %4498 = shalt.err (!%p4495_p9)
}
  0x30   :  { %s4802_s17 = smov 128   ;;  %s4803_s7 = smov 8  }
  0x31   :  { %s5499_s3 = sld [smem:[#allocation40_spill]]  ;;  %s4507_s0 = scalar_lea.vmem %s92_s6, 96 }
  0x32   :  { %p4508_p10 = scmp.ne.s32.totalorder %s92_s6, %s4507_s0  ;;  %p4512_p11 = scmp.lt.s32.totalorder %s92_s6, %s92_s6 }
  0x33   :  { %p4513_p12 = scmp.lt.s32.totalorder %s4507_s0, %s4507_s0 }
  0x35   :  { %p4514_p13 = por %p4513_p12, %p4512_p11 }
  0x37   :  { %67 = dma.hbm_to_vmem [thread:$0]  %s5499_s3, 1024, %s62_s26, [#allocation8], %s4802_s17, %s4802_s17, %s4803_s7  }
  0x38   :  { %p4515_p0 = pnand %p4514_p13, %p4508_p10 }
  0x3a   :  { %4518 = shalt.err (!%p4515_p0)
}
  0x3b   :  { %s4804_s4 = smov 48   ;;  %s4805_s30 = smov 3  }
  0x3c   :  { %s5500_s5 = sld [smem:[#allocation45_spill]]  ;;  %s4806_s1 = smov [#allocation13]  }
  0x3d   :  { %s115_s2 = sshll.u32 %s4806_s1, 4  ;;  %s116_s2 = int_to_ptr.vmem [resolvable:$true] %s115_s2 }
  0x3e   :  { %s4527_s27 = scalar_lea.vmem %s116_s2, 32  ;;  %p4532_p2 = scmp.lt.s32.totalorder %s116_s2, %s116_s2 }
  0x3f   :  { %p4528_p1 = scmp.ne.s32.totalorder %s116_s2, %s4527_s27  ;;  %p4533_p3 = scmp.lt.s32.totalorder %s4527_s27, %s4527_s27 }
  0x41   :  { %p4534_p4 = por %p4533_p3, %p4532_p2 }
  0x42   :  { %97 = dma.hbm_to_vmem [thread:$0]  %s5500_s5, 96, %s92_s6, [#allocation11], %s4804_s4, %s4804_s4, %s4805_s30  }
  0x43   :  { %p4535_p5 = pnand %p4534_p4, %p4528_p1 }
  0x45   :  { %4538 = shalt.err (!%p4535_p5)
}
  0x46   :  { %s4807_s26 = smov 16   ;;  %s4808_s28 = smov 1  }
  0x47   :  { %121 = dma.hbm_to_vmem [thread:$0]  %s5473_s9, 32, %s116_s2, [#allocation14], %s4807_s26, %s4807_s26, %s4808_s28  }
  0x48   :  { %s4809_s6 = smov [#allocation16]  }
  0x49   :  { %s143_s0 = sshll.u32 %s4809_s6, 4  ;;  %s144_s0 = int_to_ptr.vmem [resolvable:$true] %s143_s0 }
  0x4a   :  { %s4547_s4 = scalar_lea.vmem %s144_s0, 64  ;;  %p4552_p7 = scmp.lt.s32.totalorder %s144_s0, %s144_s0 }
  0x4b   :  { %p4548_p6 = scmp.ne.s32.totalorder %s144_s0, %s4547_s4  ;;  %p4553_p8 = scmp.lt.s32.totalorder %s4547_s4, %s4547_s4 }
  0x4d   :  { %p4554_p9 = por %p4553_p8, %p4552_p7 }
  0x4f   :  { %p4555_p10 = pnand %p4554_p9, %p4548_p6 }
  0x51   :  { %4558 = shalt.err (!%p4555_p10)
}
  0x52   :  { %s4810_s30 = smov 32   ;;  %s4811_s24 = smov 2  }
  0x53   :  { %149 = dma.hbm_to_vmem [thread:$0]  %s5477_s13, 64, %s144_s0, [#allocation17], %s4810_s30, %s4810_s30, %s4811_s24  }
  0x54   :  { %s4812_s1 = smov [#allocation19]   ;;  %s4813_s2 = smov [#allocation22]  }
  0x55   :  { %s167_s9 = sshll.u32 %s4812_s1, 4  ;;  %s196_s27 = sshll.u32 %s4813_s2, 4  ;;  %s168_s9 = int_to_ptr.vmem [resolvable:$true] %s167_s9  ;;  %s197_s27 = int_to_ptr.vmem [resolvable:$true] %s196_s27 }
  0x56   :  { %s4567_s29 = scalar_lea.vmem %s168_s9, 32  ;;  %p4572_p12 = scmp.lt.s32.totalorder %s168_s9, %s168_s9 }
  0x57   :  { %p4568_p11 = scmp.ne.s32.totalorder %s168_s9, %s4567_s29  ;;  %p4573_p13 = scmp.lt.s32.totalorder %s4567_s29, %s4567_s29 }
  0x59   :  { %p4574_p0 = por %p4573_p13, %p4572_p12 }
  0x5b   :  { %p4575_p1 = pnand %p4574_p0, %p4568_p11 }
  0x5d   :  { %4578 = shalt.err (!%p4575_p1)
}
  0x5e   :  { %173 = dma.hbm_to_vmem [thread:$0]  %s5479_s15, 32, %s168_s9, [#allocation20], %s4807_s26, %s4807_s26, %s4808_s28  }
  0x5f   :  { %s4587_s13 = scalar_lea.vmem %s197_s27, 16  ;;  %s4591_s0 = scalar_lea.vmem %s197_s27, 32 }
  0x60   :  { %p4588_p2 = scmp.ne.s32.totalorder %s197_s27, %s4587_s13  ;;  %p4592_p3 = scmp.lt.s32.totalorder %s197_s27, %s197_s27 }
  0x61   :  { %p4593_p4 = scmp.lt.s32.totalorder %s4591_s0, %s4587_s13 }
  0x63   :  { %p4594_p5 = por %p4593_p4, %p4592_p3 }
  0x65   :  { %p4595_p6 = pnand %p4594_p5, %p4588_p2 }
  0x67   :  { %4598 = shalt.err (!%p4595_p6)
}
  0x68   :  { %199 = dma.hbm_to_vmem [thread:$0]  %s5483_s19, 16, %s197_s27, [#allocation23]  }
  0x69   :  { %s4814_s25 = smov [#allocation4]   ;;  %s4815_s1 = smov [#allocation9]  }
  0x6a   :  { %s49_s5 = sshll.u32 %s4814_s25, 4  ;;  %s79_s2 = sshll.u32 %s4815_s1, 4  ;;  %s50_s5 = int_to_ptr.vmem [resolvable:$true] %s49_s5  ;;  %s80_s2 = int_to_ptr.vmem [resolvable:$true] %s79_s2 }
  0x6b   :  { %s4607_s29 = scalar_lea.vmem %s50_s5, 1024  ;;  %p4612_p8 = scmp.lt.s32.totalorder %s50_s5, %s50_s5 }
  0x6c   :  { %p4608_p7 = scmp.ne.s32.totalorder %s50_s5, %s4607_s29  ;;  %p4613_p9 = scmp.lt.s32.totalorder %s4607_s29, %s4607_s29 }
  0x6e   :  { %p4614_p10 = por %p4613_p9, %p4612_p8 }
  0x70   :  { %p4615_p11 = pnand %p4614_p10, %p4608_p7 }
  0x72   :  { %4618 = shalt.err (!%p4615_p11)
}
  0x73   :  { %s5501_s28 = sld [smem:[#allocation39_spill]]  ;;  %s4627_s19 = scalar_lea.vmem %s80_s2, 6144 }
  0x74   :  { %p4628_p12 = scmp.ne.s32.totalorder %s80_s2, %s4627_s19  ;;  %p4632_p13 = scmp.lt.s32.totalorder %s80_s2, %s80_s2 }
  0x75   :  { %p4633_p0 = scmp.lt.s32.totalorder %s4627_s19, %s4627_s19 }
  0x77   :  { %p4634_p1 = por %p4633_p0, %p4632_p13 }
  0x79   :  { %55 = dma.hbm_to_vmem [thread:$0]  %s5501_s28, 1024, %s50_s5, [#allocation5], %s4802_s17, %s4802_s17, %s4803_s7  }
  0x7a   :  { %p4635_p2 = pnand %p4634_p1, %p4628_p12 }
  0x7c   :  { %4638 = shalt.err (!%p4635_p2)
}
  0x7d   :  { %s4816_s9 = smov 192   ;;  %s4817_s27 = smov 12  }
  0x7e   :  { %s5502_s13 = sld [smem:[#allocation44_spill]]  ;;  %s4818_s0 = smov [#allocation12]  }
  0x7f   :  { %s103_s4 = sshll.u32 %s4818_s0, 4  ;;  %s104_s4 = int_to_ptr.vmem [resolvable:$true] %s103_s4 }
  0x80   :  { %s4647_s24 = scalar_lea.vmem %s104_s4, 2048  ;;  %p4652_p4 = scmp.lt.s32.totalorder %s104_s4, %s104_s4 }
  0x81   :  { %p4648_p3 = scmp.ne.s32.totalorder %s104_s4, %s4647_s24  ;;  %p4653_p5 = scmp.lt.s32.totalorder %s4647_s24, %s4647_s24 }
  0x83   :  { %p4654_p6 = por %p4653_p5, %p4652_p4 }
  0x84   :  { %85 = dma.hbm_to_vmem [thread:$0]  %s5502_s13, 6144, %s80_s2, [#allocation8], %s4816_s9, %s4816_s9, %s4817_s27  }
  0x85   :  { %p4655_p7 = pnand %p4654_p6, %p4648_p3 }
  0x87   :  { %4658 = shalt.err (!%p4655_p7)
}
  0x88   :  { %s4819_s25 = smov 64   ;;  %s4820_s5 = smov 4  }
  0x89   :  { %109 = dma.hbm_to_vmem [thread:$0]  %s5472_s8, 2048, %s104_s4, [#allocation11], %s4819_s25, %s4819_s25, %s4820_s5  }
  0x8a   :  { %s4821_s2 = smov [#allocation15]   ;;  %s4822_s26 = smov [#allocation18]  }
  0x8b   :  { %s131_s15 = sshll.u32 %s4821_s2, 4  ;;  %s155_s28 = sshll.u32 %s4822_s26, 4  ;;  %s132_s15 = int_to_ptr.vmem [resolvable:$true] %s131_s15  ;;  %s156_s28 = int_to_ptr.vmem [resolvable:$true] %s155_s28 }
  0x8c   :  { %s4667_s19 = scalar_lea.vmem %s132_s15, 4096  ;;  %p4672_p9 = scmp.lt.s32.totalorder %s132_s15, %s132_s15 }
  0x8d   :  { %p4668_p8 = scmp.ne.s32.totalorder %s132_s15, %s4667_s19  ;;  %p4673_p10 = scmp.lt.s32.totalorder %s4667_s19, %s4667_s19 }
  0x8f   :  { %p4674_p11 = por %p4673_p10, %p4672_p9 }
  0x91   :  { %p4675_p12 = pnand %p4674_p11, %p4668_p8 }
  0x93   :  { %4678 = shalt.err (!%p4675_p12)
}
  0x94   :  { %137 = dma.hbm_to_vmem [thread:$0]  %s5476_s12, 4096, %s132_s15, [#allocation14], %s4802_s17, %s4802_s17, %s4803_s7  }
  0x95   :  { %s4687_s8 = scalar_lea.vmem %s156_s28, 4096  ;;  %p4692_p0 = scmp.lt.s32.totalorder %s156_s28, %s156_s28 }
  0x96   :  { %p4688_p13 = scmp.ne.s32.totalorder %s156_s28, %s4687_s8  ;;  %p4693_p1 = scmp.lt.s32.totalorder %s4687_s8, %s4687_s8 }
  0x98   :  { %p4694_p2 = por %p4693_p1, %p4692_p0 }
  0x9a   :  { %p4695_p3 = pnand %p4694_p2, %p4688_p13 }
  0x9c   :  { %4698 = shalt.err (!%p4695_p3)
}
  0x9d   :  { %161 = dma.hbm_to_vmem [thread:$0]  %s5478_s14, 4096, %s156_s28, [#allocation17], %s4819_s25, %s4819_s25, %s4820_s5  }
  0x9e   :  { %s4823_s13 = smov [#allocation21]   ;;  %s4824_s4 = smov [#allocation24]  }
  0x9f   :  { %s183_s0 = sshll.u32 %s4823_s13, 4  ;;  %s205_s12 = sshll.u32 %s4824_s4, 4  ;;  %s184_s0 = int_to_ptr.vmem [resolvable:$true] %s183_s0  ;;  %s206_s12 = int_to_ptr.vmem [resolvable:$true] %s205_s12 }
  0xa0   :  { %s4707_s24 = scalar_lea.vmem %s184_s0, 1024  ;;  %p4712_p5 = scmp.lt.s32.totalorder %s184_s0, %s184_s0 }
  0xa1   :  { %p4708_p4 = scmp.ne.s32.totalorder %s184_s0, %s4707_s24  ;;  %p4713_p6 = scmp.lt.s32.totalorder %s4707_s24, %s4707_s24 }
  0xa3   :  { %p4714_p7 = por %p4713_p6, %p4712_p5 }
  0xa5   :  { %p4715_p8 = pnand %p4714_p7, %p4708_p4 }
  0xa7   :  { %4718 = shalt.err (!%p4715_p8)
}
  0xa8   :  { %189 = dma.hbm_to_vmem [thread:$0]  %s5482_s18, 1024, %s184_s0, [#allocation20], %s4819_s25, %s4819_s25, %s4820_s5  }
  0xa9   :  { %s4727_s14 = scalar_lea.vmem %s206_s12, 1024  ;;  %p4732_p10 = scmp.lt.s32.totalorder %s206_s12, %s206_s12 }
  0xaa   :  { %p4728_p9 = scmp.ne.s32.totalorder %s206_s12, %s4727_s14  ;;  %p4733_p11 = scmp.lt.s32.totalorder %s4727_s14, %s4727_s14 }
  0xac   :  { %p4734_p12 = por %p4733_p11, %p4732_p10 }
  0xae   :  { %p4735_p13 = pnand %p4734_p12, %p4728_p9 }
  0xb0   :  { %4738 = shalt.err (!%p4735_p13)
}
  0xb1   :  { %211 = dma.hbm_to_vmem [thread:$0]  %s5484_s20, 1024, %s206_s12, [#allocation23], %s4819_s25, %s4819_s25, %s4820_s5  }
  0xb2   :  { %s4825_s26 = smov [#allocation25]  }
  0xb3   :  { %s218_s28 = sshll.u32 %s4825_s26, 4  ;;  %s219_s28 = int_to_ptr.vmem [resolvable:$true] %s218_s28 }
  0xb4   :  { %s4747_s19 = scalar_lea.vmem %s219_s28, 16  ;;  %s4751_s18 = scalar_lea.vmem %s219_s28, 32 }
  0xb5   :  { %p4748_p0 = scmp.ne.s32.totalorder %s219_s28, %s4747_s19  ;;  %p4752_p1 = scmp.lt.s32.totalorder %s219_s28, %s219_s28 }
  0xb6   :  { %p4753_p2 = scmp.lt.s32.totalorder %s4751_s18, %s4747_s19 }
  0xb8   :  { %p4754_p3 = por %p4753_p2, %p4752_p1 }
  0xba   :  { %p4755_p4 = pnand %p4754_p3, %p4748_p0 }
  0xbc   :  { %4758 = shalt.err (!%p4755_p4)
}
  0xbd   :  { %221 = dma.hbm_to_vmem [thread:$0]  %s5485_s21, 16, %s219_s28, [#allocation26]  }
  0xbe   :  { %4781 = dma.done.wait [#allocation5], 1024  }
  0xbf   :  { %4782 = vsyncadd [#allocation5], 4294966272 }
  0xc0   :  { %4783 = dma.done.wait [#allocation8], 7168  }
  0xc1   :  { %4784 = vsyncadd [#allocation8], 4294960128 }
  0xc2   :  { %4785 = dma.done.wait [#allocation11], 2144  }
  0xc3   :  { %4786 = vsyncadd [#allocation11], 4294965152 }
  0xc4   :  { %4787 = dma.done.wait [#allocation14], 4128  }
  0xc5   :  { %4788 = vsyncadd [#allocation14], 4294963168 }
  0xc6   :  { %4789 = dma.done.wait [#allocation17], 4160  }
  0xc7   :  { %4790 = vsyncadd [#allocation17], 4294963136 }
  0xc8   :  { %4791 = dma.done.wait [#allocation20], 1056  }
  0xc9   :  { %4792 = vsyncadd [#allocation20], 4294966240 }
  0xca   :  { %4793 = dma.done.wait [#allocation23], 1040  }
  0xcb   :  { %4794 = vsyncadd [#allocation23], 4294966256 }
  0xcc   :  { %4795 = dma.done.wait [#allocation26], 16  }
  0xcd   :  { %4796 = vsyncadd [#allocation26], 4294967280  ;;  %s265_s20 = sld [smem:[#allocation3]]  ;;  %vm482_vm0 = vcmask 1040384   ;;  %vm484_vm1 = vcmask 1041408   ;;  %vm486_vm2 = vcmask 1042432  }
  0xce   :  { %s3572_s5 = sld [smem:[#allocation3 + $0x1]]  ;;  %vm488_vm3 = vcmask 1043456   ;;  %vm490_vm4 = vcmask 1044480   ;;  %vm492_vm5 = vcmask 1045504   ;;  %vm494_vm6 = vcmask 1046528  }
  0xcf   :  { %s3574_s8 = sld [smem:[#allocation3 + $0x2]]  ;;  %vm4828_vm7 = vmmov 0   ;;  %vm820_vm8 = vcmask 261120   ;;  %vm870_vm9 = vcmask 130048   ;;  %vm1336_vm10 = vcmask 523264  }
  0xd0   :  { %s5025_s21 = sld [smem:[#allocation3 + $0x3]]  ;;  %vm1339_vm11 = vcmask 785408  }
  0xd1   :  { %s5027_s3 = sld [smem:[#allocation3 + $0x4]] }
  0xd2   :  { %s5029_s6 = sld [smem:[#allocation3 + $0x5]] }
  0xd3   :  { %p266_p5 = scmp.ne.s32.totalorder %s265_s20, 1  ;;  %s270_s19 = scalar_lea.vmem [#allocation4], %s265_s20 }
  0xd4   :  { %p276_p6 = scmp.ne.s32.totalorder %s3572_s5, 1  ;;  %s281_s1 = scalar_lea.vmem [#allocation4], %s3572_s5  ;;  %v271_v4 = vld [vmem:[%s270_s19] sm:$0x1] }
  0xd5   :  { %s267_s13 = scalar_select %p266_p5, 1, 0  ;;  %v282_v0 = vld [vmem:[%s281_s1] sm:$0x1] }
  0xd6   :  { %s277_s0 = scalar_select %p276_p6, 1, 0 }
  0xd7   :  { %s268_s4 = smul.u32 %s267_s13, %s267_s13  ;;  %p287_p7 = scmp.ne.s32.totalorder %s3574_s8, 1 }
  0xd8   :  { %s278_s12 = sadd.s32 %s277_s0, %s267_s13  ;;  %p298_p8 = scmp.ne.s32.totalorder %s5025_s21, 1 }
  0xd9   :  { %s279_s24 = smul.u32 %s278_s12, %s277_s0  ;;  %s292_s26 = scalar_lea.vmem [#allocation4], %s3574_s8 }
  0xda   :  { %s288_s29 = scalar_select %p287_p7, 1, 0  ;;  %v293_v2 = vld [vmem:[%s292_s26] sm:$0x1] }
  0xdb   :  { %s3527_s14 = scalar_lea.vmem [#allocation7], %s279_s24  ;;  %p309_p9 = scmp.ne.s32.totalorder %s5027_s3, 1 }
  0xdc   :  { %v3573_v1 = vld [vmem:[%s3527_s14 + $0x1] sm:$0x1]  ;;  %s289_s2 = sadd.s32 %s288_s29, %s278_s12  ;;  %s3524_s18 = scalar_lea.vmem [#allocation7], %s268_s4 }
  0xdd   :  { %s290_s15 = smul.u32 %s289_s2, %s288_s29  ;;  %v285_v3 = vadd.f32 %v3573_v1, %v282_v0  ;;  %v3571_v5 = vld [vmem:[%s3524_s18 + $0x1] sm:$0x1]  ;;  %s303_s5 = scalar_lea.vmem [#allocation4], %s5025_s21 }
  0xde   :  { %s299_s28 = scalar_select %p298_p8, 1, 0  ;;  %v304_v7 = vld [vmem:[%s303_s5] sm:$0x1]  ;;  %v274_v11 = vadd.f32 %v3571_v5, %v271_v4  ;;  %v4189_v4 = vld [vmem:[#allocation9 + $0xac] ss:$12 sps:$4 sm:$0xff]  }
  0xdf   :  { %s3530_s9 = scalar_lea.vmem [#allocation7], %s290_s15  ;;  %p320_p10 = scmp.ne.s32.totalorder %s5029_s6, 1  ;;  %v441_v9 = vrot.slane %v285_v3, 7  ;;  %v4826_v5 = vmov 0.0   ;;  %733 = vmatprep.subr.bf16.mxu0 %v4189_v4 }
  0xe0   :  { %v3575_v6 = vld [vmem:[%s3530_s9 + $0x1] sm:$0x1]  ;;  %s300_s27 = sadd.s32 %s299_s28, %s289_s2  ;;  %s5037_s0 = sld [smem:[#allocation3 + $0x6]]  ;;  %3911 = vmatprep.subr.bf16.mxu1 %v4826_v5  ;;  %3927 = vmatprep.mubr.msk.bf16.mxu1 %vm4828_vm7, %v4826_v5 }
  0xe1   :  { %v296_v8 = vadd.f32 %v3575_v6, %v293_v2  ;;  %s301_s13 = smul.u32 %s300_s27, %s299_s28  ;;  %s314_s12 = scalar_lea.vmem [#allocation4], %s5027_s3  ;;  %v483_v18 = vsel %vm482_vm0, %v274_v11, %v441_v9 }
  0xe2   :  { %s310_s8 = scalar_select %p309_p9, 1, 0  ;;  %v315_v13 = vld [vmem:[%s314_s12] sm:$0x1] }
  0xe3   :  { %v444_v10 = vrot.slane %v296_v8, 6  ;;  %s3533_s20 = scalar_lea.vmem [#allocation7], %s301_s13  ;;  %s5040_s21 = sld [smem:[#allocation3 + $0x7]]  ;;  %v4192_v8 = vld [vmem:[#allocation9 + $0xb0] ss:$12 sps:$4 sm:$0xff]  }
  0xe4   :  { %v3577_v12 = vld [vmem:[%s3533_s20 + $0x1] sm:$0x1]  ;;  %s311_s4 = sadd.s32 %s310_s8, %s300_s27  ;;  %s5042_s1 = sld [smem:[#allocation3 + $0x8]]  ;;  %3912 = vmatpush3.bf16.msra.mxu1 %v4192_v8 }
  0xe5   :  { %v307_v14 = vadd.f32 %v3577_v12, %v304_v7  ;;  %s312_s24 = smul.u32 %s311_s4, %s310_s8  ;;  %s5046_s14 = sld [smem:[#allocation3 + $0x9]]  ;;  %v485_v20 = vsel %vm484_vm1, %v483_v18, %v444_v10  ;;  %v4191_v7 = vld [vmem:[#allocation9 + $0xa8] ss:$12 sps:$4 sm:$0xff]   ;;  %3913 = vmatprep.subr.bf16.mxu1 %v4826_v5 }
  0xe6   :  { %s321_s29 = scalar_select %p320_p10, 1, 0  ;;  %734 = vmatpush1.bf16.msra.mxu0 %v4191_v7  ;;  %v590_v7 = vlaneseq }
  0xe7   :  { %v447_v15 = vrot.slane %v307_v14, 5  ;;  %s3536_s2 = scalar_lea.vmem [#allocation7], %s312_s24  ;;  %s325_s26 = scalar_lea.vmem [#allocation4], %s5029_s6 }
  0xe8   :  { %v3579_v16 = vld [vmem:[%s3536_s2 + $0x1] sm:$0x1]  ;;  %s322_s15 = sadd.s32 %s321_s29, %s311_s4  ;;  %v326_v17 = vld [vmem:[%s325_s26] sm:$0x1]  ;;  %s5049_s3 = sld [smem:[#allocation3 + $0xa]]  ;;  %v5155_v8 = vshrl.u32 %v590_v7, 7 }
  0xe9   :  { %v318_v19 = vadd.f32 %v3579_v16, %v315_v13  ;;  %s323_s28 = smul.u32 %s322_s15, %s321_s29  ;;  %p331_p11 = scmp.ne.s32.totalorder %s5037_s0, 1  ;;  %v487_v25 = vsel %vm486_vm2, %v485_v20, %v447_v15 }
  0xea   :  { %p342_p12 = scmp.ne.s32.totalorder %s5040_s21, 1  ;;  %s336_s27 = scalar_lea.vmem [#allocation4], %s5037_s0 }
  0xeb   :  { %s3539_s19 = scalar_lea.vmem [#allocation7], %s323_s28  ;;  %v450_v22 = vrot.slane %v318_v19, 4  ;;  %v337_v24 = vld [vmem:[%s336_s27] sm:$0x1]  ;;  %p353_p13 = scmp.ne.s32.totalorder %s5042_s1, 1 }
  0xec   :  { %v3581_v21 = vld [vmem:[%s3539_s19 + $0x1] sm:$0x1]  ;;  %s332_s18 = scalar_select %p331_p11, 1, 0 }
  0xed   :  { %v329_v23 = vadd.f32 %v3581_v21, %v326_v17  ;;  %s343_s6 = scalar_select %p342_p12, 1, 0  ;;  %v489_v28 = vsel %vm488_vm3, %v487_v25, %v450_v22  ;;  %v4193_v21 = vld [vmem:[#allocation9 + $0x94] ss:$12 sps:$4 sm:$0xff]   ;;  %v4195_v22 = vld [vmem:[#allocation9 + $0x90] ss:$12 sps:$4 sm:$0xff]  }
  0xee   :  { %s333_s9 = sadd.s32 %s332_s18, %s322_s15  ;;  %s347_s20 = scalar_lea.vmem [#allocation4], %s5040_s21  ;;  %735 = vmatprep.subr.bf16.mxu0 %v4193_v21  ;;  %v4199_v25 = vld [vmem:[#allocation9 + $0x78] ss:$12 sps:$4 sm:$0xff]  }
  0xef   :  { %s334_s5 = smul.u32 %s333_s9, %s332_s18  ;;  %s344_s13 = sadd.s32 %s343_s6, %s333_s9  ;;  %v453_v26 = vrot.slane %v329_v23, 3  ;;  %v348_v27 = vld [vmem:[%s347_s20] sm:$0x1]  ;;  %v4196_v23 = vld [vmem:[#allocation9 + $0x98] ss:$12 sps:$4 sm:$0xff]   ;;  %736 = vmatpush1.bf16.msra.mxu0 %v4195_v22 }
  0xf0   :  { %s345_s8 = smul.u32 %s344_s13, %s343_s6  ;;  %p364_p0 = scmp.ne.s32.totalorder %s5046_s14, 1  ;;  %3914 = vmatpush3.bf16.msra.mxu1 %v4196_v23  ;;  %v600_v23 = vsub.s32 2, %v5155_v8 }
  0xf1   :  { %s3542_s4 = scalar_lea.vmem [#allocation7], %s334_s5  ;;  %v491_v33 = vsel %vm490_vm4, %v489_v28, %v453_v26  ;;  %s5503_s2 = sld [smem:[#allocation41_spill]]  ;;  %3915 = vmatprep.subr.bf16.mxu1 %v4826_v5  ;;  %v4200_v26 = vld [vmem:[#allocation9 + $0x80] ss:$12 sps:$4 sm:$0xff]  }
  0xf2   :  { %v3583_v29 = vld [vmem:[%s3542_s4 + $0x1] sm:$0x1]  ;;  %s3545_s0 = scalar_lea.vmem [#allocation7], %s345_s8  ;;  %p375_p1 = scmp.ne.s32.totalorder %s5049_s3, 1 }
  0xf3   :  { %v340_v30 = vadd.f32 %v3583_v29, %v337_v24  ;;  %v3585_v31 = vld [vmem:[%s3545_s0 + $0x1] sm:$0x1]  ;;  %s5063_s12 = scalar_select %p353_p13, 1, 0  ;;  %v4197_v24 = vld [vmem:[#allocation9 + $0x7c] ss:$12 sps:$4 sm:$0xff]  }
  0xf4   :  { %v351_v32 = vadd.f32 %v3585_v31, %v348_v27  ;;  %s365_s21 = scalar_select %p364_p0, 1, 0  ;;  %737 = vmatprep.subr.bf16.mxu0 %v4197_v24  ;;  %3916 = vmatpush3.bf16.msra.mxu1 %v4200_v26  ;;  %v4201_v27 = vld [vmem:[#allocation9 + $0x64] ss:$12 sps:$4 sm:$0xff]   ;;  %v4203_v28 = vld [vmem:[#allocation9 + $0x60] ss:$12 sps:$4 sm:$0xff]  }
  0xf5   :  { %s5072_s15 = sadd.s32 %s5063_s12, %s344_s13  ;;  %v456_v35 = vrot.slane %v340_v30, 2  ;;  %s5080_s18 = sld [smem:[#allocation3 + $0xb]]  ;;  %738 = vmatpush1.bf16.msra.mxu0 %v4199_v25  ;;  %3917 = vmatprep.subr.bf16.mxu1 %v4826_v5  ;;  %v4204_v29 = vld [vmem:[#allocation9 + $0x68] ss:$12 sps:$4 sm:$0xff]   ;;  %v4205_v30 = vld [vmem:[#allocation9 + $0x4c] ss:$12 sps:$4 sm:$0xff]  }
  0xf6   :  { %s356_s26 = smul.u32 %s5072_s15, %s5063_s12  ;;  %s366_s28 = sadd.s32 %s365_s21, %s5072_s15  ;;  %v459_v36 = vrot.slane %v351_v32, 1  ;;  %739 = vmatprep.subr.bf16.mxu0 %v4201_v27  ;;  %v4207_v31 = vld [vmem:[#allocation9 + $0x48] ss:$12 sps:$4 sm:$0xff]   ;;  %v4208_v32 = vld [vmem:[#allocation9 + $0x50] ss:$12 sps:$4 sm:$0xff]  }
  0xf7   :  { %v5069_v34 = vld [vmem:[%s5503_s2] ss:$0 sm:$0xff]  ;;  %s367_s19 = smul.u32 %s366_s28, %s365_s21  ;;  %v493_v37 = vsel %vm492_vm5, %v491_v33, %v456_v35  ;;  %s5085_s6 = sld [smem:[#allocation3 + $0xc]]  ;;  %v4212_v35 = vld [vmem:[#allocation9 + $0x38] ss:$12 sps:$4 sm:$0xff]  }
  0xf8   :  { %v495_v38 = vsel %vm494_vm6, %v493_v37, %v459_v36  ;;  %s369_s9 = scalar_lea.vmem [#allocation4], %s5046_s14  ;;  %s5093_s13 = sld [smem:[#allocation3 + $0xd]]  ;;  %3918 = vmatpush3.bf16.msra.mxu1 %v4204_v29  ;;  %v4209_v33 = vld [vmem:[#allocation9 + $0x34] ss:$12 sps:$4 sm:$0xff]   ;;  %v4213_v36 = vld [vmem:[#allocation9 + $0x1c] ss:$12 sps:$4 sm:$0xff]  }
  0xf9   :  { %v5083_v39 = vadd.f32 %v5069_v34, %v495_v38  ;;  %v370_v40 = vld [vmem:[%s369_s9] sm:$0x1]  ;;  %s3551_s27 = scalar_lea.vmem [#allocation7], %s367_s19  ;;  %s5095_s20 = sld [smem:[#allocation3 + $0xe]]  ;;  %740 = vmatpush1.bf16.msra.mxu0 %v4203_v28  ;;  %3919 = vmatprep.subr.bf16.mxu1 %v4826_v5  ;;  %v4827_v37 = vmov 0  }
  0xfa   :  { %v3589_v41 = vld [vmem:[%s3551_s27 + $0x1] sm:$0x1]  ;;  %s376_s5 = scalar_select %p375_p1, 1, 0  ;;  %741 = vmatprep.subr.bf16.mxu0 %v4205_v30  ;;  %765 = vmatprep.mubr.bf16.mxu0 %v4827_v37  ;;  %v4215_v38 = vld [vmem:[#allocation9 + $0x18] ss:$12 sps:$4 sm:$0xff]  }
  0xfb   :  { %512 = vadd.xlane.f32.xlu0 %v5083_v39  ;;  %v519_v42 = vmul.f32 %v5083_v39, %v5083_v39  ;;  %s380_s0 = scalar_lea.vmem [#allocation4], %s5049_s3  ;;  %s5098_s14 = sld [smem:[#allocation3 + $0xf]]  ;;  %v373_v46 = vadd.f32 %v3589_v41, %v370_v40  ;;  %v4216_v40 = vld [vmem:[#allocation9 + $0x20] ss:$12 sps:$4 sm:$0xff]   ;;  %v4217_v41 = vld [vmem:[#allocation9 + $0x4] ss:$12 sps:$4 sm:$0xff]  }
  0xfc   :  { %s377_s8 = sadd.s32 %s376_s5, %s366_s28  ;;  %v381_v43 = vld [vmem:[%s380_s0] sm:$0x1]  ;;  %s358_s12 = scalar_lea.vmem [#allocation4], %s5042_s1  ;;  %3920 = vmatpush3.bf16.msra.mxu1 %v4208_v32 }
  0xfd   :  { %s378_s4 = smul.u32 %s377_s8, %s376_s5  ;;  %521 = vadd.xlane.f32.xlu1 %v519_v42  ;;  %v359_v44 = vld [vmem:[%s358_s12] sm:$0x1]  ;;  %p386_p2 = scmp.ne.s32.totalorder %s5080_s18, 1  ;;  %v462_v51 = vrot.slane %v373_v46, 7  ;;  %742 = vmatpush1.bf16.msra.mxu0 %v4207_v31 }
  0xfe   :  { %s3548_s21 = scalar_lea.vmem [#allocation7], %s356_s26  ;;  %p397_p3 = scmp.ne.s32.totalorder %s5085_s6, 1  ;;  %743 = vmatprep.subr.bf16.mxu0 %v4209_v33  ;;  %3921 = vmatprep.subr.bf16.mxu1 %v4826_v5  ;;  %v4219_v42 = vld [vmem:[#allocation9] ss:$12 sps:$4 sm:$0xff]  }
  0xff   :  { %v3587_v45 = vld [vmem:[%s3548_s21 + $0x1] sm:$0x1]  ;;  %s3554_s24 = scalar_lea.vmem [#allocation7], %s378_s4  ;;  %s391_s15 = scalar_lea.vmem [#allocation4], %s5080_s18 }
 0x100   :  { %v3591_v47 = vld [vmem:[%s3554_s24 + $0x1] sm:$0x1]  ;;  %s387_s29 = scalar_select %p386_p2, 1, 0  ;;  %v392_v49 = vld [vmem:[%s391_s15] sm:$0x1]  ;;  %v362_v50 = vadd.f32 %v3587_v45, %v359_v44  ;;  %3922 = vmatpush3.bf16.msra.mxu1 %v4212_v35 }
 0x101   :  { %s398_s2 = scalar_select %p397_p3, 1, 0  ;;  %v384_v48 = vadd.f32 %v3591_v47, %v381_v43  ;;  %3923 = vmatprep.subr.bf16.mxu1 %v4826_v5  ;;  %v4220_v43 = vld [vmem:[#allocation9 + $0x8] ss:$12 sps:$4 sm:$0xff]  }
 0x102   :  { %s388_s3 = sadd.s32 %s387_s29, %s377_s8  ;;  %s402_s19 = scalar_lea.vmem [#allocation4], %s5085_s6  ;;  %v496_v57 = vsel %vm482_vm0, %v362_v50, %v462_v51 }
 0x103   :  { %s389_s1 = smul.u32 %s388_s3, %s387_s29  ;;  %s399_s28 = sadd.s32 %s398_s2, %s388_s3  ;;  %v403_v52 = vld [vmem:[%s402_s19] sm:$0x1]  ;;  %v465_v53 = vrot.slane %v384_v48, 6 }
 0x104   :  { %s400_s26 = smul.u32 %s399_s28, %s398_s2  ;;  %p408_p4 = scmp.ne.s32.totalorder %s5093_s13, 1  ;;  %3924 = vmatpush3.bf16.msra.mxu1 %v4216_v40 }
 0x105   :  { %s3557_s9 = scalar_lea.vmem [#allocation7], %s389_s1  ;;  %p419_p5 = scmp.ne.s32.totalorder %s5095_s20, 1  ;;  %v497_v62 = vsel %vm484_vm1, %v496_v57, %v465_v53  ;;  %3925 = vmatprep.subr.bf16.mxu1 %v4826_v5 }
 0x106   :  { %v3593_v54 = vld [vmem:[%s3557_s9 + $0x1] sm:$0x1]  ;;  %s3560_s27 = scalar_lea.vmem [#allocation7], %s400_s26  ;;  %s413_s6 = scalar_lea.vmem [#allocation4], %s5093_s13 }
 0x107   :  { %v395_v55 = vadd.f32 %v3593_v54, %v392_v49  ;;  %v3595_v56 = vld [vmem:[%s3560_s27 + $0x1] sm:$0x1]  ;;  %s409_s18 = scalar_select %p408_p4, 1, 0  ;;  %v414_v59 = vld [vmem:[%s413_s6] sm:$0x1] }
 0x108   :  { %v406_v58 = vadd.f32 %v3595_v56, %v403_v52  ;;  %s420_s5 = scalar_select %p419_p5, 1, 0  ;;  %3926 = vmatpush3.bf16.msra.mxu1 %v4220_v43 }
 0x109   :  { %s410_s8 = sadd.s32 %s409_s18, %s399_s28  ;;  %v468_v60 = vrot.slane %v395_v55, 5  ;;  %s424_s12 = scalar_lea.vmem [#allocation4], %s5095_s20  ;;  %3931 = vmatprep.subr.bf16.mxu1 %v4826_v5 }
 0x10a   :  { %s411_s4 = smul.u32 %s410_s8, %s409_s18  ;;  %s421_s0 = sadd.s32 %s420_s5, %s410_s8  ;;  %v425_v61 = vld [vmem:[%s424_s12] sm:$0x1]  ;;  %v471_v63 = vrot.slane %v406_v58, 4 }
 0x10b   :  { %s422_s21 = smul.u32 %s421_s0, %s420_s5  ;;  %p430_p6 = scmp.ne.s32.totalorder %s5098_s14, 1  ;;  %v498_v1 = vsel %vm486_vm2, %v497_v62, %v468_v60 }
 0x10c   :  { %s3563_s24 = scalar_lea.vmem [#allocation7], %s411_s4  ;;  %s435_s2 = scalar_lea.vmem [#allocation4], %s5098_s14  ;;  %v499_v11 = vsel %vm488_vm3, %v498_v1, %v471_v63 }
 0x10d   :  { %v3597_v0 = vld [vmem:[%s3563_s24 + $0x1] sm:$0x1]  ;;  %s3566_s29 = scalar_lea.vmem [#allocation7], %s422_s21  ;;  %v436_v9 = vld [vmem:[%s435_s2] sm:$0x1]  ;;  %s5504_s28 = sld [smem:[#allocation42_spill]] }
 0x10e   :  { %v417_v2 = vadd.f32 %v3597_v0, %v414_v59  ;;  %v3599_v3 = vld [vmem:[%s3566_s29 + $0x1] sm:$0x1]  ;;  %s431_s13 = scalar_select %p430_p6, 1, 0 }
 0x10f   :  { %v428_v6 = vadd.f32 %v3599_v3, %v425_v61  ;;  %s5505_s9 = sld [smem:[#allocation43_spill]]  ;;  %s4829_s27 = smov 96  }
 0x110   :  { %s432_s20 = sadd.s32 %s431_s13, %s421_s0  ;;  %v474_v10 = vrot.slane %v417_v2, 3  ;;  %s5506_s24 = sld [smem:[#allocation46_spill]] }
 0x111   :  { %s433_s3 = smul.u32 %s432_s20, %s431_s13  ;;  %v477_v12 = vrot.slane %v428_v6, 2 }
 0x112   :  { %v500_v13 = vsel %vm490_vm4, %v499_v11, %v474_v10 }
 0x113   :  { %s3569_s15 = scalar_lea.vmem [#allocation7], %s433_s3  ;;  %v501_v16 = vsel %vm492_vm5, %v500_v13, %v477_v12  ;;  %v3603_v61 = vld [vmem:[%s5504_s28] ss:$0 sm:$0xff] }
 0x114   :  { %v3601_v14 = vld [vmem:[%s3569_s15 + $0x1] sm:$0x1] }
 0x115   :  { %v439_v15 = vadd.f32 %v3601_v14, %v436_v9  ;;  %v3604_v2 = vld [vmem:[%s5505_s9] ss:$0 sm:$0xff]  ;;  %v5158_v9 = vsub.s32 1, %v5155_v8 }
 0x116   :  { %v588_v12 = vld [vmem:[#allocation10] sm:$0x7] }
 0x117   :  { %v480_v17 = vrot.slane %v439_v15, 1  ;;  %v597_v15 = vrot.slane %v588_v12, %v5158_v9  ;;  %v601_v27 = vrot.slane %v588_v12, %v600_v23 }
 0x119   :  { %v502_v18 = vsel %vm494_vm6, %v501_v16, %v480_v17 }
 0x11a   :  { %v5121_v19 = vadd.f32 %v5069_v34, %v502_v18  ;;  %v4211_v34 = vld [vmem:[#allocation9 + $0x30] ss:$12 sps:$4 sm:$0xff]  }
 0x11b   :  { %744 = vmatpush1.bf16.msra.mxu0 %v4211_v34 }
 0x11c   :  { %514 = vadd.xlane.f32.xlu0 %v5121_v19  ;;  %v520_v20 = vmul.f32 %v5121_v19, %v5121_v19  ;;  %745 = vmatprep.subr.bf16.mxu0 %v4213_v36 }
 0x11e   :  { %523 = vadd.xlane.f32.xlu1 %v520_v20  ;;  %v5162_v20 = vsub.s32 0, %v5155_v8 }
 0x11f   :  { %746 = vmatpush1.bf16.msra.mxu0 %v4215_v38 }
 0x120   :  { %747 = vmatprep.subr.bf16.mxu0 %v4217_v41  ;;  %v593_v25 = vrot.slane %v588_v12, %v5162_v20 }
 0x123   :  { %748 = vmatpush1.bf16.msra.mxu0 %v4219_v42 }
 0x124   :  { %3955 = vmatprep.subr.bf16.mxu0 %v4826_v5 }
 0x184   :  { %v513_v44 = vpop.xlane.xlu0 %512 }
 0x185   :  { %v517_v45 = vmul.f32 0.0078125, %v513_v44 }
 0x186   :  { %v522_v46 = vpop.xlane.xlu1 %521 }
 0x187   :  { %v527_v47 = vmul.f32 %v517_v45, %v517_v45  ;;  %v525_v48 = vmul.f32 0.0078125, %v522_v46  ;;  %v531_v59 = vsub.f32 %v5083_v39, %v517_v45 }
 0x189   :  { %v529_v49 = vsub.f32 %v525_v48, %v527_v47 }
 0x18b   :  { %v533_v50 = vadd.f32 1e-05, %v529_v49 }
 0x18d   :  { %4365 = vrsqrt.f32 %v533_v50 }
 0x19a   :  { %v4366_v58 = vpop.eup %4365 }
 0x19b   :  { %v537_v60 = vmul.f32 %v4366_v58, %v531_v59 }
 0x19d   :  { %v545_v1 = vmul.f32 %v3603_v61, %v537_v60 }
 0x19f   :  { %v5145_v4 = vadd.f32 %v3604_v2, %v545_v1 }
 0x1a5   :  { %v515_v51 = vpop.xlane.xlu0 %514 }
 0x1a6   :  { %v518_v52 = vmul.f32 0.0078125, %v515_v51 }
 0x1a7   :  { %v524_v53 = vpop.xlane.xlu1 %523 }
 0x1a8   :  { %v528_v54 = vmul.f32 %v518_v52, %v518_v52  ;;  %v526_v55 = vmul.f32 0.0078125, %v524_v53  ;;  %v532_v62 = vsub.f32 %v5121_v19, %v518_v52 }
 0x1aa   :  { %v530_v56 = vsub.f32 %v526_v55, %v528_v54 }
 0x1ac   :  { %v534_v57 = vadd.f32 1e-05, %v530_v56 }
 0x1ae   :  { %4367 = vrsqrt.f32 %v534_v57 }
 0x1bb   :  { %v4368_v63 = vpop.eup %4367 }
 0x1bc   :  { %v538_v0 = vmul.f32 %v4368_v63, %v532_v62 }
 0x1be   :  { %v546_v3 = vmul.f32 %v3603_v61, %v538_v0 }
 0x1c0   :  { %v5147_v6 = vadd.f32 %v3604_v2, %v546_v3 }
 0x1c2   :  { %v555_v39 = vpack.c.bf16 %v5147_v6, %v5145_v4 }
 0x1c4   :  { %766 = vmatmul.mubr.bf16.vlgmr.msra.gmra.mxu0 %v555_v39  ;;  %3928 = vmatmul.mubr.bf16.vlgmr.msra.gmra.mxu1 %v555_v39 }
 0x1c5   :  { %3933 = vmatprep.mubr.msk.bf16.mxu1 %vm4828_vm7, %v4826_v5  ;;  %3957 = vmatprep.mubr.msk.bf16.mxu0 %vm4828_vm7, %v4826_v5 }
 0x284   :  { %v767_v10 = vpop.f32.mrf.mxu0  ;;  %v810_v11 = vpop.f32.mrf.mxu1 }
 0x285   :  { %v768_v30 = vadd.f32 %v767_v10, %v593_v25  ;;  %v811_v31 = vadd.f32 %v810_v11, %v601_v27 }
 0x286   :  { %v769_v13 = vpop.f32.mrf.mxu0  ;;  %v3929_v14 = vpop.f32.mrf.mxu1 }
 0x287   :  { %v770_v21 = vadd.f32 %v769_v13, %v597_v15 }
 0x288   :  { %v771_v16 = vpop.f32.mrf.mxu0  ;;  %v813_v17 = vpop.f32.mrf.mxu1 }
 0x289   :  { %v772_v28 = vadd.f32 %v771_v16, %v593_v25  ;;  %v814_v29 = vadd.f32 %v813_v17, %v601_v27 }
 0x28a   :  { %v773_v18 = vpop.f32.mrf.mxu0  ;;  %v3930_v19 = vpop.f32.mrf.mxu1 }
 0x28b   :  { %v774_v22 = vadd.f32 %v773_v18, %v597_v15  ;;  %v817_v32 = vpack.c.bf16 %v772_v28, %v768_v30  ;;  %v5170_v33 = vpack.c.bf16 %v814_v29, %v811_v31 }
 0x28d   :  { %v818_v24 = vpack.c.bf16 %v774_v22, %v770_v21 }
 0x28f   :  { %v825_v26 = vsel %vm820_vm8, %v818_v24, 0 }
 0x290   :  { %3932 = vmatpush3.bf16.xpose.msra.mxu1 %v825_v26 }
 0x291   :  { %3937 = vmatprep.subr.bf16.mxu1 %v4826_v5 }
 0x297   :  { %3934 = vmatmul.mubr.msk.bf16.vlgmr.msra.gmra.mxu1 %vm820_vm8, %v817_v32 }
 0x298   :  { %3938 = vmatpush3.bf16.msra.mxu1 %v5170_v33  ;;  %3939 = vmatprep.mubr.msk.bf16.mxu1 %vm4828_vm7, %v4826_v5 }
 0x299   :  { %3943 = vmatprep.subr.bf16.mxu1 %v4826_v5 }
 0x357   :  { %v861_v34 = vpop.f32.mrf.mxu1 }
 0x358   :  { %v868_v35 = vmul.f32 0.17677669, %v861_v34 }
 0x359   :  { %v3935_v36 = vpop.f32.mrf.mxu1 }
 0x35a   :  { %v871_v38 = vsel %vm870_vm9, %v868_v35, -inf }
 0x35b   :  { %872 = vmax.xlane.f32.xlu0 %v871_v38  ;;  %v864_v40 = vpop.f32.mrf.mxu1 }
 0x35c   :  { %v869_v41 = vmul.f32 0.17677669, %v864_v40 }
 0x35d   :  { %v3936_v42 = vpop.f32.mrf.mxu1 }
 0x35e   :  { %v874_v43 = vsel %vm870_vm9, %v869_v41, -inf }
 0x35f   :  { %875 = vmax.xlane.f32.xlu1 %v874_v43 }
 0x3e4   :  { %v873_v44 = vpop.xlane.xlu0 %872 }
 0x3e5   :  { %v877_v45 = vsub.f32 %v868_v35, %v873_v44 }
 0x3e7   :  { %v879_v46 = vmul.f32 1.442695, %v877_v45 }
 0x3e8   :  { %v876_v47 = vpop.xlane.xlu1 %875 }
 0x3e9   :  { %4369 = vpow2.f32 %v879_v46  ;;  %v878_v48 = vsub.f32 %v869_v41, %v876_v47 }
 0x3eb   :  { %v881_v49 = vmul.f32 1.442695, %v878_v48 }
 0x3ed   :  { %4371 = vpow2.f32 %v881_v49 }
 0x3f6   :  { %v4370_v50 = vpop.eup %4369 }
 0x3f7   :  { %v883_v51 = vsel %vm870_vm9, %v4370_v50, 0.0 }
 0x3f8   :  { %884 = vadd.xlane.f32.xlu0 %v883_v51 }
 0x3fa   :  { %v4372_v52 = vpop.eup %4371 }
 0x3fb   :  { %v886_v53 = vsel %vm870_vm9, %v4372_v52, 0.0 }
 0x3fc   :  { %887 = vadd.xlane.f32.xlu1 %v886_v53 }
 0x40d   :  { %939 = vrot.lane.b32.xlu1 %v817_v32, %s4829_s27 }
 0x40e   :  { %942 = vrot.lane.b32.xlu0 %v818_v24, %s4829_s27 }
 0x411   :  { %1066 = vrot.lane.b32.xlu1 %v818_v24, %s4819_s25 }
 0x412   :  { %1189 = vrot.lane.b32.xlu0 %v818_v24, %s4810_s30 }
 0x415   :  { %1064 = vrot.lane.b32.xlu1 %v817_v32, %s4819_s25 }
 0x419   :  { %1187 = vrot.lane.b32.xlu1 %v817_v32, %s4810_s30 }
 0x481   :  { %v885_v54 = vpop.xlane.xlu0 %884 }
 0x482   :  { %4373 = vrcp.f32 %v885_v54 }
 0x485   :  { %v888_v55 = vpop.xlane.xlu1 %887  ;;  %v943_v57 = vpop.permute.xlu0 %942 }
 0x486   :  { %4375 = vrcp.f32 %v888_v55  ;;  %v948_v39 = vsel %vm820_vm8, %v943_v57, 0 }
 0x489   :  { %v940_v56 = vpop.permute.xlu1 %939  ;;  %v1190_v62 = vpop.permute.xlu0 %1189 }
 0x48a   :  { %v1195_v2 = vsel %vm820_vm8, %v1190_v62, 0 }
 0x48d   :  { %v1067_v58 = vpop.permute.xlu1 %1066 }
 0x48e   :  { %v1072_v59 = vsel %vm820_vm8, %v1067_v58, 0 }
 0x48f   :  { %3956 = vmatpush3.bf16.xpose.msra.mxu0 %v1072_v59  ;;  %v4374_v60 = vpop.eup %4373 }
 0x490   :  { %3967 = vmatprep.subr.bf16.mxu0 %v4826_v5  ;;  %v891_v63 = vmul.f32 %v4374_v60, %v4370_v50 }
 0x491   :  { %v1065_v1 = vpop.permute.xlu1 %1064 }
 0x493   :  { %v4376_v61 = vpop.eup %4375 }
 0x494   :  { %v892_v0 = vmul.f32 %v4376_v61, %v4372_v52 }
 0x495   :  { %v1188_v7 = vpop.permute.xlu1 %1187 }
 0x496   :  { %3958 = vmatmul.mubr.msk.bf16.vlgmr.msra.gmra.mxu0 %vm820_vm8, %v1065_v1  ;;  %v893_v3 = vpack.c.bf16 %v892_v0, %v891_v63 }
 0x497   :  { %3968 = vmatpush3.bf16.xpose.msra.mxu0 %v1195_v2  ;;  %3969 = vmatprep.mubr.msk.bf16.mxu0 %vm4828_vm7, %v4826_v5 }
 0x498   :  { %3940 = vmatmul.mubr.msk.bf16.vlgmr.msra.gmra.mxu1 %vm870_vm9, %v893_v3  ;;  %3979 = vmatprep.subr.bf16.mxu0 %v4826_v5 }
 0x499   :  { %3944 = vmatpush3.bf16.xpose.msra.mxu1 %v948_v39  ;;  %3945 = vmatprep.mubr.msk.bf16.mxu1 %vm4828_vm7, %v4826_v5 }
 0x49a   :  { %3949 = vmatprep.subr.bf16.mxu1 %v4826_v5 }
 0x49e   :  { %3970 = vmatmul.mubr.msk.bf16.vlgmr.msra.gmra.mxu0 %vm820_vm8, %v1188_v7 }
 0x49f   :  { %3995 = vmatprep.mubr.msk.bf16.mxu0 %vm4828_vm7, %v4826_v5 }
 0x4a0   :  { %3946 = vmatmul.mubr.msk.bf16.vlgmr.msra.gmra.mxu1 %vm820_vm8, %v940_v56 }
 0x4a1   :  { %3951 = vmatprep.mubr.msk.bf16.mxu1 %vm4828_vm7, %v4826_v5 }
 0x556   :  { %v1108_v10 = vpop.f32.mrf.mxu0 }
 0x557   :  { %v1115_v26 = vmul.f32 0.17677669, %v1108_v10 }
 0x558   :  { %v5205_v11 = vpop.f32.mrf.mxu1  ;;  %v3959_v12 = vpop.f32.mrf.mxu0 }
 0x559   :  { %v1117_v35 = vsel %vm870_vm9, %v1115_v26, -inf }
 0x55a   :  { %v3941_v13 = vpop.f32.mrf.mxu1  ;;  %v1111_v14 = vpop.f32.mrf.mxu0 }
 0x55b   :  { %v1116_v32 = vmul.f32 0.17677669, %v1111_v14 }
 0x55c   :  { %v5207_v15 = vpop.f32.mrf.mxu1  ;;  %v3960_v16 = vpop.f32.mrf.mxu0 }
 0x55d   :  { %v1120_v40 = vsel %vm870_vm9, %v1116_v32, -inf }
 0x55e   :  { %v3942_v17 = vpop.f32.mrf.mxu1  ;;  %v1231_v18 = vpop.f32.mrf.mxu0 }
 0x55f   :  { %v1238_v38 = vmul.f32 0.17677669, %v1231_v18 }
 0x560   :  { %v984_v19 = vpop.f32.mrf.mxu1  ;;  %v3971_v21 = vpop.f32.mrf.mxu0 }
 0x561   :  { %v991_v22 = vmul.f32 0.17677669, %v984_v19  ;;  %v1240_v42 = vsel %vm870_vm9, %v1238_v38, -inf }
 0x562   :  { %v3947_v24 = vpop.f32.mrf.mxu1  ;;  %v1234_v25 = vpop.f32.mrf.mxu0 }
 0x563   :  { %v993_v27 = vsel %vm870_vm9, %v991_v22, -inf  ;;  %v1239_v34 = vmul.f32 0.17677669, %v1234_v25 }
 0x564   :  { %v3972_v28 = vpop.f32.mrf.mxu0  ;;  %994 = vmax.xlane.f32.xlu0 %v993_v27  ;;  %v987_v29 = vpop.f32.mrf.mxu1 }
 0x565   :  { %v992_v30 = vmul.f32 0.17677669, %v987_v29  ;;  %v1243_v41 = vsel %vm870_vm9, %v1239_v34, -inf }
 0x566   :  { %v3948_v31 = vpop.f32.mrf.mxu1 }
 0x567   :  { %v996_v36 = vsel %vm870_vm9, %v992_v30, -inf }
 0x568   :  { %1118 = vmax.xlane.f32.xlu0 %v1117_v35  ;;  %997 = vmax.xlane.f32.xlu1 %v996_v36 }
 0x56c   :  { %1121 = vmax.xlane.f32.xlu0 %v1120_v40  ;;  %1244 = vmax.xlane.f32.xlu1 %v1243_v41 }
 0x570   :  { %1241 = vmax.xlane.f32.xlu0 %v1240_v42 }
 0x5ed   :  { %v995_v43 = vpop.xlane.xlu0 %994 }
 0x5ee   :  { %v999_v52 = vsub.f32 %v991_v22, %v995_v43  ;;  %v4221_v43 = vld [vmem:[#allocation12 + $0x38] sm:$0xff]  }
 0x5ef   :  { %3980 = vmatpush3.bf16.msra.mxu0 %v4221_v43  ;;  %v4240_v43 = vld [vmem:[#allocation15 + $0x44] ss:$8 sps:$4 sm:$0xff]  }
 0x5f0   :  { %v1001_v58 = vmul.f32 1.442695, %v999_v52  ;;  %3981 = vmatprep.subr.bf16.mxu0 %v4826_v5 }
 0x5f1   :  { %v1119_v44 = vpop.xlane.xlu0 %1118  ;;  %v998_v45 = vpop.xlane.xlu1 %997 }
 0x5f2   :  { %v1123_v46 = vsub.f32 %v1115_v26, %v1119_v44  ;;  %v1000_v53 = vsub.f32 %v992_v30, %v998_v45  ;;  %v4222_v44 = vld [vmem:[#allocation12 + $0x30] sm:$0xff]   ;;  %v4223_v45 = vld [vmem:[#allocation12 + $0x28] sm:$0xff]  }
 0x5f3   :  { %3982 = vmatpush3.bf16.msra.mxu0 %v4222_v44  ;;  %v4241_v44 = vld [vmem:[#allocation15 + $0x30] ss:$8 sps:$4 sm:$0xff]  }
 0x5f4   :  { %v1125_v47 = vmul.f32 1.442695, %v1123_v46  ;;  %v1003_v59 = vmul.f32 1.442695, %v1000_v53  ;;  %3983 = vmatprep.subr.bf16.mxu0 %v4826_v5  ;;  %v4224_v46 = vld [vmem:[#allocation12 + $0x20] sm:$0xff]   ;;  %v4227_v53 = vld [vmem:[#allocation12 + $0x8] sm:$0xff]  }
 0x5f5   :  { %v1122_v48 = vpop.xlane.xlu0 %1121  ;;  %v1245_v49 = vpop.xlane.xlu1 %1244 }
 0x5f6   :  { %4377 = vpow2.f32 %v1125_v47  ;;  %v1124_v50 = vsub.f32 %v1116_v32, %v1122_v48  ;;  %v1247_v51 = vsub.f32 %v1239_v34, %v1245_v49  ;;  %v4225_v47 = vld [vmem:[#allocation12 + $0x18] sm:$0xff]  }
 0x5f7   :  { %3984 = vmatpush3.bf16.msra.mxu0 %v4223_v45  ;;  %v4246_v45 = vld [vmem:[#allocation15 + $0x24] ss:$8 sps:$4 sm:$0xff]  }
 0x5f8   :  { %v1127_v54 = vmul.f32 1.442695, %v1124_v50  ;;  %v1250_v55 = vmul.f32 1.442695, %v1247_v51  ;;  %3985 = vmatprep.subr.bf16.mxu0 %v4826_v5  ;;  %v4226_v50 = vld [vmem:[#allocation12 + $0x10] sm:$0xff]  }
 0x5f9   :  { %v1242_v56 = vpop.xlane.xlu0 %1241 }
 0x5fa   :  { %4379 = vpow2.f32 %v1127_v54  ;;  %v1246_v57 = vsub.f32 %v1238_v38, %v1242_v56 }
 0x5fb   :  { %4381 = vpow2.f32 %v1250_v55  ;;  %3986 = vmatpush3.bf16.msra.mxu0 %v4224_v46  ;;  %v4244_v46 = vld [vmem:[#allocation15 + $0x20] ss:$8 sps:$4 sm:$0xff]  }
 0x5fc   :  { %v1248_v60 = vmul.f32 1.442695, %v1246_v57  ;;  %3987 = vmatprep.subr.bf16.mxu0 %v4826_v5  ;;  %v4228_v57 = vld [vmem:[#allocation12] sm:$0xff]  }
 0x5fe   :  { %4383 = vpow2.f32 %v1248_v60 }
 0x5ff   :  { %4385 = vpow2.f32 %v1001_v58  ;;  %3988 = vmatpush3.bf16.msra.mxu0 %v4225_v47  ;;  %v4249_v47 = vld [vmem:[#allocation15 + $0x14] ss:$8 sps:$4 sm:$0xff]  }
 0x600   :  { %4387 = vpow2.f32 %v1003_v59  ;;  %3989 = vmatprep.subr.bf16.mxu0 %v4826_v5 }
 0x603   :  { %v4378_v61 = vpop.eup %4377  ;;  %3990 = vmatpush3.bf16.msra.mxu0 %v4226_v50  ;;  %v4250_v50 = vld [vmem:[#allocation15] ss:$8 sps:$4 sm:$0xff]  }
 0x604   :  { %v1129_v62 = vsel %vm870_vm9, %v4378_v61, 0.0  ;;  %3991 = vmatprep.subr.bf16.mxu0 %v4826_v5 }
 0x605   :  { %1130 = vadd.xlane.f32.xlu0 %v1129_v62 }
 0x607   :  { %v4380_v63 = vpop.eup %4379  ;;  %3992 = vmatpush3.bf16.msra.mxu0 %v4227_v53 }
 0x608   :  { %v1132_v0 = vsel %vm870_vm9, %v4380_v63, 0.0  ;;  %v4382_v1 = vpop.eup %4381  ;;  %3993 = vmatprep.subr.bf16.mxu0 %v4826_v5 }
 0x609   :  { %1133 = vadd.xlane.f32.xlu1 %v1132_v0  ;;  %v1255_v7 = vsel %vm870_vm9, %v4382_v1, 0.0 }
 0x60b   :  { %v4384_v2 = vpop.eup %4383  ;;  %3994 = vmatpush3.bf16.msra.mxu0 %v4228_v57 }
 0x60c   :  { %v4386_v3 = vpop.eup %4385  ;;  %v1252_v39 = vsel %vm870_vm9, %v4384_v2, 0.0 }
 0x60d   :  { %v4388_v10 = vpop.eup %4387  ;;  %1253 = vadd.xlane.f32.xlu0 %v1252_v39  ;;  %1256 = vadd.xlane.f32.xlu1 %v1255_v7  ;;  %v1005_v12 = vsel %vm870_vm9, %v4386_v3, 0.0 }
 0x60e   :  { %v1008_v13 = vsel %vm870_vm9, %v4388_v10, 0.0 }
 0x611   :  { %1006 = vadd.xlane.f32.xlu0 %v1005_v12  ;;  %1009 = vadd.xlane.f32.xlu1 %v1008_v13 }
 0x622   :  { %1140 = vrot.lane.b32.xlu1 %v5170_v33, %s4819_s25 }
 0x626   :  { %1263 = vrot.lane.b32.xlu1 %v5170_v33, %s4810_s30 }
 0x627   :  { %1017 = vrot.lane.b32.xlu0 %v5170_v33, %s4829_s27 }
 0x68e   :  { %v1131_v14 = vpop.xlane.xlu0 %1130 }
 0x692   :  { %v1134_v16 = vpop.xlane.xlu1 %1133 }
 0x696   :  { %v1254_v17 = vpop.xlane.xlu0 %1253  ;;  %v1257_v18 = vpop.xlane.xlu1 %1256 }
 0x69a   :  { %v1007_v19 = vpop.xlane.xlu0 %1006  ;;  %v1010_v21 = vpop.xlane.xlu1 %1009 }
 0x69b   :  { %4389 = vrcp.f32 %v1007_v19 }
 0x69c   :  { %4391 = vrcp.f32 %v1010_v21 }
 0x69d   :  { %4393 = vrcp.f32 %v1134_v16 }
 0x69e   :  { %v1018_v22 = vpop.permute.xlu0 %1017  ;;  %4395 = vrcp.f32 %v1131_v14  ;;  %v1141_v29 = vpop.permute.xlu1 %1140 }
 0x69f   :  { %3950 = vmatpush3.bf16.msra.mxu1 %v1018_v22  ;;  %4397 = vrcp.f32 %v1254_v17 }
 0x6a0   :  { %3961 = vmatprep.subr.bf16.mxu1 %v4826_v5  ;;  %4399 = vrcp.f32 %v1257_v18 }
 0x6a2   :  { %v1264_v38 = vpop.permute.xlu1 %1263 }
 0x6a8   :  { %v4390_v24 = vpop.eup %4389 }
 0x6a9   :  { %v4392_v25 = vpop.eup %4391  ;;  %v1013_v26 = vmul.f32 %v4390_v24, %v4386_v3 }
 0x6aa   :  { %v1014_v33 = vmul.f32 %v4392_v25, %v4388_v10  ;;  %v4394_v28 = vpop.eup %4393 }
 0x6ab   :  { %v4396_v30 = vpop.eup %4395  ;;  %v1138_v31 = vmul.f32 %v4394_v28, %v4380_v63 }
 0x6ac   :  { %v1015_v27 = vpack.c.bf16 %v1014_v33, %v1013_v26  ;;  %v1137_v32 = vmul.f32 %v4396_v30, %v4378_v61  ;;  %v4398_v34 = vpop.eup %4397  ;;  %v3637_v26 = vld [vmem:[#allocation13] ss:$0 sm:$0xff] }
 0x6ad   :  { %v4400_v36 = vpop.eup %4399  ;;  %v1260_v40 = vmul.f32 %v4398_v34, %v4384_v2 }
 0x6ae   :  { %3952 = vmatmul.mubr.msk.bf16.vlgmr.msra.gmra.mxu1 %vm870_vm9, %v1015_v27  ;;  %v1139_v35 = vpack.c.bf16 %v1138_v31, %v1137_v32  ;;  %v1261_v41 = vmul.f32 %v4400_v36, %v4382_v1  ;;  %v4229_v36 = vld [vmem:[#allocation15 + $0x70] ss:$8 sps:$4 sm:$0xff]  }
 0x6af   :  { %3962 = vmatpush3.bf16.msra.mxu1 %v1141_v29  ;;  %3963 = vmatprep.mubr.msk.bf16.mxu1 %vm4828_vm7, %v4826_v5 }
 0x6b0   :  { %3973 = vmatprep.subr.bf16.mxu1 %v4826_v5  ;;  %v1262_v42 = vpack.c.bf16 %v1261_v41, %v1260_v40  ;;  %v4232_v40 = vld [vmem:[#allocation15 + $0x60] ss:$8 sps:$4 sm:$0xff]   ;;  %v4235_v41 = vld [vmem:[#allocation15 + $0x50] ss:$8 sps:$4 sm:$0xff]  }
 0x6b6   :  { %3964 = vmatmul.mubr.msk.bf16.vlgmr.msra.gmra.mxu1 %vm870_vm9, %v1139_v35  ;;  %v4231_v35 = vld [vmem:[#allocation15 + $0x74] ss:$8 sps:$4 sm:$0xff]  }
 0x6b7   :  { %3974 = vmatpush3.bf16.msra.mxu1 %v1264_v38  ;;  %3975 = vmatprep.mubr.msk.bf16.mxu1 %vm4828_vm7, %v4826_v5  ;;  %v4234_v38 = vld [vmem:[#allocation15 + $0x64] ss:$8 sps:$4 sm:$0xff]  }
 0x6b8   :  { %1610 = vmatprep.subr.bf16.mxu1 %v4231_v35  ;;  %v4268_v35 = vld [vmem:[#allocation18] sm:$0xff]  }
 0x6be   :  { %3976 = vmatmul.mubr.msk.bf16.vlgmr.msra.gmra.mxu1 %vm870_vm9, %v1262_v42  ;;  %v4238_v42 = vld [vmem:[#allocation15 + $0x40] ss:$8 sps:$4 sm:$0xff]  }
 0x6bf   :  { %1642 = vmatprep.mubr.bf16.mxu1 %v4827_v37  ;;  %1611 = vmatpush1.bf16.msra.mxu1 %v4229_v36  ;;  %v1518_v36 = vld [vmem:[#allocation16] sm:$0x3] }
 0x6c0   :  { %1612 = vmatprep.subr.bf16.mxu1 %v4234_v38  ;;  %v1523_v38 = vrot.slane %v1518_v36, %v5162_v20 }
 0x6c3   :  { %1613 = vmatpush1.bf16.msra.mxu1 %v4232_v40  ;;  %v1527_v40 = vrot.slane %v1518_v36, %v5158_v9 }
 0x76e   :  { %v1057_v48 = vpop.f32.mrf.mxu1 }
 0x770   :  { %v3953_v49 = vpop.f32.mrf.mxu1 }
 0x771   :  { %v4252_v49 = vld [vmem:[#allocation15 + $0x4] ss:$8 sps:$4 sm:$0xff]  }
 0x772   :  { %v1060_v51 = vpop.f32.mrf.mxu1 }
 0x773   :  { %v4159_v52 = vpack.i.bf16 %v1060_v51, %v1057_v48  ;;  %v4247_v48 = vld [vmem:[#allocation15 + $0x10] ss:$8 sps:$4 sm:$0xff]  }
 0x774   :  { %v3954_v54 = vpop.f32.mrf.mxu1 }
 0x775   :  { %4160 = vrot.lane.b32.xlu1 %v4159_v52, %s4810_s30 }
 0x776   :  { %v1180_v55 = vpop.f32.mrf.mxu1 }
 0x778   :  { %v3965_v56 = vpop.f32.mrf.mxu1 }
 0x77a   :  { %v1183_v58 = vpop.f32.mrf.mxu1 }
 0x77b   :  { %v4164_v59 = vpack.i.bf16 %v1183_v58, %v1180_v55 }
 0x77c   :  { %v3966_v60 = vpop.f32.mrf.mxu1 }
 0x77d   :  { %4165 = vrot.lane.b32.xlu0 %v4164_v59, %s4819_s25 }
 0x77e   :  { %v1303_v61 = vpop.f32.mrf.mxu1 }
 0x780   :  { %v3977_v62 = vpop.f32.mrf.mxu1 }
 0x782   :  { %v1306_v63 = vpop.f32.mrf.mxu1 }
 0x783   :  { %v4169_v0 = vpack.i.bf16 %v1306_v63, %v1303_v61 }
 0x784   :  { %v3978_v1 = vpop.f32.mrf.mxu1 }
 0x785   :  { %4170 = vrot.lane.b32.xlu1 %v4169_v0, %s4829_s27 }
 0x7e7   :  { %v4161_v2 = vpop.permute.xlu1 %4160 }
 0x7e8   :  { %v4163_v39 = vunpack.i.h.bf16 %v4161_v2  ;;  %v4162_v7 = vunpack.i.l.bf16 %v4161_v2 }
 0x7ea   :  { %v1335_v14 = vsel %vm820_vm8, %v5207_v15, %v4163_v39  ;;  %v1334_v16 = vsel %vm820_vm8, %v5205_v11, %v4162_v7  ;;  %v3646_v39 = vld [vmem:[%s5474_s10] ss:$0 sm:$0xff] }
 0x7ef   :  { %v4166_v3 = vpop.permute.xlu0 %4165 }
 0x7f0   :  { %v4168_v10 = vunpack.i.h.bf16 %v4166_v3  ;;  %v4167_v12 = vunpack.i.l.bf16 %v4166_v3 }
 0x7f2   :  { %v1338_v19 = vsel %vm1336_vm10, %v1335_v14, %v4168_v10  ;;  %v1337_v21 = vsel %vm1336_vm10, %v1334_v16, %v4167_v12  ;;  %v3647_v14 = vld [vmem:[%s5475_s11] ss:$0 sm:$0xff] }
 0x7f7   :  { %v4171_v13 = vpop.permute.xlu1 %4170 }
 0x7f8   :  { %v4173_v17 = vunpack.i.h.bf16 %v4171_v13  ;;  %v4172_v18 = vunpack.i.l.bf16 %v4171_v13 }
 0x7fa   :  { %v1341_v22 = vsel %vm1339_vm11, %v1338_v19, %v4173_v17  ;;  %v1340_v24 = vsel %vm1339_vm11, %v1337_v21, %v4172_v18  ;;  %v4253_v21 = vld [vmem:[#allocation18 + $0x78] sm:$0xff]  }
 0x7fb   :  { %v1342_v25 = vpack.c.bf16 %v1341_v22, %v1340_v24  ;;  %v4254_v22 = vld [vmem:[#allocation18 + $0x38] sm:$0xff]   ;;  %3815 = vmatprep.subr.bf16.mxu0 %v4253_v21  ;;  %v4255_v24 = vld [vmem:[#allocation18 + $0x70] sm:$0xff]  }
 0x7fd   :  { %3996 = vmatmul.mubr.bf16.vlgmr.msra.gmra.mxu0 %v1342_v25  ;;  %v4256_v25 = vld [vmem:[#allocation18 + $0x30] sm:$0xff]  }
 0x7fe   :  { %3816 = vmatpush3.bf16.msra.mxu0 %v4254_v22 }
 0x7ff   :  { %3817 = vmatprep.subr.bf16.mxu0 %v4255_v24 }
 0x802   :  { %3818 = vmatpush3.bf16.msra.mxu0 %v4256_v25 }
 0x8bd   :  { %v1448_v33 = vpop.f32.mrf.mxu0 }
 0x8be   :  { %v1449_v27 = vadd.f32 %v3637_v26, %v1448_v33  ;;  %v4258_v33 = vld [vmem:[#allocation18 + $0x28] sm:$0xff]  }
 0x8bf   :  { %v3997_v28 = vpop.f32.mrf.mxu0 }
 0x8c0   :  { %v1455_v15 = vadd.f32 %v1449_v27, %v5145_v4  ;;  %v4237_v4 = vld [vmem:[#allocation15 + $0x54] ss:$8 sps:$4 sm:$0xff]   ;;  %v4259_v27 = vld [vmem:[#allocation18 + $0x60] sm:$0xff]  }
 0x8c1   :  { %v1451_v29 = vpop.f32.mrf.mxu0  ;;  %1614 = vmatprep.subr.bf16.mxu1 %v4237_v4  ;;  %v4260_v28 = vld [vmem:[#allocation18 + $0x20] sm:$0xff]  }
 0x8c2   :  { %v1452_v11 = vadd.f32 %v3637_v26, %v1451_v29  ;;  %1459 = vadd.xlane.f32.xlu0 %v1455_v15  ;;  %v1465_v32 = vmul.f32 %v1455_v15, %v1455_v15  ;;  %1615 = vmatpush1.bf16.msra.mxu1 %v4235_v41  ;;  %v4257_v26 = vld [vmem:[#allocation18 + $0x68] sm:$0xff]   ;;  %v4262_v29 = vld [vmem:[#allocation18 + $0x18] sm:$0xff]  }
 0x8c3   :  { %v3998_v30 = vpop.f32.mrf.mxu0  ;;  %1616 = vmatprep.subr.bf16.mxu1 %v4240_v43  ;;  %3819 = vmatprep.subr.bf16.mxu0 %v4257_v26 }
 0x8c4   :  { %v1456_v31 = vadd.f32 %v1452_v11, %v5147_v6  ;;  %v4243_v6 = vld [vmem:[#allocation15 + $0x34] ss:$8 sps:$4 sm:$0xff]   ;;  %3820 = vmatpush3.bf16.msra.mxu0 %v4258_v33 }
 0x8c5   :  { %3821 = vmatprep.subr.bf16.mxu0 %v4259_v27  ;;  %v4263_v11 = vld [vmem:[#allocation18 + $0x50] sm:$0xff]  }
 0x8c6   :  { %1467 = vadd.xlane.f32.xlu0 %v1465_v32  ;;  %1461 = vadd.xlane.f32.xlu1 %v1456_v31  ;;  %v1466_v34 = vmul.f32 %v1456_v31, %v1456_v31  ;;  %v4264_v30 = vld [vmem:[#allocation18 + $0x10] sm:$0xff]   ;;  %v4266_v32 = vld [vmem:[#allocation18 + $0x8] sm:$0xff]  }
 0x8c7   :  { %1617 = vmatpush1.bf16.msra.mxu1 %v4238_v42 }
 0x8c8   :  { %1618 = vmatprep.subr.bf16.mxu1 %v4243_v6  ;;  %3822 = vmatpush3.bf16.msra.mxu0 %v4260_v28 }
 0x8ca   :  { %1469 = vadd.xlane.f32.xlu0 %v1466_v34  ;;  %v4267_v34 = vld [vmem:[#allocation18 + $0x40] sm:$0xff]  }
 0x8cb   :  { %1619 = vmatpush1.bf16.msra.mxu1 %v4241_v44 }
 0x8cc   :  { %1620 = vmatprep.subr.bf16.mxu1 %v4246_v45 }
 0x8cf   :  { %1621 = vmatpush1.bf16.msra.mxu1 %v4244_v46 }
 0x8d0   :  { %1622 = vmatprep.subr.bf16.mxu1 %v4249_v47 }
 0x8d3   :  { %1623 = vmatpush1.bf16.msra.mxu1 %v4247_v48 }
 0x8d4   :  { %1624 = vmatprep.subr.bf16.mxu1 %v4252_v49 }
 0x8d7   :  { %1625 = vmatpush1.bf16.msra.mxu1 %v4250_v50 }
 0x94b   :  { %v1460_v51 = vpop.xlane.xlu0 %1459 }
 0x94c   :  { %v1463_v52 = vmul.f32 0.0078125, %v1460_v51 }
 0x94e   :  { %v1473_v55 = vmul.f32 %v1463_v52, %v1463_v52  ;;  %v1477_v1 = vsub.f32 %v1455_v15, %v1463_v52  ;;  %v4261_v15 = vld [vmem:[#allocation18 + $0x58] sm:$0xff]  }
 0x94f   :  { %v1468_v53 = vpop.xlane.xlu0 %1467  ;;  %v1462_v54 = vpop.xlane.xlu1 %1461  ;;  %3823 = vmatprep.subr.bf16.mxu0 %v4261_v15 }
 0x950   :  { %v1471_v56 = vmul.f32 0.0078125, %v1468_v53  ;;  %v1464_v57 = vmul.f32 0.0078125, %v1462_v54  ;;  %3824 = vmatpush3.bf16.msra.mxu0 %v4262_v29 }
 0x951   :  { %3825 = vmatprep.subr.bf16.mxu0 %v4263_v11  ;;  %v3664_v11 = vld [vmem:[#allocation19] ss:$0 sm:$0xff] }
 0x952   :  { %v1475_v58 = vsub.f32 %v1471_v56, %v1473_v55  ;;  %v1474_v61 = vmul.f32 %v1464_v57, %v1464_v57  ;;  %v1478_v7 = vsub.f32 %v1456_v31, %v1464_v57  ;;  %v4265_v31 = vld [vmem:[#allocation18 + $0x48] sm:$0xff]  }
 0x953   :  { %v1470_v59 = vpop.xlane.xlu0 %1469 }
 0x954   :  { %v1479_v60 = vadd.f32 1e-05, %v1475_v58  ;;  %v1472_v62 = vmul.f32 0.0078125, %v1470_v59  ;;  %3826 = vmatpush3.bf16.msra.mxu0 %v4264_v30 }
 0x955   :  { %3827 = vmatprep.subr.bf16.mxu0 %v4265_v31 }
 0x956   :  { %4401 = vrsqrt.f32 %v1479_v60  ;;  %v1476_v63 = vsub.f32 %v1472_v62, %v1474_v61 }
 0x958   :  { %v1480_v0 = vadd.f32 1e-05, %v1476_v63  ;;  %3828 = vmatpush3.bf16.msra.mxu0 %v4266_v32 }
 0x959   :  { %3829 = vmatprep.subr.bf16.mxu0 %v4267_v34 }
 0x95a   :  { %4403 = vrsqrt.f32 %v1480_v0 }
 0x95c   :  { %3830 = vmatpush3.bf16.msra.mxu0 %v4268_v35 }
 0x95d   :  { %3999 = vmatprep.subr.bf16.mxu0 %v4826_v5 }
 0x963   :  { %v4402_v2 = vpop.eup %4401 }
 0x964   :  { %v1483_v3 = vmul.f32 %v4402_v2, %v1477_v1 }
 0x966   :  { %v1491_v13 = vmul.f32 %v3646_v39, %v1483_v3 }
 0x967   :  { %v4404_v10 = vpop.eup %4403 }
 0x968   :  { %v1484_v12 = vmul.f32 %v4404_v10, %v1478_v7  ;;  %v5263_v17 = vadd.f32 %v3647_v14, %v1491_v13 }
 0x96a   :  { %v1492_v16 = vmul.f32 %v3646_v39, %v1484_v12 }
 0x96c   :  { %v5265_v18 = vadd.f32 %v3647_v14, %v1492_v16 }
 0x96e   :  { %v1501_v19 = vpack.c.bf16 %v5265_v18, %v5263_v17 }
 0x970   :  { %1643 = vmatmul.mubr.bf16.vlgmr.msra.gmra.mxu1 %v1501_v19 }
 0x971   :  { %2125 = vmatprep.mubr.bf16.mxu1 %v4827_v37 }
 0xa30   :  { %v1644_v4 = vpop.f32.mrf.mxu1 }
 0xa31   :  { %v1645_v41 = vadd.f32 %v1644_v4, %v1523_v38 }
 0xa32   :  { %v1646_v42 = vpop.f32.mrf.mxu1 }
 0xa33   :  { %v1653_v43 = vmul.f32 %v1645_v41, %v1645_v41  ;;  %v1647_v6 = vadd.f32 %v1646_v42, %v1527_v40 }
 0xa34   :  { %v1648_v44 = vpop.f32.mrf.mxu1 }
 0xa35   :  { %v1657_v45 = vmul.f32 %v1653_v43, %v1645_v41  ;;  %v1654_v46 = vmul.f32 %v1647_v6, %v1647_v6  ;;  %v1649_v47 = vadd.f32 %v1648_v44, %v1523_v38  ;;  %v4271_v43 = vld [vmem:[#allocation9 + $0x16c] ss:$12 sps:$4 sm:$0xff]   ;;  %v4275_v44 = vld [vmem:[#allocation9 + $0x154] ss:$12 sps:$4 sm:$0xff]  }
 0xa36   :  { %v1650_v48 = vpop.f32.mrf.mxu1  ;;  %2093 = vmatprep.subr.bf16.mxu1 %v4271_v43 }
 0xa37   :  { %v1661_v49 = vmul.f32 0.044715, %v1657_v45  ;;  %v1658_v50 = vmul.f32 %v1654_v46, %v1647_v6  ;;  %v1655_v51 = vmul.f32 %v1649_v47, %v1649_v47  ;;  %v1651_v52 = vadd.f32 %v1650_v48, %v1527_v40  ;;  %v4276_v45 = vld [vmem:[#allocation9 + $0x158] ss:$12 sps:$4 sm:$0xff]   ;;  %v4279_v46 = vld [vmem:[#allocation9 + $0x13c] ss:$12 sps:$4 sm:$0xff]  }
 0xa38   :  { %v4280_v48 = vld [vmem:[#allocation9 + $0x140] ss:$12 sps:$4 sm:$0xff]  }
 0xa39   :  { %v1665_v53 = vadd.f32 %v1661_v49, %v1645_v41  ;;  %v1662_v54 = vmul.f32 0.044715, %v1658_v50  ;;  %v1659_v55 = vmul.f32 %v1655_v51, %v1649_v47  ;;  %v1656_v56 = vmul.f32 %v1651_v52, %v1651_v52  ;;  %v4281_v49 = vld [vmem:[#allocation9 + $0x120] ss:$12 sps:$4 sm:$0xff]   ;;  %v4283_v50 = vld [vmem:[#allocation9 + $0x124] ss:$12 sps:$4 sm:$0xff]  }
 0xa3a   :  { %v4284_v51 = vld [vmem:[#allocation9 + $0x128] ss:$12 sps:$4 sm:$0xff]  }
 0xa3b   :  { %v1669_v57 = vmul.f32 0.7978846, %v1665_v53  ;;  %v1666_v58 = vadd.f32 %v1662_v54, %v1647_v6  ;;  %v1663_v59 = vmul.f32 0.044715, %v1659_v55  ;;  %v1660_v60 = vmul.f32 %v1656_v56, %v1651_v52  ;;  %v4285_v53 = vld [vmem:[#allocation9 + $0x108] ss:$12 sps:$4 sm:$0xff]  }
 0xa3c   :  { %v4288_v54 = vld [vmem:[#allocation9 + $0x110] ss:$12 sps:$4 sm:$0xff]   ;;  %v4291_v55 = vld [vmem:[#allocation9 + $0xf4] ss:$12 sps:$4 sm:$0xff]  }
 0xa3d   :  { %v1670_v61 = vmul.f32 0.7978846, %v1666_v58  ;;  %v1667_v62 = vadd.f32 %v1663_v59, %v1649_v47  ;;  %v1664_v63 = vmul.f32 0.044715, %v1660_v60  ;;  %4405 = vtanh.f32 %v1669_v57  ;;  %v4289_v56 = vld [vmem:[#allocation9 + $0xf0] ss:$12 sps:$4 sm:$0xff]  }
 0xa3e   :  { %v4292_v57 = vld [vmem:[#allocation9 + $0xf8] ss:$12 sps:$4 sm:$0xff]   ;;  %v4295_v58 = vld [vmem:[#allocation9 + $0xdc] ss:$12 sps:$4 sm:$0xff]   ;;  %v4296_v60 = vld [vmem:[#allocation9 + $0xe0] ss:$12 sps:$4 sm:$0xff]  }
 0xa3f   :  { %4407 = vtanh.f32 %v1670_v61  ;;  %v1671_v0 = vmul.f32 0.7978846, %v1667_v62  ;;  %v1668_v1 = vadd.f32 %v1664_v63, %v1651_v52  ;;  %v4293_v59 = vld [vmem:[#allocation9 + $0xd8] ss:$12 sps:$4 sm:$0xff]   ;;  %v4297_v62 = vld [vmem:[#allocation9 + $0xc0] ss:$12 sps:$4 sm:$0xff]  }
 0xa40   :  { %v4299_v61 = vld [vmem:[#allocation9 + $0xc4] ss:$12 sps:$4 sm:$0xff]   ;;  %v4300_v63 = vld [vmem:[#allocation9 + $0xc8] ss:$12 sps:$4 sm:$0xff]  }
 0xa41   :  { %4409 = vtanh.f32 %v1671_v0  ;;  %v1672_v2 = vmul.f32 0.7978846, %v1668_v1 }
 0xa43   :  { %4411 = vtanh.f32 %v1672_v2 }
 0xa4a   :  { %v4406_v3 = vpop.eup %4405 }
 0xa4b   :  { %v1677_v12 = vadd.f32 1.0, %v4406_v3 }
 0xa4c   :  { %v4408_v39 = vpop.eup %4407 }
 0xa4d   :  { %v1678_v7 = vadd.f32 1.0, %v4408_v39  ;;  %v1681_v22 = vmul.f32 0.5, %v1677_v12 }
 0xa4e   :  { %v4410_v10 = vpop.eup %4409 }
 0xa4f   :  { %v1679_v13 = vadd.f32 1.0, %v4410_v10  ;;  %v1682_v21 = vmul.f32 0.5, %v1678_v7  ;;  %v1685_v27 = vmul.f32 %v1681_v22, %v1645_v41 }
 0xa50   :  { %v4412_v14 = vpop.eup %4411 }
 0xa51   :  { %v1683_v16 = vmul.f32 0.5, %v1679_v13  ;;  %v1680_v19 = vadd.f32 1.0, %v4412_v14  ;;  %v1686_v26 = vmul.f32 %v1682_v21, %v1647_v6  ;;  %v4269_v6 = vld [vmem:[#allocation9 + $0x168] ss:$12 sps:$4 sm:$0xff]  }
 0xa52   :  { %2094 = vmatpush1.bf16.msra.mxu1 %v4269_v6 }
 0xa53   :  { %v1684_v24 = vmul.f32 0.5, %v1680_v19  ;;  %v1687_v25 = vmul.f32 %v1683_v16, %v1649_v47  ;;  %2095 = vmatprep.subr.bf16.mxu1 %v4275_v44  ;;  %v4277_v47 = vld [vmem:[#allocation9 + $0x138] ss:$12 sps:$4 sm:$0xff]  }
 0xa55   :  { %v1688_v33 = vmul.f32 %v1684_v24, %v1651_v52  ;;  %v1689_v15 = vpack.c.bf16 %v1687_v25, %v1685_v27  ;;  %v4287_v52 = vld [vmem:[#allocation9 + $0x10c] ss:$12 sps:$4 sm:$0xff]  }
 0xa57   :  { %v1690_v28 = vpack.c.bf16 %v1688_v33, %v1686_v26  ;;  %v3681_v33 = vld [vmem:[%s5480_s16] ss:$0 sm:$0xff] }
 0xa59   :  { %1858 = vmatprep.mubr.bf16.mxu0 %v1690_v28 }
 0xa5a   :  { %1859 = vmatmul.mubr.bf16.vlgmr.msra.gmra.mxu0 %v1689_v15 }
 0xa5b   :  { %4015 = vmatprep.mubr.msk.bf16.mxu0 %vm4828_vm7, %v4826_v5 }
 0xb1a   :  { %v3831_v29 = vpop.f32.mrf.mxu0 }
 0xb1c   :  { %v3832_v30 = vpop.f32.mrf.mxu0 }
 0xb1d   :  { %v3833_v31 = vadd.f32 %v3832_v30, %v3831_v29 }
 0xb1e   :  { %v3834_v32 = vpop.f32.mrf.mxu0 }
 0xb1f   :  { %v1861_v34 = vadd.f32 %v3833_v31, %v3664_v11 }
 0xb20   :  { %v3835_v35 = vpop.f32.mrf.mxu0 }
 0xb21   :  { %v3836_v36 = vadd.f32 %v3835_v35, %v3834_v32  ;;  %v5276_v38 = vadd.f32 %v1861_v34, %v5263_v17  ;;  %v4272_v17 = vld [vmem:[#allocation9 + $0x170] ss:$12 sps:$4 sm:$0xff]  }
 0xb22   :  { %4000 = vmatpush3.bf16.msra.mxu0 %v4272_v17 }
 0xb23   :  { %v1864_v40 = vadd.f32 %v3836_v36, %v3664_v11  ;;  %1871 = vadd.xlane.f32.xlu0 %v5276_v38  ;;  %v1877_v41 = vmul.f32 %v5276_v38, %v5276_v38  ;;  %4001 = vmatprep.subr.bf16.mxu0 %v4826_v5  ;;  %v3682_v11 = vld [vmem:[%s5506_s24] ss:$0 sm:$0xff] }
 0xb25   :  { %v5280_v4 = vadd.f32 %v1864_v40, %v5265_v18  ;;  %v4273_v18 = vld [vmem:[#allocation9 + $0x150] ss:$12 sps:$4 sm:$0xff]  }
 0xb26   :  { %2096 = vmatpush1.bf16.msra.mxu1 %v4273_v18  ;;  %4002 = vmatpush3.bf16.msra.mxu0 %v4276_v45 }
 0xb27   :  { %1873 = vadd.xlane.f32.xlu1 %v5280_v4  ;;  %1879 = vadd.xlane.f32.xlu0 %v1877_v41  ;;  %v1878_v42 = vmul.f32 %v5280_v4, %v5280_v4 }
 0xb28   :  { %4003 = vmatprep.subr.bf16.mxu0 %v4826_v5  ;;  %2097 = vmatprep.subr.bf16.mxu1 %v4279_v46 }
 0xb2a   :  { %2098 = vmatpush1.bf16.msra.mxu1 %v4277_v47  ;;  %4004 = vmatpush3.bf16.msra.mxu0 %v4280_v48 }
 0xb2b   :  { %1881 = vadd.xlane.f32.xlu1 %v1878_v42  ;;  %4005 = vmatprep.subr.bf16.mxu0 %v4826_v5 }
 0xb2c   :  { %2099 = vmatprep.subr.bf16.mxu1 %v4283_v50 }
 0xb2e   :  { %2100 = vmatpush1.bf16.msra.mxu1 %v4281_v49  ;;  %4006 = vmatpush3.bf16.msra.mxu0 %v4284_v51 }
 0xb2f   :  { %2101 = vmatprep.subr.bf16.mxu1 %v4287_v52  ;;  %4007 = vmatprep.subr.bf16.mxu0 %v4826_v5 }
 0xb32   :  { %2102 = vmatpush1.bf16.msra.mxu1 %v4285_v53  ;;  %4008 = vmatpush3.bf16.msra.mxu0 %v4288_v54 }
 0xb33   :  { %2103 = vmatprep.subr.bf16.mxu1 %v4291_v55  ;;  %4009 = vmatprep.subr.bf16.mxu0 %v4826_v5 }
 0xb36   :  { %2104 = vmatpush1.bf16.msra.mxu1 %v4289_v56  ;;  %4010 = vmatpush3.bf16.msra.mxu0 %v4292_v57 }
 0xb37   :  { %2105 = vmatprep.subr.bf16.mxu1 %v4295_v58  ;;  %4011 = vmatprep.subr.bf16.mxu0 %v4826_v5 }
 0xb3a   :  { %2106 = vmatpush1.bf16.msra.mxu1 %v4293_v59  ;;  %4012 = vmatpush3.bf16.msra.mxu0 %v4296_v60 }
 0xb3b   :  { %2107 = vmatprep.subr.bf16.mxu1 %v4299_v61  ;;  %4013 = vmatprep.subr.bf16.mxu0 %v4826_v5 }
 0xb3e   :  { %2108 = vmatpush1.bf16.msra.mxu1 %v4297_v62  ;;  %4014 = vmatpush3.bf16.msra.mxu0 %v4300_v63 }
 0xb3f   :  { %4019 = vmatprep.subr.bf16.mxu1 %v4826_v5  ;;  %4043 = vmatprep.subr.bf16.mxu0 %v4826_v5 }
 0xbac   :  { %v1872_v0 = vpop.xlane.xlu0 %1871 }
 0xbad   :  { %v1875_v1 = vmul.f32 0.0078125, %v1872_v0 }
 0xbaf   :  { %v1885_v39 = vmul.f32 %v1875_v1, %v1875_v1  ;;  %v1889_v24 = vsub.f32 %v5276_v38, %v1875_v1  ;;  %v1948_v38 = vld [vmem:[#allocation10 + $0x3] sm:$0x7] }
 0xbb0   :  { %v1874_v2 = vpop.xlane.xlu1 %1873  ;;  %v1880_v3 = vpop.xlane.xlu0 %1879  ;;  %v1957_v41 = vrot.slane %v1948_v38, %v5158_v9  ;;  %v1953_v46 = vrot.slane %v1948_v38, %v5162_v20  ;;  %v1961_v48 = vrot.slane %v1948_v38, %v600_v23 }
 0xbb1   :  { %v1876_v7 = vmul.f32 0.0078125, %v1874_v2  ;;  %v1883_v10 = vmul.f32 0.0078125, %v1880_v3 }
 0xbb3   :  { %v1887_v12 = vsub.f32 %v1883_v10, %v1885_v39  ;;  %v1886_v14 = vmul.f32 %v1876_v7, %v1876_v7  ;;  %v1890_v27 = vsub.f32 %v5280_v4, %v1876_v7 }
 0xbb4   :  { %v1882_v13 = vpop.xlane.xlu1 %1881 }
 0xbb5   :  { %v1891_v16 = vadd.f32 1e-05, %v1887_v12  ;;  %v1884_v19 = vmul.f32 0.0078125, %v1882_v13 }
 0xbb7   :  { %4413 = vrsqrt.f32 %v1891_v16  ;;  %v1888_v21 = vsub.f32 %v1884_v19, %v1886_v14 }
 0xbb9   :  { %v1892_v22 = vadd.f32 1e-05, %v1888_v21 }
 0xbbb   :  { %4415 = vrsqrt.f32 %v1892_v22 }
 0xbc4   :  { %v4414_v25 = vpop.eup %4413 }
 0xbc5   :  { %v1895_v26 = vmul.f32 %v4414_v25, %v1889_v24 }
 0xbc7   :  { %v1903_v29 = vmul.f32 %v3681_v33, %v1895_v26 }
 0xbc8   :  { %v4416_v28 = vpop.eup %4415 }
 0xbc9   :  { %v1896_v15 = vmul.f32 %v4416_v28, %v1890_v27  ;;  %v5304_v31 = vadd.f32 %v3682_v11, %v1903_v29 }
 0xbcb   :  { %v1904_v30 = vmul.f32 %v3681_v33, %v1896_v15 }
 0xbcd   :  { %v5306_v32 = vadd.f32 %v3682_v11, %v1904_v30 }
 0xbcf   :  { %v1913_v34 = vpack.c.bf16 %v5306_v32, %v5304_v31 }
 0xbd1   :  { %2126 = vmatmul.mubr.bf16.vlgmr.msra.gmra.mxu1 %v1913_v34  ;;  %4016 = vmatmul.mubr.bf16.vlgmr.msra.gmra.mxu0 %v1913_v34 }
 0xbd2   :  { %4021 = vmatprep.mubr.msk.bf16.mxu1 %vm4828_vm7, %v4826_v5  ;;  %4045 = vmatprep.mubr.msk.bf16.mxu0 %vm4828_vm7, %v4826_v5 }
 0xc91   :  { %v2127_v35 = vpop.f32.mrf.mxu1  ;;  %v2170_v36 = vpop.f32.mrf.mxu0 }
 0xc92   :  { %v2128_v51 = vadd.f32 %v2127_v35, %v1953_v46  ;;  %v2171_v52 = vadd.f32 %v2170_v36, %v1961_v48 }
 0xc93   :  { %v2129_v40 = vpop.f32.mrf.mxu1  ;;  %v4017_v4 = vpop.f32.mrf.mxu0 }
 0xc94   :  { %v2130_v44 = vadd.f32 %v2129_v40, %v1957_v41 }
 0xc95   :  { %v2131_v42 = vpop.f32.mrf.mxu1  ;;  %v2173_v43 = vpop.f32.mrf.mxu0 }
 0xc96   :  { %v2132_v49 = vadd.f32 %v2131_v42, %v1953_v46  ;;  %v2174_v50 = vadd.f32 %v2173_v43, %v1961_v48 }
 0xc97   :  { %v2133_v6 = vpop.f32.mrf.mxu1  ;;  %v4018_v17 = vpop.f32.mrf.mxu0 }
 0xc98   :  { %v2134_v18 = vadd.f32 %v2133_v6, %v1957_v41  ;;  %v2177_v53 = vpack.c.bf16 %v2132_v49, %v2128_v51  ;;  %v5320_v54 = vpack.c.bf16 %v2174_v50, %v2171_v52 }
 0xc9a   :  { %v2178_v45 = vpack.c.bf16 %v2134_v18, %v2130_v44 }
 0xc9c   :  { %v2184_v47 = vsel %vm820_vm8, %v2178_v45, 0 }
 0xc9d   :  { %4020 = vmatpush3.bf16.xpose.msra.mxu1 %v2184_v47 }
 0xc9e   :  { %4025 = vmatprep.subr.bf16.mxu1 %v4826_v5 }
 0xca4   :  { %4022 = vmatmul.mubr.msk.bf16.vlgmr.msra.gmra.mxu1 %vm820_vm8, %v2177_v53 }
 0xca5   :  { %4026 = vmatpush3.bf16.msra.mxu1 %v5320_v54  ;;  %4027 = vmatprep.mubr.msk.bf16.mxu1 %vm4828_vm7, %v4826_v5 }
 0xca6   :  { %4031 = vmatprep.subr.bf16.mxu1 %v4826_v5 }
 0xd64   :  { %v2220_v8 = vpop.f32.mrf.mxu1 }
 0xd65   :  { %v2227_v23 = vmul.f32 0.17677669, %v2220_v8 }
 0xd66   :  { %v4023_v55 = vpop.f32.mrf.mxu1 }
 0xd67   :  { %v2229_v56 = vsel %vm870_vm9, %v2227_v23, -inf }
 0xd68   :  { %2230 = vmax.xlane.f32.xlu0 %v2229_v56  ;;  %v2223_v57 = vpop.f32.mrf.mxu1 }
 0xd69   :  { %v2228_v58 = vmul.f32 0.17677669, %v2223_v57 }
 0xd6a   :  { %v4024_v59 = vpop.f32.mrf.mxu1 }
 0xd6b   :  { %v2232_v60 = vsel %vm870_vm9, %v2228_v58, -inf }
 0xd6c   :  { %2233 = vmax.xlane.f32.xlu1 %v2232_v60 }
 0xdf1   :  { %v2231_v61 = vpop.xlane.xlu0 %2230 }
 0xdf2   :  { %v2235_v62 = vsub.f32 %v2227_v23, %v2231_v61 }
 0xdf4   :  { %v2237_v63 = vmul.f32 1.442695, %v2235_v62 }
 0xdf5   :  { %v2234_v0 = vpop.xlane.xlu1 %2233 }
 0xdf6   :  { %4417 = vpow2.f32 %v2237_v63  ;;  %v2236_v1 = vsub.f32 %v2228_v58, %v2234_v0 }
 0xdf8   :  { %v2239_v2 = vmul.f32 1.442695, %v2236_v1 }
 0xdfa   :  { %4419 = vpow2.f32 %v2239_v2 }
 0xe03   :  { %v4418_v3 = vpop.eup %4417 }
 0xe04   :  { %v2241_v39 = vsel %vm870_vm9, %v4418_v3, 0.0 }
 0xe05   :  { %2242 = vadd.xlane.f32.xlu0 %v2241_v39 }
 0xe07   :  { %v4420_v7 = vpop.eup %4419 }
 0xe08   :  { %v2244_v10 = vsel %vm870_vm9, %v4420_v7, 0.0 }
 0xe09   :  { %2245 = vadd.xlane.f32.xlu1 %v2244_v10 }
 0xe1a   :  { %2297 = vrot.lane.b32.xlu1 %v2177_v53, %s4829_s27 }
 0xe1b   :  { %2300 = vrot.lane.b32.xlu0 %v2178_v45, %s4829_s27 }
 0xe1e   :  { %2424 = vrot.lane.b32.xlu1 %v2178_v45, %s4819_s25 }
 0xe1f   :  { %2547 = vrot.lane.b32.xlu0 %v2178_v45, %s4810_s30 }
 0xe22   :  { %2422 = vrot.lane.b32.xlu1 %v2177_v53, %s4819_s25 }
 0xe26   :  { %2545 = vrot.lane.b32.xlu1 %v2177_v53, %s4810_s30 }
 0xe8e   :  { %v2243_v12 = vpop.xlane.xlu0 %2242 }
 0xe8f   :  { %4421 = vrcp.f32 %v2243_v12 }
 0xe92   :  { %v2246_v13 = vpop.xlane.xlu1 %2245  ;;  %v2301_v16 = vpop.permute.xlu0 %2300 }
 0xe93   :  { %4423 = vrcp.f32 %v2246_v13  ;;  %v2306_v29 = vsel %vm820_vm8, %v2301_v16, 0 }
 0xe96   :  { %v2298_v14 = vpop.permute.xlu1 %2297  ;;  %v2548_v25 = vpop.permute.xlu0 %2547 }
 0xe97   :  { %v2553_v28 = vsel %vm820_vm8, %v2548_v25, 0 }
 0xe9a   :  { %v2425_v19 = vpop.permute.xlu1 %2424 }
 0xe9b   :  { %v2430_v21 = vsel %vm820_vm8, %v2425_v19, 0 }
 0xe9c   :  { %4044 = vmatpush3.bf16.xpose.msra.mxu0 %v2430_v21  ;;  %v4422_v22 = vpop.eup %4421 }
 0xe9d   :  { %4055 = vmatprep.subr.bf16.mxu0 %v4826_v5  ;;  %v2249_v26 = vmul.f32 %v4422_v22, %v4418_v3 }
 0xe9e   :  { %v2423_v27 = vpop.permute.xlu1 %2422 }
 0xea0   :  { %v4424_v24 = vpop.eup %4423 }
 0xea1   :  { %v2250_v33 = vmul.f32 %v4424_v24, %v4420_v7 }
 0xea2   :  { %v2546_v11 = vpop.permute.xlu1 %2545 }
 0xea3   :  { %4046 = vmatmul.mubr.msk.bf16.vlgmr.msra.gmra.mxu0 %vm820_vm8, %v2423_v27  ;;  %v2251_v15 = vpack.c.bf16 %v2250_v33, %v2249_v26 }
 0xea4   :  { %4056 = vmatpush3.bf16.xpose.msra.mxu0 %v2553_v28  ;;  %4057 = vmatprep.mubr.msk.bf16.mxu0 %vm4828_vm7, %v4826_v5 }
 0xea5   :  { %4028 = vmatmul.mubr.msk.bf16.vlgmr.msra.gmra.mxu1 %vm870_vm9, %v2251_v15  ;;  %4067 = vmatprep.subr.bf16.mxu0 %v4826_v5 }
 0xea6   :  { %4032 = vmatpush3.bf16.xpose.msra.mxu1 %v2306_v29  ;;  %4033 = vmatprep.mubr.msk.bf16.mxu1 %vm4828_vm7, %v4826_v5 }
 0xea7   :  { %4037 = vmatprep.subr.bf16.mxu1 %v4826_v5 }
 0xeab   :  { %4058 = vmatmul.mubr.msk.bf16.vlgmr.msra.gmra.mxu0 %vm820_vm8, %v2546_v11 }
 0xeac   :  { %4083 = vmatprep.mubr.msk.bf16.mxu0 %vm4828_vm7, %v4826_v5 }
 0xead   :  { %4034 = vmatmul.mubr.msk.bf16.vlgmr.msra.gmra.mxu1 %vm820_vm8, %v2298_v14 }
 0xeae   :  { %4039 = vmatprep.mubr.msk.bf16.mxu1 %vm4828_vm7, %v4826_v5 }
 0xf63   :  { %v2466_v30 = vpop.f32.mrf.mxu0 }
 0xf64   :  { %v2473_v45 = vmul.f32 0.17677669, %v2466_v30 }
 0xf65   :  { %v5355_v34 = vpop.f32.mrf.mxu1  ;;  %v4047_v35 = vpop.f32.mrf.mxu0 }
 0xf66   :  { %v2475_v53 = vsel %vm870_vm9, %v2473_v45, -inf }
 0xf67   :  { %v4029_v36 = vpop.f32.mrf.mxu1  ;;  %v2469_v38 = vpop.f32.mrf.mxu0 }
 0xf68   :  { %v2474_v51 = vmul.f32 0.17677669, %v2469_v38 }
 0xf69   :  { %v5357_v40 = vpop.f32.mrf.mxu1  ;;  %v4048_v4 = vpop.f32.mrf.mxu0 }
 0xf6a   :  { %v2478_v55 = vsel %vm870_vm9, %v2474_v51, -inf }
 0xf6b   :  { %v4030_v41 = vpop.f32.mrf.mxu1  ;;  %v2589_v42 = vpop.f32.mrf.mxu0 }
 0xf6c   :  { %v2596_v23 = vmul.f32 0.17677669, %v2589_v42 }
 0xf6d   :  { %v2342_v43 = vpop.f32.mrf.mxu1  ;;  %v4059_v6 = vpop.f32.mrf.mxu0 }
 0xf6e   :  { %v2349_v17 = vmul.f32 0.17677669, %v2342_v43  ;;  %v2598_v57 = vsel %vm870_vm9, %v2596_v23, -inf }
 0xf6f   :  { %v4035_v44 = vpop.f32.mrf.mxu1  ;;  %v2592_v18 = vpop.f32.mrf.mxu0 }
 0xf70   :  { %v2351_v46 = vsel %vm870_vm9, %v2349_v17, -inf  ;;  %v2597_v52 = vmul.f32 0.17677669, %v2592_v18 }
 0xf71   :  { %v4060_v47 = vpop.f32.mrf.mxu0  ;;  %2352 = vmax.xlane.f32.xlu0 %v2351_v46  ;;  %v2345_v48 = vpop.f32.mrf.mxu1 }
 0xf72   :  { %v2350_v49 = vmul.f32 0.17677669, %v2345_v48  ;;  %v2601_v56 = vsel %vm870_vm9, %v2597_v52, -inf }
 0xf73   :  { %v4036_v50 = vpop.f32.mrf.mxu1 }
 0xf74   :  { %v2354_v8 = vsel %vm870_vm9, %v2350_v49, -inf }
 0xf75   :  { %2476 = vmax.xlane.f32.xlu0 %v2475_v53  ;;  %2355 = vmax.xlane.f32.xlu1 %v2354_v8 }
 0xf79   :  { %2479 = vmax.xlane.f32.xlu0 %v2478_v55  ;;  %2602 = vmax.xlane.f32.xlu1 %v2601_v56  ;;  %v4301_v56 = vld [vmem:[#allocation12 + $0x78] sm:$0xff]  }
 0xf7a   :  { %4068 = vmatpush3.bf16.msra.mxu0 %v4301_v56  ;;  %v4324_v56 = vld [vmem:[#allocation15 + $0xa0] ss:$8 sps:$4 sm:$0xff]  }
 0xf7b   :  { %4069 = vmatprep.subr.bf16.mxu0 %v4826_v5 }
 0xf7d   :  { %2599 = vmax.xlane.f32.xlu0 %v2598_v57  ;;  %v4302_v57 = vld [vmem:[#allocation12 + $0x70] sm:$0xff]  }
 0xf7e   :  { %4070 = vmatpush3.bf16.msra.mxu0 %v4302_v57  ;;  %v4329_v57 = vld [vmem:[#allocation15 + $0x94] ss:$8 sps:$4 sm:$0xff]  }
 0xf7f   :  { %4071 = vmatprep.subr.bf16.mxu0 %v4826_v5 }
 0xffa   :  { %v2353_v58 = vpop.xlane.xlu0 %2352 }
 0xffb   :  { %v2357_v3 = vsub.f32 %v2349_v17, %v2353_v58  ;;  %v4303_v58 = vld [vmem:[#allocation12 + $0x68] sm:$0xff]  }
 0xffc   :  { %4072 = vmatpush3.bf16.msra.mxu0 %v4303_v58  ;;  %v4327_v58 = vld [vmem:[#allocation15 + $0x90] ss:$8 sps:$4 sm:$0xff]  }
 0xffd   :  { %v2359_v14 = vmul.f32 1.442695, %v2357_v3  ;;  %4073 = vmatprep.subr.bf16.mxu0 %v4826_v5 }
 0xffe   :  { %v2477_v59 = vpop.xlane.xlu0 %2476  ;;  %v2356_v60 = vpop.xlane.xlu1 %2355 }
 0xfff   :  { %v2481_v61 = vsub.f32 %v2473_v45, %v2477_v59  ;;  %v2358_v39 = vsub.f32 %v2350_v49, %v2356_v60  ;;  %v4304_v59 = vld [vmem:[#allocation12 + $0x60] sm:$0xff]   ;;  %v4305_v60 = vld [vmem:[#allocation12 + $0x58] sm:$0xff]  }
0x1000   :  { %4074 = vmatpush3.bf16.msra.mxu0 %v4304_v59  ;;  %v4332_v59 = vld [vmem:[#allocation15 + $0x84] ss:$8 sps:$4 sm:$0xff]  }
0x1001   :  { %v2483_v62 = vmul.f32 1.442695, %v2481_v61  ;;  %v2361_v16 = vmul.f32 1.442695, %v2358_v39  ;;  %4075 = vmatprep.subr.bf16.mxu0 %v4826_v5 }
0x1002   :  { %v2480_v63 = vpop.xlane.xlu0 %2479  ;;  %v2603_v0 = vpop.xlane.xlu1 %2602 }
0x1003   :  { %4425 = vpow2.f32 %v2483_v62  ;;  %v2482_v1 = vsub.f32 %v2474_v51, %v2480_v63  ;;  %v2605_v2 = vsub.f32 %v2597_v52, %v2603_v0  ;;  %v4306_v62 = vld [vmem:[#allocation12 + $0x50] sm:$0xff]  }
0x1004   :  { %4076 = vmatpush3.bf16.msra.mxu0 %v4305_v60  ;;  %v4330_v60 = vld [vmem:[#allocation15 + $0x80] ss:$8 sps:$4 sm:$0xff]  }
0x1005   :  { %v2485_v7 = vmul.f32 1.442695, %v2482_v1  ;;  %v2608_v10 = vmul.f32 1.442695, %v2605_v2  ;;  %4077 = vmatprep.subr.bf16.mxu0 %v4826_v5  ;;  %v4307_v1 = vld [vmem:[#allocation12 + $0x48] sm:$0xff]  }
0x1006   :  { %v2600_v12 = vpop.xlane.xlu0 %2599 }
0x1007   :  { %4427 = vpow2.f32 %v2485_v7  ;;  %v2604_v13 = vsub.f32 %v2596_v23, %v2600_v12  ;;  %v4308_v7 = vld [vmem:[#allocation12 + $0x40] sm:$0xff]  }
0x1008   :  { %4429 = vpow2.f32 %v2608_v10  ;;  %4078 = vmatpush3.bf16.msra.mxu0 %v4306_v62 }
0x1009   :  { %v2606_v19 = vmul.f32 1.442695, %v2604_v13  ;;  %4079 = vmatprep.subr.bf16.mxu0 %v4826_v5 }
0x100b   :  { %4431 = vpow2.f32 %v2606_v19 }
0x100c   :  { %4433 = vpow2.f32 %v2359_v14  ;;  %4080 = vmatpush3.bf16.msra.mxu0 %v4307_v1 }
0x100d   :  { %4435 = vpow2.f32 %v2361_v16  ;;  %4081 = vmatprep.subr.bf16.mxu0 %v4826_v5 }
0x1010   :  { %v4426_v21 = vpop.eup %4425  ;;  %4082 = vmatpush3.bf16.msra.mxu0 %v4308_v7 }
0x1011   :  { %v2487_v22 = vsel %vm870_vm9, %v4426_v21, 0.0 }
0x1012   :  { %2488 = vadd.xlane.f32.xlu0 %v2487_v22 }
0x1014   :  { %v4428_v24 = vpop.eup %4427 }
0x1015   :  { %v2490_v25 = vsel %vm870_vm9, %v4428_v24, 0.0  ;;  %v4430_v26 = vpop.eup %4429 }
0x1016   :  { %2491 = vadd.xlane.f32.xlu1 %v2490_v25  ;;  %v2613_v15 = vsel %vm870_vm9, %v4430_v26, 0.0 }
0x1018   :  { %v4432_v33 = vpop.eup %4431 }
0x1019   :  { %v4434_v27 = vpop.eup %4433  ;;  %v2610_v28 = vsel %vm870_vm9, %v4432_v33, 0.0 }
0x101a   :  { %v4436_v29 = vpop.eup %4435  ;;  %2611 = vadd.xlane.f32.xlu0 %v2610_v28  ;;  %2614 = vadd.xlane.f32.xlu1 %v2613_v15  ;;  %v2363_v11 = vsel %vm870_vm9, %v4434_v27, 0.0 }
0x101b   :  { %v2366_v30 = vsel %vm870_vm9, %v4436_v29, 0.0 }
0x101e   :  { %2364 = vadd.xlane.f32.xlu0 %v2363_v11  ;;  %2367 = vadd.xlane.f32.xlu1 %v2366_v30 }
0x102f   :  { %2498 = vrot.lane.b32.xlu1 %v5320_v54, %s4819_s25 }
0x1033   :  { %2621 = vrot.lane.b32.xlu1 %v5320_v54, %s4810_s30 }
0x1034   :  { %2375 = vrot.lane.b32.xlu0 %v5320_v54, %s4829_s27 }
0x109b   :  { %v2489_v35 = vpop.xlane.xlu0 %2488 }
0x109f   :  { %v2492_v36 = vpop.xlane.xlu1 %2491 }
0x10a3   :  { %v2612_v38 = vpop.xlane.xlu0 %2611  ;;  %v2615_v4 = vpop.xlane.xlu1 %2614 }
0x10a7   :  { %v2365_v41 = vpop.xlane.xlu0 %2364  ;;  %v2368_v42 = vpop.xlane.xlu1 %2367 }
0x10a8   :  { %4437 = vrcp.f32 %v2365_v41 }
0x10a9   :  { %4439 = vrcp.f32 %v2368_v42 }
0x10aa   :  { %4441 = vrcp.f32 %v2492_v36 }
0x10ab   :  { %v2376_v43 = vpop.permute.xlu0 %2375  ;;  %4443 = vrcp.f32 %v2489_v35  ;;  %v2499_v46 = vpop.permute.xlu1 %2498 }
0x10ac   :  { %4038 = vmatpush3.bf16.msra.mxu1 %v2376_v43  ;;  %4445 = vrcp.f32 %v2612_v38  ;;  %v3715_v43 = vld [vmem:[#allocation13 + $0x1] ss:$0 sm:$0xff] }
0x10ad   :  { %4049 = vmatprep.subr.bf16.mxu1 %v4826_v5  ;;  %4447 = vrcp.f32 %v2615_v4 }
0x10af   :  { %v2622_v53 = vpop.permute.xlu1 %2621 }
0x10b5   :  { %v4438_v6 = vpop.eup %4437 }
0x10b6   :  { %v4440_v17 = vpop.eup %4439  ;;  %v2371_v44 = vmul.f32 %v4438_v6, %v4434_v27 }
0x10b7   :  { %v2372_v54 = vmul.f32 %v4440_v17, %v4436_v29  ;;  %v4442_v45 = vpop.eup %4441 }
0x10b8   :  { %v4444_v47 = vpop.eup %4443  ;;  %v2496_v48 = vmul.f32 %v4442_v45, %v4428_v24 }
0x10b9   :  { %v2373_v18 = vpack.c.bf16 %v2372_v54, %v2371_v44  ;;  %v2495_v49 = vmul.f32 %v4444_v47, %v4426_v21  ;;  %v4446_v50 = vpop.eup %4445 }
0x10ba   :  { %v4448_v52 = vpop.eup %4447  ;;  %v2618_v8 = vmul.f32 %v4446_v50, %v4432_v33  ;;  %v4312_v50 = vld [vmem:[#allocation15 + $0xe0] ss:$8 sps:$4 sm:$0xff]  }
0x10bb   :  { %4040 = vmatmul.mubr.msk.bf16.vlgmr.msra.gmra.mxu1 %vm870_vm9, %v2373_v18  ;;  %v2497_v51 = vpack.c.bf16 %v2496_v48, %v2495_v49  ;;  %v2619_v23 = vmul.f32 %v4448_v52, %v4430_v26  ;;  %v4311_v48 = vld [vmem:[#allocation15 + $0xf4] ss:$8 sps:$4 sm:$0xff]   ;;  %v4309_v49 = vld [vmem:[#allocation15 + $0xf0] ss:$8 sps:$4 sm:$0xff]  }
0x10bc   :  { %4050 = vmatpush3.bf16.msra.mxu1 %v2499_v46  ;;  %4051 = vmatprep.mubr.msk.bf16.mxu1 %vm4828_vm7, %v4826_v5  ;;  %v4315_v52 = vld [vmem:[#allocation15 + $0xd0] ss:$8 sps:$4 sm:$0xff]  }
0x10bd   :  { %4061 = vmatprep.subr.bf16.mxu1 %v4826_v5  ;;  %v2620_v55 = vpack.c.bf16 %v2619_v23, %v2618_v8  ;;  %v4323_v8 = vld [vmem:[#allocation15 + $0xb4] ss:$8 sps:$4 sm:$0xff]   ;;  %v4321_v23 = vld [vmem:[#allocation15 + $0xb0] ss:$8 sps:$4 sm:$0xff]  }
0x10c3   :  { %4052 = vmatmul.mubr.msk.bf16.vlgmr.msra.gmra.mxu1 %vm870_vm9, %v2497_v51  ;;  %v4317_v51 = vld [vmem:[#allocation15 + $0xd4] ss:$8 sps:$4 sm:$0xff]  }
0x10c4   :  { %4062 = vmatpush3.bf16.msra.mxu1 %v2622_v53  ;;  %4063 = vmatprep.mubr.msk.bf16.mxu1 %vm4828_vm7, %v4826_v5  ;;  %v4320_v53 = vld [vmem:[#allocation15 + $0xc4] ss:$8 sps:$4 sm:$0xff]  }
0x10c5   :  { %2972 = vmatprep.subr.bf16.mxu1 %v4311_v48 }
0x10cb   :  { %4064 = vmatmul.mubr.msk.bf16.vlgmr.msra.gmra.mxu1 %vm870_vm9, %v2620_v55  ;;  %v4326_v55 = vld [vmem:[#allocation15 + $0xa4] ss:$8 sps:$4 sm:$0xff]  }
0x10cc   :  { %3004 = vmatprep.mubr.bf16.mxu1 %v4827_v37  ;;  %2973 = vmatpush1.bf16.msra.mxu1 %v4309_v49 }
0x117b   :  { %v2415_v61 = vpop.f32.mrf.mxu1 }
0x117d   :  { %v4041_v37 = vpop.f32.mrf.mxu1 }
0x117f   :  { %v2418_v63 = vpop.f32.mrf.mxu1 }
0x1180   :  { %v4174_v0 = vpack.i.bf16 %v2418_v63, %v2415_v61 }
0x1181   :  { %v4042_v2 = vpop.f32.mrf.mxu1 }
0x1182   :  { %4175 = vrot.lane.b32.xlu1 %v4174_v0, %s4810_s30 }
0x1183   :  { %v2538_v3 = vpop.f32.mrf.mxu1 }
0x1185   :  { %v4053_v39 = vpop.f32.mrf.mxu1 }
0x1187   :  { %v2541_v10 = vpop.f32.mrf.mxu1 }
0x1188   :  { %v4179_v12 = vpack.i.bf16 %v2541_v10, %v2538_v3 }
0x1189   :  { %v4054_v13 = vpop.f32.mrf.mxu1 }
0x118a   :  { %4180 = vrot.lane.b32.xlu0 %v4179_v12, %s4819_s25 }
0x118b   :  { %v2661_v14 = vpop.f32.mrf.mxu1 }
0x118d   :  { %v4065_v16 = vpop.f32.mrf.mxu1 }
0x118f   :  { %v2664_v19 = vpop.f32.mrf.mxu1 }
0x1190   :  { %v4184_v21 = vpack.i.bf16 %v2664_v19, %v2661_v14 }
0x1191   :  { %v4066_v22 = vpop.f32.mrf.mxu1 }
0x1192   :  { %4185 = vrot.lane.b32.xlu1 %v4184_v21, %s4829_s27  ;;  %v3726_v22 = vld [vmem:[%s5474_s10 + $0x1] ss:$0 sm:$0xff] }
0x11f4   :  { %v4176_v24 = vpop.permute.xlu1 %4175 }
0x11f5   :  { %v4178_v26 = vunpack.i.h.bf16 %v4176_v24  ;;  %v4177_v33 = vunpack.i.l.bf16 %v4176_v24 }
0x11f7   :  { %v2693_v29 = vsel %vm820_vm8, %v5357_v40, %v4178_v26  ;;  %v2692_v11 = vsel %vm820_vm8, %v5355_v34, %v4177_v33 }
0x11fc   :  { %v4181_v25 = vpop.permute.xlu0 %4180 }
0x11fd   :  { %v4183_v27 = vunpack.i.h.bf16 %v4181_v25  ;;  %v4182_v28 = vunpack.i.l.bf16 %v4181_v25 }
0x11ff   :  { %v2695_v36 = vsel %vm1336_vm10, %v2693_v29, %v4183_v27  ;;  %v2694_v38 = vsel %vm1336_vm10, %v2692_v11, %v4182_v28  ;;  %v3727_v27 = vld [vmem:[%s5475_s11 + $0x1] ss:$0 sm:$0xff] }
0x1204   :  { %v4186_v15 = vpop.permute.xlu1 %4185 }
0x1205   :  { %v4188_v30 = vunpack.i.h.bf16 %v4186_v15  ;;  %v4187_v35 = vunpack.i.l.bf16 %v4186_v15 }
0x1207   :  { %v2697_v4 = vsel %vm1339_vm11, %v2695_v36, %v4188_v30  ;;  %v2696_v41 = vsel %vm1339_vm11, %v2694_v38, %v4187_v35  ;;  %v4333_v30 = vld [vmem:[#allocation18 + $0xf8] sm:$0xff]   ;;  %v4335_v36 = vld [vmem:[#allocation18 + $0xf0] sm:$0xff]  }
0x1208   :  { %v2698_v42 = vpack.c.bf16 %v2697_v4, %v2696_v41  ;;  %v4334_v35 = vld [vmem:[#allocation18 + $0xb8] sm:$0xff]   ;;  %3871 = vmatprep.subr.bf16.mxu0 %v4333_v30  ;;  %v4336_v38 = vld [vmem:[#allocation18 + $0xb0] sm:$0xff]   ;;  %v4337_v4 = vld [vmem:[#allocation18 + $0xe8] sm:$0xff]  }
0x1209   :  { %v4338_v41 = vld [vmem:[#allocation18 + $0xa8] sm:$0xff]  }
0x120a   :  { %4084 = vmatmul.mubr.bf16.vlgmr.msra.gmra.mxu0 %v2698_v42  ;;  %v4339_v42 = vld [vmem:[#allocation18 + $0xe0] sm:$0xff]  }
0x120b   :  { %3872 = vmatpush3.bf16.msra.mxu0 %v4334_v35 }
0x120c   :  { %3873 = vmatprep.subr.bf16.mxu0 %v4335_v36 }
0x120f   :  { %3874 = vmatpush3.bf16.msra.mxu0 %v4336_v38 }
0x1210   :  { %3875 = vmatprep.subr.bf16.mxu0 %v4337_v4  ;;  %v4349_v4 = vld [vmem:[#allocation21 + $0x38] sm:$0xff]  }
0x1213   :  { %3876 = vmatpush3.bf16.msra.mxu0 %v4338_v41 }
0x1214   :  { %3877 = vmatprep.subr.bf16.mxu0 %v4339_v42  ;;  %v3744_v42 = vld [vmem:[#allocation19 + $0x1] ss:$0 sm:$0xff] }
0x12ca   :  { %v2806_v6 = vpop.f32.mrf.mxu0 }
0x12cb   :  { %v2807_v17 = vadd.f32 %v3715_v43, %v2806_v6  ;;  %v4341_v6 = vld [vmem:[#allocation18 + $0xd8] sm:$0xff]  }
0x12cc   :  { %v4085_v44 = vpop.f32.mrf.mxu0 }
0x12cd   :  { %v5406_v40 = vadd.f32 %v2807_v17, %v5304_v31  ;;  %v4314_v31 = vld [vmem:[#allocation15 + $0xe4] ss:$8 sps:$4 sm:$0xff]   ;;  %v4342_v17 = vld [vmem:[#allocation18 + $0x98] sm:$0xff]   ;;  %v4343_v44 = vld [vmem:[#allocation18 + $0xd0] sm:$0xff]  }
0x12ce   :  { %v2809_v34 = vpop.f32.mrf.mxu0  ;;  %2974 = vmatprep.subr.bf16.mxu1 %v4314_v31 }
0x12cf   :  { %v2810_v54 = vadd.f32 %v3715_v43, %v2809_v34  ;;  %2819 = vadd.xlane.f32.xlu0 %v5406_v40  ;;  %v2825_v46 = vmul.f32 %v5406_v40, %v5406_v40  ;;  %2975 = vmatpush1.bf16.msra.mxu1 %v4312_v50  ;;  %v4340_v43 = vld [vmem:[#allocation18 + $0xa0] sm:$0xff]   ;;  %v4345_v34 = vld [vmem:[#allocation18 + $0xc8] sm:$0xff]  }
0x12d0   :  { %v4086_v18 = vpop.f32.mrf.mxu0  ;;  %2976 = vmatprep.subr.bf16.mxu1 %v4317_v51  ;;  %3878 = vmatpush3.bf16.msra.mxu0 %v4340_v43 }
0x12d1   :  { %v2814_v45 = vadd.f32 %v2810_v54, %v5306_v32  ;;  %v4318_v32 = vld [vmem:[#allocation15 + $0xc0] ss:$8 sps:$4 sm:$0xff]   ;;  %3879 = vmatprep.subr.bf16.mxu0 %v4341_v6  ;;  %v4346_v54 = vld [vmem:[#allocation18 + $0x88] sm:$0xff]  }
0x12d2   :  { %v4347_v18 = vld [vmem:[#allocation18 + $0xc0] sm:$0xff]  }
0x12d3   :  { %2827 = vadd.xlane.f32.xlu0 %v2825_v46  ;;  %2821 = vadd.xlane.f32.xlu1 %v2814_v45  ;;  %v2826_v47 = vmul.f32 %v2814_v45, %v2814_v45  ;;  %v2880_v46 = vld [vmem:[#allocation16 + $0x2] sm:$0x3] }
0x12d4   :  { %2977 = vmatpush1.bf16.msra.mxu1 %v4315_v52  ;;  %3880 = vmatpush3.bf16.msra.mxu0 %v4342_v17  ;;  %v2889_v48 = vrot.slane %v2880_v46, %v5158_v9 }
0x12d5   :  { %2978 = vmatprep.subr.bf16.mxu1 %v4320_v53  ;;  %3881 = vmatprep.subr.bf16.mxu0 %v4343_v44 }
0x12d7   :  { %2829 = vadd.xlane.f32.xlu0 %v2826_v47  ;;  %v2885_v47 = vrot.slane %v2880_v46, %v5162_v20 }
0x12d8   :  { %2979 = vmatpush1.bf16.msra.mxu1 %v4318_v32 }
0x12d9   :  { %2980 = vmatprep.subr.bf16.mxu1 %v4323_v8 }
0x12dc   :  { %2981 = vmatpush1.bf16.msra.mxu1 %v4321_v23 }
0x12dd   :  { %2982 = vmatprep.subr.bf16.mxu1 %v4326_v55 }
0x12e0   :  { %2983 = vmatpush1.bf16.msra.mxu1 %v4324_v56 }
0x12e1   :  { %2984 = vmatprep.subr.bf16.mxu1 %v4329_v57 }
0x12e4   :  { %2985 = vmatpush1.bf16.msra.mxu1 %v4327_v58 }
0x12e5   :  { %2986 = vmatprep.subr.bf16.mxu1 %v4332_v59 }
0x12e8   :  { %2987 = vmatpush1.bf16.msra.mxu1 %v4330_v60 }
0x12e9   :  { %4087 = vmatprep.subr.bf16.mxu1 %v4826_v5 }
0x1358   :  { %v2820_v61 = vpop.xlane.xlu0 %2819 }
0x1359   :  { %v2823_v37 = vmul.f32 0.0078125, %v2820_v61 }
0x135b   :  { %v2833_v0 = vmul.f32 %v2823_v37, %v2823_v37  ;;  %v2837_v16 = vsub.f32 %v5406_v40, %v2823_v37  ;;  %v4344_v40 = vld [vmem:[#allocation18 + $0x90] sm:$0xff]  }
0x135c   :  { %v2828_v62 = vpop.xlane.xlu0 %2827  ;;  %v2822_v63 = vpop.xlane.xlu1 %2821  ;;  %3882 = vmatpush3.bf16.msra.mxu0 %v4344_v40 }
0x135d   :  { %v2831_v1 = vmul.f32 0.0078125, %v2828_v62  ;;  %v2824_v2 = vmul.f32 0.0078125, %v2822_v63  ;;  %3883 = vmatprep.subr.bf16.mxu0 %v4345_v34 }
0x135f   :  { %v2835_v3 = vsub.f32 %v2831_v1, %v2833_v0  ;;  %v2834_v10 = vmul.f32 %v2824_v2, %v2824_v2  ;;  %v2838_v24 = vsub.f32 %v2814_v45, %v2824_v2  ;;  %v4348_v45 = vld [vmem:[#allocation18 + $0x80] sm:$0xff]  }
0x1360   :  { %v2830_v39 = vpop.xlane.xlu0 %2829  ;;  %3884 = vmatpush3.bf16.msra.mxu0 %v4346_v54 }
0x1361   :  { %v2839_v7 = vadd.f32 1e-05, %v2835_v3  ;;  %v2832_v12 = vmul.f32 0.0078125, %v2830_v39  ;;  %3885 = vmatprep.subr.bf16.mxu0 %v4347_v18 }
0x1363   :  { %4449 = vrsqrt.f32 %v2839_v7  ;;  %v2836_v13 = vsub.f32 %v2832_v12, %v2834_v10 }
0x1364   :  { %3886 = vmatpush3.bf16.msra.mxu0 %v4348_v45 }
0x1365   :  { %v2840_v14 = vadd.f32 1e-05, %v2836_v13  ;;  %4107 = vmatprep.subr.bf16.mxu0 %v4826_v5 }
0x1367   :  { %4451 = vrsqrt.f32 %v2840_v14 }
0x1370   :  { %v4450_v19 = vpop.eup %4449 }
0x1371   :  { %v2843_v21 = vmul.f32 %v4450_v19, %v2837_v16 }
0x1373   :  { %v2851_v33 = vmul.f32 %v3726_v22, %v2843_v21 }
0x1374   :  { %v4452_v25 = vpop.eup %4451 }
0x1375   :  { %v2844_v26 = vmul.f32 %v4452_v25, %v2838_v24  ;;  %v5420_v15 = vadd.f32 %v3727_v27, %v2851_v33 }
0x1377   :  { %v2852_v28 = vmul.f32 %v3726_v22, %v2844_v26 }
0x1379   :  { %v5422_v29 = vadd.f32 %v3727_v27, %v2852_v28 }
0x137b   :  { %v2861_v11 = vpack.c.bf16 %v5422_v29, %v5420_v15 }
0x137d   :  { %3005 = vmatmul.mubr.bf16.vlgmr.msra.gmra.mxu1 %v2861_v11 }
0x137e   :  { %4103 = vmatprep.mubr.msk.bf16.mxu1 %vm4828_vm7, %v4826_v5  ;;  %4088 = vmatpush3.bf16.msra.mxu1 %v4349_v4 }
0x137f   :  { %4089 = vmatprep.subr.bf16.mxu1 %v4826_v5 }
0x143d   :  { %v3006_v49 = vpop.f32.mrf.mxu1 }
0x143e   :  { %v3007_v31 = vadd.f32 %v3006_v49, %v2885_v47  ;;  %v4351_v49 = vld [vmem:[#allocation21 + $0x28] sm:$0xff]  }
0x143f   :  { %v3008_v50 = vpop.f32.mrf.mxu1 }
0x1440   :  { %v3015_v51 = vmul.f32 %v3007_v31, %v3007_v31  ;;  %v3009_v52 = vadd.f32 %v3008_v50, %v2889_v48  ;;  %v4354_v50 = vld [vmem:[#allocation21 + $0x10] sm:$0xff]  }
0x1441   :  { %v3010_v32 = vpop.f32.mrf.mxu1 }
0x1442   :  { %v3019_v53 = vmul.f32 %v3015_v51, %v3007_v31  ;;  %v3016_v8 = vmul.f32 %v3009_v52, %v3009_v52  ;;  %v3011_v23 = vadd.f32 %v3010_v32, %v2885_v47  ;;  %v4356_v51 = vld [vmem:[#allocation21] sm:$0xff]   ;;  %v4358_v32 = vld [vmem:[#allocation24 + $0x30] sm:$0xff]  }
0x1443   :  { %v3012_v55 = vpop.f32.mrf.mxu1 }
0x1444   :  { %v3023_v56 = vmul.f32 0.044715, %v3019_v53  ;;  %v3020_v57 = vmul.f32 %v3016_v8, %v3009_v52  ;;  %v3017_v58 = vmul.f32 %v3011_v23, %v3011_v23  ;;  %v3013_v59 = vadd.f32 %v3012_v55, %v2889_v48  ;;  %v4350_v48 = vld [vmem:[#allocation21 + $0x30] sm:$0xff]  }
0x1445   :  { %4090 = vmatpush3.bf16.msra.mxu1 %v4350_v48  ;;  %v4359_v53 = vld [vmem:[#allocation24 + $0x28] sm:$0xff]  }
0x1446   :  { %v3027_v60 = vadd.f32 %v3023_v56, %v3007_v31  ;;  %v3024_v61 = vmul.f32 0.044715, %v3020_v57  ;;  %v3021_v37 = vmul.f32 %v3017_v58, %v3011_v23  ;;  %v3018_v20 = vmul.f32 %v3013_v59, %v3013_v59  ;;  %4091 = vmatprep.subr.bf16.mxu1 %v4826_v5 }
0x1448   :  { %v3031_v62 = vmul.f32 0.7978846, %v3027_v60  ;;  %v3028_v9 = vadd.f32 %v3024_v61, %v3009_v52  ;;  %v3025_v63 = vmul.f32 0.044715, %v3021_v37  ;;  %v3022_v0 = vmul.f32 %v3018_v20, %v3013_v59 }
0x1449   :  { %4092 = vmatpush3.bf16.msra.mxu1 %v4351_v49 }
0x144a   :  { %v3032_v1 = vmul.f32 0.7978846, %v3028_v9  ;;  %v3029_v2 = vadd.f32 %v3025_v63, %v3011_v23  ;;  %v3026_v3 = vmul.f32 0.044715, %v3022_v0  ;;  %4453 = vtanh.f32 %v3031_v62  ;;  %4093 = vmatprep.subr.bf16.mxu1 %v4826_v5 }
0x144c   :  { %4455 = vtanh.f32 %v3032_v1  ;;  %v3033_v39 = vmul.f32 0.7978846, %v3029_v2  ;;  %v3030_v7 = vadd.f32 %v3026_v3, %v3013_v59  ;;  %v3763_v2 = vld [vmem:[%s5480_s16 + $0x1] ss:$0 sm:$0xff]  ;;  %s4830_s16 = smov [#allocation27]  }
0x144d   :  { %s3500_s3 = sshll.u32 %s4830_s16, 4  ;;  %s3501_s3 = int_to_ptr.vmem [resolvable:$true] %s3500_s3 }
0x144e   :  { %4457 = vtanh.f32 %v3033_v39  ;;  %v3034_v10 = vmul.f32 0.7978846, %v3030_v7  ;;  %v3764_v39 = vld [vmem:[%s5506_s24 + $0x1] ss:$0 sm:$0xff]  ;;  %s4759_s15 = scalar_lea.vmem %s3501_s3, 256  ;;  %p4764_p8 = scmp.lt.s32.totalorder %s3501_s3, %s3501_s3 }
0x144f   :  { %p4760_p7 = scmp.ne.s32.totalorder %s3501_s3, %s4759_s15  ;;  %p4765_p9 = scmp.lt.s32.totalorder %s4759_s15, %s4759_s15 }
0x1450   :  { %4459 = vtanh.f32 %v3034_v10 }
0x1451   :  { %p4766_p10 = por %p4765_p9, %p4764_p8 }
0x1453   :  { %p4767_p11 = pnand %p4766_p10, %p4760_p7 }
0x1457   :  { %v4454_v12 = vpop.eup %4453 }
0x1458   :  { %v3039_v19 = vadd.f32 1.0, %v4454_v12 }
0x1459   :  { %v4456_v13 = vpop.eup %4455 }
0x145a   :  { %v3040_v14 = vadd.f32 1.0, %v4456_v13  ;;  %v3043_v33 = vmul.f32 0.5, %v3039_v19 }
0x145b   :  { %v4458_v16 = vpop.eup %4457 }
0x145c   :  { %v3041_v21 = vadd.f32 1.0, %v4458_v16  ;;  %v3044_v26 = vmul.f32 0.5, %v3040_v14  ;;  %v3047_v35 = vmul.f32 %v3043_v33, %v3007_v31  ;;  %v4352_v31 = vld [vmem:[#allocation21 + $0x20] sm:$0xff]  }
0x145d   :  { %v4460_v22 = vpop.eup %4459  ;;  %4094 = vmatpush3.bf16.msra.mxu1 %v4352_v31  ;;  %v4364_v33 = vld [vmem:[#allocation24] sm:$0xff]  }
0x145e   :  { %v3045_v24 = vmul.f32 0.5, %v3041_v21  ;;  %v3042_v25 = vadd.f32 1.0, %v4460_v22  ;;  %v3048_v11 = vmul.f32 %v3044_v26, %v3009_v52  ;;  %4095 = vmatprep.subr.bf16.mxu1 %v4826_v5  ;;  %v4357_v52 = vld [vmem:[#allocation24 + $0x38] sm:$0xff]   ;;  %v4360_v22 = vld [vmem:[#allocation24 + $0x20] sm:$0xff]   ;;  %v4363_v26 = vld [vmem:[#allocation24 + $0x8] sm:$0xff]  }
0x1460   :  { %v3046_v27 = vmul.f32 0.5, %v3042_v25  ;;  %v3049_v28 = vmul.f32 %v3045_v24, %v3011_v23  ;;  %v4361_v24 = vld [vmem:[#allocation24 + $0x18] sm:$0xff]   ;;  %v4362_v25 = vld [vmem:[#allocation24 + $0x10] sm:$0xff]  }
0x1462   :  { %v3050_v30 = vmul.f32 %v3046_v27, %v3013_v59  ;;  %v3051_v38 = vpack.c.bf16 %v3049_v28, %v3047_v35  ;;  %v3298_v27 = vld [vmem:[#allocation22] sm:$0x1] }
0x1464   :  { %v3052_v36 = vpack.c.bf16 %v3050_v30, %v3048_v11 }
0x1466   :  { %3222 = vmatprep.mubr.bf16.mxu0 %v3052_v36 }
0x1467   :  { %3223 = vmatmul.mubr.bf16.vlgmr.msra.gmra.mxu0 %v3051_v38 }
0x1468   :  { %4123 = vmatprep.mubr.msk.bf16.mxu0 %vm4828_vm7, %v4826_v5  ;;  %4108 = vmatpush3.bf16.msra.mxu0 %v4357_v52 }
0x1469   :  { %4109 = vmatprep.subr.bf16.mxu0 %v4826_v5 }
0x146c   :  { %4110 = vmatpush3.bf16.msra.mxu0 %v4358_v32 }
0x146d   :  { %4111 = vmatprep.subr.bf16.mxu0 %v4826_v5 }
0x1470   :  { %4112 = vmatpush3.bf16.msra.mxu0 %v4359_v53 }
0x1471   :  { %4113 = vmatprep.subr.bf16.mxu0 %v4826_v5 }
0x1474   :  { %4114 = vmatpush3.bf16.msra.mxu0 %v4360_v22 }
0x1475   :  { %4115 = vmatprep.subr.bf16.mxu0 %v4826_v5 }
0x1478   :  { %4116 = vmatpush3.bf16.msra.mxu0 %v4361_v24 }
0x1479   :  { %4117 = vmatprep.subr.bf16.mxu0 %v4826_v5 }
0x147c   :  { %4118 = vmatpush3.bf16.msra.mxu0 %v4362_v25 }
0x147d   :  { %4119 = vmatprep.subr.bf16.mxu0 %v4826_v5 }
0x1480   :  { %4120 = vmatpush3.bf16.msra.mxu0 %v4363_v26 }
0x1481   :  { %4121 = vmatprep.subr.bf16.mxu0 %v4826_v5 }
0x1484   :  { %4122 = vmatpush3.bf16.msra.mxu0 %v4364_v33 }
0x1527   :  { %v3887_v41 = vpop.f32.mrf.mxu0 }
0x1529   :  { %v3888_v43 = vpop.f32.mrf.mxu0 }
0x152a   :  { %v3889_v6 = vadd.f32 %v3888_v43, %v3887_v41 }
0x152b   :  { %v3890_v17 = vpop.f32.mrf.mxu0 }
0x152c   :  { %v3225_v44 = vadd.f32 %v3889_v6, %v3744_v42 }
0x152d   :  { %v3891_v40 = vpop.f32.mrf.mxu0 }
0x152e   :  { %v3892_v34 = vadd.f32 %v3891_v40, %v3890_v17  ;;  %v3231_v54 = vadd.f32 %v3225_v44, %v5420_v15  ;;  %v4353_v15 = vld [vmem:[#allocation21 + $0x18] sm:$0xff]  }
0x152f   :  { %4096 = vmatpush3.bf16.msra.mxu1 %v4353_v15 }
0x1530   :  { %v3228_v18 = vadd.f32 %v3892_v34, %v3744_v42  ;;  %3237 = vadd.xlane.f32.xlu0 %v3231_v54  ;;  %v3243_v45 = vmul.f32 %v3231_v54, %v3231_v54  ;;  %4097 = vmatprep.subr.bf16.mxu1 %v4826_v5 }
0x1532   :  { %3245 = vadd.xlane.f32.xlu1 %v3243_v45  ;;  %v3232_v46 = vadd.f32 %v3228_v18, %v5422_v29  ;;  %v4355_v29 = vld [vmem:[#allocation21 + $0x8] sm:$0xff]  }
0x1533   :  { %4098 = vmatpush3.bf16.msra.mxu1 %v4354_v50 }
0x1534   :  { %3239 = vadd.xlane.f32.xlu0 %v3232_v46  ;;  %v3244_v47 = vmul.f32 %v3232_v46, %v3232_v46  ;;  %4099 = vmatprep.subr.bf16.mxu1 %v4826_v5 }
0x1536   :  { %3247 = vadd.xlane.f32.xlu1 %v3244_v47 }
0x1537   :  { %4100 = vmatpush3.bf16.msra.mxu1 %v4355_v29 }
0x1538   :  { %4101 = vmatprep.subr.bf16.mxu1 %v4826_v5 }
0x153b   :  { %4102 = vmatpush3.bf16.msra.mxu1 %v4356_v51 }
0x15b9   :  { %v3238_v8 = vpop.xlane.xlu0 %3237 }
0x15ba   :  { %v3241_v23 = vmul.f32 0.0078125, %v3238_v8 }
0x15bb   :  { %v3246_v55 = vpop.xlane.xlu1 %3245 }
0x15bc   :  { %v3251_v56 = vmul.f32 %v3241_v23, %v3241_v23  ;;  %v3249_v57 = vmul.f32 0.0078125, %v3246_v55  ;;  %v3255_v0 = vsub.f32 %v3231_v54, %v3241_v23 }
0x15bd   :  { %v3240_v58 = vpop.xlane.xlu0 %3239 }
0x15be   :  { %v3253_v59 = vsub.f32 %v3249_v57, %v3251_v56  ;;  %v3242_v60 = vmul.f32 0.0078125, %v3240_v58 }
0x15bf   :  { %v3248_v61 = vpop.xlane.xlu1 %3247 }
0x15c0   :  { %v3257_v37 = vadd.f32 1e-05, %v3253_v59  ;;  %v3252_v20 = vmul.f32 %v3242_v60, %v3242_v60  ;;  %v3250_v62 = vmul.f32 0.0078125, %v3248_v61  ;;  %v3256_v7 = vsub.f32 %v3232_v46, %v3242_v60 }
0x15c2   :  { %4461 = vrsqrt.f32 %v3257_v37  ;;  %v3254_v9 = vsub.f32 %v3250_v62, %v3252_v20 }
0x15c4   :  { %v3258_v63 = vadd.f32 1e-05, %v3254_v9 }
0x15c6   :  { %4463 = vrsqrt.f32 %v3258_v63 }
0x15cf   :  { %v4462_v1 = vpop.eup %4461 }
0x15d0   :  { %v3261_v3 = vmul.f32 %v4462_v1, %v3255_v0 }
0x15d2   :  { %v3269_v10 = vmul.f32 %v3763_v2, %v3261_v3 }
0x15d3   :  { %v4464_v12 = vpop.eup %4463 }
0x15d4   :  { %v3277_v13 = vadd.f32 %v3764_v39, %v3269_v10  ;;  %v3262_v14 = vmul.f32 %v4464_v12, %v3256_v7 }
0x15d6   :  { %v3281_v16 = vpack.c.bf16 %v3277_v13, %v3277_v13  ;;  %3279 = vst [vmem:[#allocation27] sm:$0xff] %v3277_v13  ;;  %v3270_v19 = vmul.f32 %v3763_v2, %v3262_v14 }
0x15d8   :  { %4104 = vmatmul.mubr.bf16.vlgmr.msra.gmra.mxu1 %v3281_v16  ;;  %v3278_v21 = vadd.f32 %v3764_v39, %v3270_v19 }
0x15da   :  { %3280 = vst [vmem:[#allocation27 + $0x8] sm:$0xff] %v3278_v21 }
0x1698   :  { %v3381_v28 = vpop.f32.mrf.mxu1 }
0x1699   :  { %v3382_v11 = vadd.f32 %v3381_v28, %v3298_v27 }
0x169a   :  { %v4105_v30 = vpop.f32.mrf.mxu1 }
0x169b   :  { %4465 = vtanh.f32 %v3382_v11 }
0x169c   :  { %v3384_v35 = vpop.f32.mrf.mxu1 }
0x169e   :  { %v4106_v36 = vpop.f32.mrf.mxu1 }
0x16a8   :  { %v4466_v38 = vpop.eup %4465 }
0x16a9   :  { %v3388_v4 = vpack.c.bf16 %v4466_v38, %v4466_v38 }
0x16ab   :  { %4124 = vmatmul.mubr.bf16.vlgmr.msra.gmra.mxu0 %v3388_v4 }
0x16ac   :  { %4770 = shalt.err (!%p4767_p11)
}
0x16ad   :  { %3506 = dma.vmem_to_hbm [thread:$0]  %s3501_s3, 256, %s5486_s22, [#allocation6], %s4802_s17, %s4802_s17, %s4803_s7   ;;  %v3405_v5 = vld [vmem:[#allocation25] sm:$0x1] }
0x176b   :  { %v3488_v41 = vpop.f32.mrf.mxu0 }
0x176c   :  { %v3489_v42 = vadd.f32 %v3488_v41, %v3405_v5 }
0x176d   :  { %v4125_v43 = vpop.f32.mrf.mxu0 }
0x176e   :  { %3494 = vst [vmem:[%s5487_s23] sm:$0x1] %v3489_v42 }
0x176f   :  { %v3491_v6 = vpop.f32.mrf.mxu0 }
0x1771   :  { %v4126_v17 = vpop.f32.mrf.mxu0 }
0x1772   :  { %4797 = dma.done.wait [#allocation6], 256  }
0x1773   :  { %4798 = vsyncadd [#allocation6], 4294967040 }
0x1774   :  { %3514 = vsyncpa [#allocation5], 1 }
0x1775   :  { %3515 = vsyncpa [#allocation8], 1 }
0x1776   :  { %3516 = vsyncpa [#allocation11], 1 }
0x1777   :  { %3517 = vsyncpa [#allocation14], 1 }
0x1778   :  { %3518 = vsyncpa [#allocation17], 1 }
0x1779   :  { %3519 = vsyncpa [#allocation20], 1 }
0x177a   :  { %3520 = vsyncpa [#allocation23], 1 }
0x177b   :  { %3521 = vsyncpa [#allocation26], 1 }
0x177c   :  { %3522 = vsyncpa [#allocation6], 1 }

</bundles_post_ra>
